<compile_context>
chip_gen: v7x
topology: tpu7x:2x2x1
jax: 0.10.0
libtpu: 0.0.40
codegen_flags: <defaults>
</compile_context>

<pallas_src>
import functools
import math

import jax
import jax.numpy as jnp
import numpy as np
from jax import lax
from jax.experimental import pallas as pl
from jax.experimental.pallas import tpu as pltpu

_EPS = 1e-5
_NEG = -1e30
_PREC = jax.lax.Precision.HIGHEST       # in-kernel matmul precision
_PREC_REF = jax.lax.Precision.HIGHEST   # reference matmul precision


# ----------------------------------------------------------------------------
# In-kernel math (operates on batch-fused 2D tensors).
# ----------------------------------------------------------------------------
def _dot(a, b):
    return jnp.dot(a, b, precision=_PREC, preferred_element_type=jnp.float32)


def _layernorm(x, g, b):
    mu = jnp.mean(x, axis=-1, keepdims=True)
    var = jnp.mean((x - mu) ** 2, axis=-1, keepdims=True)
    return (x - mu) * lax.rsqrt(var + _EPS) * g + b


def _block_mask(nq, nk, per_q, per_k, B):
    """(nq, nk) additive mask: 0 within the same batch element, -1e30 across.

    Built with 2D iota compares (no integer division, no host DMA); B is a small
    static count so the per-batch indicator loop unrolls to a few VPU compares.
    """
    ri = lax.broadcasted_iota(jnp.int32, (nq, nk), 0)
    ci = lax.broadcasted_iota(jnp.int32, (nq, nk), 1)
    same = ri < 0                                    # all-False
    for b in range(B):
        same = same | ((ri >= b * per_q) & (ri < (b + 1) * per_q)
                       & (ci >= b * per_k) & (ci < (b + 1) * per_k))
    return jnp.where(same, 0.0, _NEG)


def _attend(q, k, v, mask, ow_t, ob, n_heads):
    """Scaled-dot-product attention over batch-fused rows.

    q: (Nq, C) / k, v: (Nk, C), already projected (+bias).  `mask` is the
    block-diagonal batch mask.  Head outputs are concatenated at static lane
    offsets (within one vreg) and fed through a single out-projection matmul.
    """
    C = q.shape[-1]
    dh = C // n_heads
    scale = 1.0 / math.sqrt(dh)
    heads = []
    for h in range(n_heads):                       # small static head count
        sl = slice(h * dh, (h + 1) * dh)
        s = lax.dot_general(q[:, sl] * scale, k[:, sl],
                            (((1,), (1,)), ((), ())),
                            precision=_PREC, preferred_element_type=jnp.float32)
        s = s + mask
        s = s - jnp.max(s, axis=-1, keepdims=True)
        p = jnp.exp(s)
        d = jnp.sum(p, axis=-1, keepdims=True)
        r = pl.reciprocal(d, approx=True)          # EUP vrcp seed (free slot)
        r = r * (2.0 - d * r)                      # one Newton step -> f32-exact
        heads.append(_dot(p * r, v[:, sl]))        # (Nq, dh)
    o = jnp.concatenate(heads, axis=-1)            # (Nq, C), static lane offsets
    return _dot(o, ow_t) + ob                      # single out-proj matmul


def act_decoder_layer_kernel(acts_ref, wqkv_ref, wout_ref, vec_ref, out_ref,
                             *, B, DS, ES, C, F, n_heads, pre_norm):
    NX, NE = B * DS, B * ES
    C2, C3 = 2 * C, 3 * C

    # ---- unpack activation slab (rows: x | enc | dpos | epos) ----
    x    = acts_ref[0:NX, :]                                  # (B*DS, C)
    enc  = acts_ref[NX:NX + NE, :]                            # (B*ES, C)
    dpos = acts_ref[NX + NE:NX + NE + DS, :]                  # (DS, C)
    epos = acts_ref[NX + NE + DS:NX + NE + DS + ES, :]        # (ES, C)
    dpos_t = jnp.concatenate([dpos] * B, axis=0)              # (B*DS, C)

    # ---- unpack vector slab ----
    vecs = vec_ref[...]
    sa_bqk, sa_bv = vecs[0:1, 0:C2], vecs[0:1, C2:C3]
    ca_bq, ca_bkv = vecs[1:2, 0:C], vecs[1:2, C:C3]
    b1 = vecs[2:3, 0:F]
    sa_ob, ca_ob, b2 = vecs[3:4, 0:C], vecs[4:5, 0:C], vecs[5:6, 0:C]
    g1, be1 = vecs[6:7, 0:C], vecs[7:8, 0:C]
    g2, be2 = vecs[8:9, 0:C], vecs[9:10, 0:C]
    g3, be3 = vecs[10:11, 0:C], vecs[11:12, 0:C]

    # ---- block-diagonal batch masks (built in-kernel, no DMA) ----
    smask = _block_mask(NX, NX, DS, DS, B)
    cmask = _block_mask(NX, NE, DS, ES, B)

    # ================= self-attention block =================
    skip = x
    xn = _layernorm(x, g1, be1) if pre_norm else x
    qk = xn + dpos_t
    qk_p = _dot(qk, wqkv_ref[0:C, 0:C2]) + sa_bqk             # fused Q|K proj
    v_p  = _dot(xn, wqkv_ref[0:C, C2:C3]) + sa_bv             # V proj
    sa = _attend(qk_p[:, 0:C], qk_p[:, C:C2], v_p, smask,
                 wout_ref[0:C, :], sa_ob, n_heads)
    x = skip + sa                                             # dropout1 == identity

    # ================= cross-attention block =================
    if pre_norm:
        skip = x
        xn = _layernorm(x, g2, be2)
    else:
        x = _layernorm(x, g1, be1)
        xn = x
        skip = x
    q_p  = _dot(xn + dpos_t, wqkv_ref[C:C2, 0:C]) + ca_bq     # Q proj
    kv_p = _dot(enc, wqkv_ref[C:C2, C:C3]) + ca_bkv           # fused K|V proj
    epk  = _dot(epos, wqkv_ref[C:C2, C:C2])                   # (ES, C) epos @ Wk
    k_p  = kv_p[:, 0:C] + jnp.concatenate([epk] * B, axis=0)
    ca = _attend(q_p, k_p, kv_p[:, C:C2], cmask,
                 wout_ref[C:C2, :], ca_ob, n_heads)
    x = skip + ca                                             # dropout2 == identity

    # ================= feed-forward block =================
    if pre_norm:
        skip = x
        xn = _layernorm(x, g3, be3)
    else:
        x = _layernorm(x, g2, be2)
        xn = x
        skip = x
    h = jnp.maximum(_dot(xn, wqkv_ref[C2:C3, 0:F]) + b1, 0.0)  # activation = relu
    ff = _dot(h, wout_ref[C2:C2 + F, :]) + b2
    x = skip + ff                                              # dropout3 == identity
    if not pre_norm:
        x = _layernorm(x, g3, be3)

    out_ref[...] = x                                           # single slab store


# ----------------------------------------------------------------------------
# Wrapper: one-time weight packing + jitted forward.
# ----------------------------------------------------------------------------
def _prep_params(p, C, F):
    """Pack PyTorch-layout params into the kernel's three weight/vector slabs."""
    wide = max(3 * C, F)
    sa_w = np.asarray(p["sa_w"], np.float32)       # (3C, C)
    ca_w = np.asarray(p["ca_w"], np.float32)
    w1 = np.asarray(p["w1"], np.float32)           # (F, C)
    w2 = np.asarray(p["w2"], np.float32)           # (C, F)
    sa_ow = np.asarray(p["sa_ow"], np.float32)     # (C, C)
    ca_ow = np.asarray(p["ca_ow"], np.float32)

    wqkv = np.zeros((3 * C, wide), np.float32)
    wqkv[0:C, 0:3 * C] = sa_w.T                    # [Wq^T | Wk^T | Wv^T]
    wqkv[C:2 * C, 0:3 * C] = ca_w.T
    wqkv[2 * C:3 * C, 0:F] = w1.T                  # (C, F)

    wout = np.zeros((2 * C + F, C), np.float32)
    wout[0:C] = sa_ow.T
    wout[C:2 * C] = ca_ow.T
    wout[2 * C:2 * C + F] = w2.T                   # (F, C)

    vecs = np.zeros((12, wide), np.float32)
    vecs[0, 0:3 * C] = np.asarray(p["sa_b"], np.float32).reshape(-1)
    vecs[1, 0:3 * C] = np.asarray(p["ca_b"], np.float32).reshape(-1)
    vecs[2, 0:F] = np.asarray(p["b1"], np.float32).reshape(-1)
    vecs[3, 0:C] = np.asarray(p["sa_ob"], np.float32).reshape(-1)
    vecs[4, 0:C] = np.asarray(p["ca_ob"], np.float32).reshape(-1)
    vecs[5, 0:C] = np.asarray(p["b2"], np.float32).reshape(-1)
    for i, nm in enumerate(("g1", "be1", "g2", "be2", "g3", "be3")):
        vecs[6 + i, 0:C] = np.asarray(p[nm], np.float32).reshape(-1)
    return jnp.asarray(wqkv), jnp.asarray(wout), jnp.asarray(vecs)


def make_act_decoder_layer(params, *, n_heads, pre_norm):
    """Prep weights once and return a jitted forward:
    (DS,B,C), (ES,B,C), (DS,1,C), (ES,1,C) -> (DS,B,C)."""
    C = int(params["sa_ow"].shape[0])
    F = int(params["w1"].shape[0])
    wqkv, wout, vecs = _prep_params(params, C, F)

    def fwd(x_sbc, enc_sbc, dec_pos, enc_pos):
        DS, B, _ = x_sbc.shape
        ES = enc_sbc.shape[0]
        x2 = jnp.transpose(x_sbc, (1, 0, 2)).reshape(B * DS, C)
        enc2 = jnp.transpose(enc_sbc, (1, 0, 2)).reshape(B * ES, C)
        acts = jnp.concatenate(
            [x2, enc2, dec_pos[:, 0, :], enc_pos[:, 0, :]],
            axis=0).astype(jnp.float32)

        kernel = functools.partial(
            act_decoder_layer_kernel,
            B=B, DS=DS, ES=ES, C=C, F=F, n_heads=n_heads, pre_norm=pre_norm)
        out2 = pl.pallas_call(
            kernel,
            out_shape=jax.ShapeDtypeStruct((B * DS, C), jnp.float32),
            in_specs=[pl.BlockSpec(memory_space=pltpu.MemorySpace.VMEM)] * 4,
            out_specs=pl.BlockSpec(memory_space=pltpu.MemorySpace.VMEM),
        )(acts, wqkv, wout, vecs)
        return jnp.transpose(out2.reshape(B, DS, C), (1, 0, 2))

    return jax.jit(fwd)


# ----------------------------------------------------------------------------
# Pure-JAX reference (independent per-batch, per-head implementation).
# ----------------------------------------------------------------------------
def _ref_dot(a, b):
    return jnp.dot(a, b, precision=_PREC_REF, preferred_element_type=jnp.float32)


def _ref_mha_2d(q_in, k_in, v_in, in_w, in_b, out_w, out_b, n_heads):
    C = q_in.shape[-1]
    dh = C // n_heads
    scale = 1.0 / math.sqrt(dh)
    wq, wk, wv = in_w[:C], in_w[C:2 * C], in_w[2 * C:]
    bq, bk, bv = in_b[:, :C], in_b[:, C:2 * C], in_b[:, 2 * C:]
    q = _ref_dot(q_in, wq.T) + bq
    k = _ref_dot(k_in, wk.T) + bk
    v = _ref_dot(v_in, wv.T) + bv
    heads = []
    for h in range(n_heads):
        qh = q[:, h * dh:(h + 1) * dh] * scale
        kh = k[:, h * dh:(h + 1) * dh]
        vh = v[:, h * dh:(h + 1) * dh]
        s = _ref_dot(qh, kh.T)
        s = s - jnp.max(s, axis=-1, keepdims=True)
        p = jnp.exp(s)
        p = p / jnp.sum(p, axis=-1, keepdims=True)
        heads.append(_ref_dot(p, vh))
    o = jnp.concatenate(heads, axis=-1)
    return _ref_dot(o, out_w.T) + out_b


def _ref_layer_2d(x, enc, dpos, epos, p, n_heads, pre_norm):
    skip = x
    xn = _layernorm(x, p["g1"], p["be1"]) if pre_norm else x
    qk = xn + dpos
    sa = _ref_mha_2d(qk, qk, xn, p["sa_w"], p["sa_b"], p["sa_ow"], p["sa_ob"], n_heads)
    x = skip + sa
    if pre_norm:
        skip = x
        xn = _layernorm(x, p["g2"], p["be2"])
    else:
        x = _layernorm(x, p["g1"], p["be1"])
        xn = x
        skip = x
    ca = _ref_mha_2d(xn + dpos, enc + epos, enc,
                     p["ca_w"], p["ca_b"], p["ca_ow"], p["ca_ob"], n_heads)
    x = skip + ca
    if pre_norm:
        skip = x
        xn = _layernorm(x, p["g3"], p["be3"])
    else:
        x = _layernorm(x, p["g2"], p["be2"])
        xn = x
        skip = x
    h = jnp.maximum(_ref_dot(xn, p["w1"].T) + p["b1"], 0.0)
    ff = _ref_dot(h, p["w2"].T) + p["b2"]
    x = skip + ff
    if not pre_norm:
        x = _layernorm(x, p["g3"], p["be3"])
    return x


def reference(x_sbc, enc_sbc, dec_pos, enc_pos, params, *, n_heads, pre_norm):
    x = jnp.transpose(x_sbc, (1, 0, 2)).astype(jnp.float32)
    enc = jnp.transpose(enc_sbc, (1, 0, 2)).astype(jnp.float32)
    dpos = dec_pos[:, 0, :].astype(jnp.float32)
    epos = enc_pos[:, 0, :].astype(jnp.float32)
    outs = [_ref_layer_2d(x[b], enc[b], dpos, epos, params, n_heads, pre_norm)
            for b in range(x.shape[0])]
    return jnp.transpose(jnp.stack(outs, 0), (1, 0, 2))


if __name__ == "__main__":
    DS, ES, B, C, H, F = 8, 16, 2, 32, 4, 64   # dim_model=32, n_heads=4, dim_feedforward=64

    key = jax.random.PRNGKey(0)
    ks = jax.random.split(key, 24)

    def nrm(k, shape, scale=0.05):
        return (scale * jax.random.normal(k, shape)).astype(jnp.float32)

    params = {
        "sa_w": nrm(ks[0], (3 * C, C)), "sa_b": nrm(ks[1], (1, 3 * C)),
        "sa_ow": nrm(ks[2], (C, C)),    "sa_ob": nrm(ks[3], (1, C)),
        "ca_w": nrm(ks[4], (3 * C, C)), "ca_b": nrm(ks[5], (1, 3 * C)),
        "ca_ow": nrm(ks[6], (C, C)),    "ca_ob": nrm(ks[7], (1, C)),
        "w1": nrm(ks[8], (F, C)),       "b1": nrm(ks[9], (1, F)),
        "w2": nrm(ks[10], (C, F)),      "b2": nrm(ks[11], (1, C)),
        "g1": (1.0 + nrm(ks[12], (1, C), 0.1)), "be1": nrm(ks[13], (1, C), 0.1),
        "g2": (1.0 + nrm(ks[14], (1, C), 0.1)), "be2": nrm(ks[15], (1, C), 0.1),
        "g3": (1.0 + nrm(ks[16], (1, C), 0.1)), "be3": nrm(ks[17], (1, C), 0.1),
    }

    x = jax.random.normal(ks[18], (DS, B, C), jnp.float32)          # decoder tokens
    encoder_out = jax.random.normal(ks[19], (ES, B, C), jnp.float32)
    decoder_pos = jax.random.normal(ks[20], (DS, 1, C), jnp.float32)
    encoder_pos = jax.random.normal(ks[21], (ES, 1, C), jnp.float32)

    for pre_norm in (False, True):
        layer = make_act_decoder_layer(params, n_heads=H, pre_norm=pre_norm)
        out = layer(x, encoder_out, decoder_pos, encoder_pos)
        out = jax.block_until_ready(out)
        ref = reference(x, encoder_out, decoder_pos, encoder_pos, params,
                        n_heads=H, pre_norm=pre_norm)
        np.testing.assert_allclose(np.asarray(out), np.asarray(ref),
                                   rtol=2e-4, atol=2e-4)

    print("KERNEL_OK")
</pallas_src>

<mosaic_0001>
module attributes {stable_mosaic.version = 11 : i64} {
  func.func @act_decoder_layer_kernel(%arg0: memref<72x32xf32, #tpu.memory_space<vmem>>, %arg1: memref<96x96xf32, #tpu.memory_space<vmem>>, %arg2: memref<128x32xf32, #tpu.memory_space<vmem>>, %arg3: memref<12x96xf32, #tpu.memory_space<vmem>>, %arg4: memref<16x32xf32, #tpu.memory_space<vmem>>) attributes {dimension_semantics = [], scalar_prefetch = 0 : i64, scratch_operands = 0 : i64, tpu.core_type = #tpu.core_type<tc>} {
    %c0 = arith.constant 0 : index
    %c0_0 = arith.constant 0 : index
    %0 = vector.load %arg0[%c0, %c0_0] : memref<72x32xf32, #tpu.memory_space<vmem>>, vector<16x32xf32>
    %c16 = arith.constant 16 : index
    %c0_1 = arith.constant 0 : index
    %1 = vector.load %arg0[%c16, %c0_1] : memref<72x32xf32, #tpu.memory_space<vmem>>, vector<32x32xf32>
    %c48 = arith.constant 48 : index
    %c0_2 = arith.constant 0 : index
    %2 = vector.load %arg0[%c48, %c0_2] : memref<72x32xf32, #tpu.memory_space<vmem>>, vector<8x32xf32>
    %c56 = arith.constant 56 : index
    %c0_3 = arith.constant 0 : index
    %3 = vector.load %arg0[%c56, %c0_3] : memref<72x32xf32, #tpu.memory_space<vmem>>, vector<16x32xf32>
    %4 = tpu.concatenate %2, %2 in 0 : vector<8x32xf32>, vector<8x32xf32> -> vector<16x32xf32>
    %c0_4 = arith.constant 0 : index
    %c0_5 = arith.constant 0 : index
    %5 = vector.load %arg3[%c0_4, %c0_5] : memref<12x96xf32, #tpu.memory_space<vmem>>, vector<12x96xf32>
    %6 = vector.extract_strided_slice %5 {offsets = [0, 0], sizes = [1, 64], strides = [1, 1]} : vector<12x96xf32> to vector<1x64xf32>
    %7 = vector.extract_strided_slice %5 {offsets = [0, 64], sizes = [1, 32], strides = [1, 1]} : vector<12x96xf32> to vector<1x32xf32>
    %8 = vector.extract_strided_slice %5 {offsets = [1, 0], sizes = [1, 32], strides = [1, 1]} : vector<12x96xf32> to vector<1x32xf32>
    %9 = vector.extract_strided_slice %5 {offsets = [1, 32], sizes = [1, 64], strides = [1, 1]} : vector<12x96xf32> to vector<1x64xf32>
    %10 = vector.extract_strided_slice %5 {offsets = [2, 0], sizes = [1, 64], strides = [1, 1]} : vector<12x96xf32> to vector<1x64xf32>
    %11 = vector.extract_strided_slice %5 {offsets = [3, 0], sizes = [1, 32], strides = [1, 1]} : vector<12x96xf32> to vector<1x32xf32>
    %12 = vector.extract_strided_slice %5 {offsets = [4, 0], sizes = [1, 32], strides = [1, 1]} : vector<12x96xf32> to vector<1x32xf32>
    %13 = vector.extract_strided_slice %5 {offsets = [5, 0], sizes = [1, 32], strides = [1, 1]} : vector<12x96xf32> to vector<1x32xf32>
    %14 = vector.extract_strided_slice %5 {offsets = [6, 0], sizes = [1, 32], strides = [1, 1]} : vector<12x96xf32> to vector<1x32xf32>
    %15 = vector.extract_strided_slice %5 {offsets = [7, 0], sizes = [1, 32], strides = [1, 1]} : vector<12x96xf32> to vector<1x32xf32>
    %16 = vector.extract_strided_slice %5 {offsets = [8, 0], sizes = [1, 32], strides = [1, 1]} : vector<12x96xf32> to vector<1x32xf32>
    %17 = vector.extract_strided_slice %5 {offsets = [9, 0], sizes = [1, 32], strides = [1, 1]} : vector<12x96xf32> to vector<1x32xf32>
    %18 = vector.extract_strided_slice %5 {offsets = [10, 0], sizes = [1, 32], strides = [1, 1]} : vector<12x96xf32> to vector<1x32xf32>
    %19 = vector.extract_strided_slice %5 {offsets = [11, 0], sizes = [1, 32], strides = [1, 1]} : vector<12x96xf32> to vector<1x32xf32>
    %20 = tpu.iota {dimensions = array<i32: 0>} : vector<16x16xi32>
    %21 = tpu.iota {dimensions = array<i32: 1>} : vector<16x16xi32>
    %c0_i32 = arith.constant 0 : i32
    %22 = vector.broadcast %c0_i32 : i32 to vector<16x16xi32>
    %23 = arith.cmpi slt, %20, %22 : vector<16x16xi32>
    %c0_i32_6 = arith.constant 0 : i32
    %24 = vector.broadcast %c0_i32_6 : i32 to vector<16x16xi32>
    %25 = arith.cmpi sge, %20, %24 : vector<16x16xi32>
    %c8_i32 = arith.constant 8 : i32
    %26 = vector.broadcast %c8_i32 : i32 to vector<16x16xi32>
    %27 = arith.cmpi slt, %20, %26 : vector<16x16xi32>
    %28 = arith.andi %25, %27 : vector<16x16xi1>
    %c0_i32_7 = arith.constant 0 : i32
    %29 = vector.broadcast %c0_i32_7 : i32 to vector<16x16xi32>
    %30 = arith.cmpi sge, %21, %29 : vector<16x16xi32>
    %31 = arith.andi %28, %30 : vector<16x16xi1>
    %c8_i32_8 = arith.constant 8 : i32
    %32 = vector.broadcast %c8_i32_8 : i32 to vector<16x16xi32>
    %33 = arith.cmpi slt, %21, %32 : vector<16x16xi32>
    %34 = arith.andi %31, %33 : vector<16x16xi1>
    %35 = arith.ori %23, %34 : vector<16x16xi1>
    %c8_i32_9 = arith.constant 8 : i32
    %36 = vector.broadcast %c8_i32_9 : i32 to vector<16x16xi32>
    %37 = arith.cmpi sge, %20, %36 : vector<16x16xi32>
    %c16_i32 = arith.constant 16 : i32
    %38 = vector.broadcast %c16_i32 : i32 to vector<16x16xi32>
    %39 = arith.cmpi slt, %20, %38 : vector<16x16xi32>
    %40 = arith.andi %37, %39 : vector<16x16xi1>
    %c8_i32_10 = arith.constant 8 : i32
    %41 = vector.broadcast %c8_i32_10 : i32 to vector<16x16xi32>
    %42 = arith.cmpi sge, %21, %41 : vector<16x16xi32>
    %43 = arith.andi %40, %42 : vector<16x16xi1>
    %c16_i32_11 = arith.constant 16 : i32
    %44 = vector.broadcast %c16_i32_11 : i32 to vector<16x16xi32>
    %45 = arith.cmpi slt, %21, %44 : vector<16x16xi32>
    %46 = arith.andi %43, %45 : vector<16x16xi1>
    %47 = arith.ori %35, %46 : vector<16x16xi1>
    %cst = arith.constant 0.000000e+00 : f32
    %cst_12 = arith.constant -1.000000e+30 : f32
    %48 = vector.broadcast %cst : f32 to vector<16x16xf32>
    %49 = vector.broadcast %cst_12 : f32 to vector<16x16xf32>
    %50 = arith.select %47, %48, %49 : vector<16x16xi1>, vector<16x16xf32>
    %51 = tpu.iota {dimensions = array<i32: 0>} : vector<16x32xi32>
    %52 = tpu.iota {dimensions = array<i32: 1>} : vector<16x32xi32>
    %c0_i32_13 = arith.constant 0 : i32
    %53 = vector.broadcast %c0_i32_13 : i32 to vector<16x32xi32>
    %54 = arith.cmpi slt, %51, %53 : vector<16x32xi32>
    %c0_i32_14 = arith.constant 0 : i32
    %55 = vector.broadcast %c0_i32_14 : i32 to vector<16x32xi32>
    %56 = arith.cmpi sge, %51, %55 : vector<16x32xi32>
    %c8_i32_15 = arith.constant 8 : i32
    %57 = vector.broadcast %c8_i32_15 : i32 to vector<16x32xi32>
    %58 = arith.cmpi slt, %51, %57 : vector<16x32xi32>
    %59 = arith.andi %56, %58 : vector<16x32xi1>
    %c0_i32_16 = arith.constant 0 : i32
    %60 = vector.broadcast %c0_i32_16 : i32 to vector<16x32xi32>
    %61 = arith.cmpi sge, %52, %60 : vector<16x32xi32>
    %62 = arith.andi %59, %61 : vector<16x32xi1>
    %c16_i32_17 = arith.constant 16 : i32
    %63 = vector.broadcast %c16_i32_17 : i32 to vector<16x32xi32>
    %64 = arith.cmpi slt, %52, %63 : vector<16x32xi32>
    %65 = arith.andi %62, %64 : vector<16x32xi1>
    %66 = arith.ori %54, %65 : vector<16x32xi1>
    %c8_i32_18 = arith.constant 8 : i32
    %67 = vector.broadcast %c8_i32_18 : i32 to vector<16x32xi32>
    %68 = arith.cmpi sge, %51, %67 : vector<16x32xi32>
    %c16_i32_19 = arith.constant 16 : i32
    %69 = vector.broadcast %c16_i32_19 : i32 to vector<16x32xi32>
    %70 = arith.cmpi slt, %51, %69 : vector<16x32xi32>
    %71 = arith.andi %68, %70 : vector<16x32xi1>
    %c16_i32_20 = arith.constant 16 : i32
    %72 = vector.broadcast %c16_i32_20 : i32 to vector<16x32xi32>
    %73 = arith.cmpi sge, %52, %72 : vector<16x32xi32>
    %74 = arith.andi %71, %73 : vector<16x32xi1>
    %c32_i32 = arith.constant 32 : i32
    %75 = vector.broadcast %c32_i32 : i32 to vector<16x32xi32>
    %76 = arith.cmpi slt, %52, %75 : vector<16x32xi32>
    %77 = arith.andi %74, %76 : vector<16x32xi1>
    %78 = arith.ori %66, %77 : vector<16x32xi1>
    %cst_21 = arith.constant 0.000000e+00 : f32
    %cst_22 = arith.constant -1.000000e+30 : f32
    %79 = vector.broadcast %cst_21 : f32 to vector<16x32xf32>
    %80 = vector.broadcast %cst_22 : f32 to vector<16x32xf32>
    %81 = arith.select %78, %79, %80 : vector<16x32xi1>, vector<16x32xf32>
    %82 = arith.addf %0, %4 : vector<16x32xf32>
    %c0_23 = arith.constant 0 : index
    %c0_24 = arith.constant 0 : index
    %83 = vector.load %arg1[%c0_23, %c0_24] : memref<96x96xf32, #tpu.memory_space<vmem>>, vector<32x64xf32>
    %cst_25 = arith.constant dense<0.000000e+00> : vector<16x64xf32>
    %84 = tpu.matmul %82, %83, %cst_25 {dimension_numbers = #tpu.dot_dimension_numbers<[1], [0], [0], [1], [0, 0, 1, 1], [], []>, precision = #tpu.contract_precision<fp32>} : vector<16x32xf32>, vector<32x64xf32>, vector<16x64xf32> -> vector<16x64xf32>
    %85 = vector.broadcast %6 : vector<1x64xf32> to vector<16x64xf32>
    %86 = arith.addf %84, %85 : vector<16x64xf32>
    %c0_26 = arith.constant 0 : index
    %c64 = arith.constant 64 : index
    %87 = vector.load %arg1[%c0_26, %c64] : memref<96x96xf32, #tpu.memory_space<vmem>>, vector<32x32xf32>
    %cst_27 = arith.constant dense<0.000000e+00> : vector<16x32xf32>
    %88 = tpu.matmul %0, %87, %cst_27 {dimension_numbers = #tpu.dot_dimension_numbers<[1], [0], [0], [1], [0, 0, 1, 1], [], []>, precision = #tpu.contract_precision<fp32>} : vector<16x32xf32>, vector<32x32xf32>, vector<16x32xf32> -> vector<16x32xf32>
    %89 = vector.broadcast %7 : vector<1x32xf32> to vector<16x32xf32>
    %90 = arith.addf %88, %89 : vector<16x32xf32>
    %91 = vector.extract_strided_slice %86 {offsets = [0, 0], sizes = [16, 32], strides = [1, 1]} : vector<16x64xf32> to vector<16x32xf32>
    %92 = vector.extract_strided_slice %86 {offsets = [0, 32], sizes = [16, 32], strides = [1, 1]} : vector<16x64xf32> to vector<16x32xf32>
    %c0_28 = arith.constant 0 : index
    %c0_29 = arith.constant 0 : index
    %93 = vector.load %arg2[%c0_28, %c0_29] : memref<128x32xf32, #tpu.memory_space<vmem>>, vector<32x32xf32>
    %94 = vector.extract_strided_slice %91 {offsets = [0, 0], sizes = [16, 8], strides = [1, 1]} : vector<16x32xf32> to vector<16x8xf32>
    %cst_30 = arith.constant 0.353553385 : f32
    %95 = vector.broadcast %cst_30 : f32 to vector<16x8xf32>
    %96 = arith.mulf %94, %95 : vector<16x8xf32>
    %97 = vector.extract_strided_slice %92 {offsets = [0, 0], sizes = [16, 8], strides = [1, 1]} : vector<16x32xf32> to vector<16x8xf32>
    %cst_31 = arith.constant dense<0.000000e+00> : vector<16x16xf32>
    %98 = tpu.matmul %96, %97, %cst_31 {dimension_numbers = #tpu.dot_dimension_numbers<[1], [1], [0], [0], [0, 0, 1, 0], [], []>, precision = #tpu.contract_precision<fp32>} : vector<16x8xf32>, vector<16x8xf32>, vector<16x16xf32> -> vector<16x16xf32>
    %99 = arith.addf %98, %50 : vector<16x16xf32>
    %cst_32 = arith.constant dense<0xFF800000> : vector<16xf32>
    %100 = vector.multi_reduction <maximumf>, %99, %cst_32 [1] : vector<16x16xf32> to vector<16xf32>
    %101 = vector.shape_cast %100 : vector<16xf32> to vector<16x1xf32>
    %102 = vector.broadcast %101 : vector<16x1xf32> to vector<16x16xf32>
    %103 = arith.subf %99, %102 : vector<16x16xf32>
    %104 = math.exp %103 : vector<16x16xf32>
    %cst_33 = arith.constant dense<0.000000e+00> : vector<16xf32>
    %105 = vector.multi_reduction <add>, %104, %cst_33 [1] : vector<16x16xf32> to vector<16xf32>
    %106 = vector.shape_cast %105 : vector<16xf32> to vector<16x1xf32>
    %107 = tpu.reciprocal %106 {approx = true} : vector<16x1xf32> -> vector<16x1xf32>
    %108 = arith.mulf %106, %107 : vector<16x1xf32>
    %cst_34 = arith.constant 2.000000e+00 : f32
    %109 = vector.broadcast %cst_34 : f32 to vector<16x1xf32>
    %110 = arith.subf %109, %108 : vector<16x1xf32>
    %111 = arith.mulf %107, %110 : vector<16x1xf32>
    %112 = vector.broadcast %111 : vector<16x1xf32> to vector<16x16xf32>
    %113 = arith.mulf %104, %112 : vector<16x16xf32>
    %114 = vector.extract_strided_slice %90 {offsets = [0, 0], sizes = [16, 8], strides = [1, 1]} : vector<16x32xf32> to vector<16x8xf32>
    %cst_35 = arith.constant dense<0.000000e+00> : vector<16x8xf32>
    %115 = tpu.matmul %113, %114, %cst_35 {dimension_numbers = #tpu.dot_dimension_numbers<[1], [0], [0], [1], [0, 0, 1, 1], [], []>, precision = #tpu.contract_precision<fp32>} : vector<16x16xf32>, vector<16x8xf32>, vector<16x8xf32> -> vector<16x8xf32>
    %116 = vector.extract_strided_slice %91 {offsets = [0, 8], sizes = [16, 8], strides = [1, 1]} : vector<16x32xf32> to vector<16x8xf32>
    %cst_36 = arith.constant 0.353553385 : f32
    %117 = vector.broadcast %cst_36 : f32 to vector<16x8xf32>
    %118 = arith.mulf %116, %117 : vector<16x8xf32>
    %119 = vector.extract_strided_slice %92 {offsets = [0, 8], sizes = [16, 8], strides = [1, 1]} : vector<16x32xf32> to vector<16x8xf32>
    %cst_37 = arith.constant dense<0.000000e+00> : vector<16x16xf32>
    %120 = tpu.matmul %118, %119, %cst_37 {dimension_numbers = #tpu.dot_dimension_numbers<[1], [1], [0], [0], [0, 0, 1, 0], [], []>, precision = #tpu.contract_precision<fp32>} : vector<16x8xf32>, vector<16x8xf32>, vector<16x16xf32> -> vector<16x16xf32>
    %121 = arith.addf %120, %50 : vector<16x16xf32>
    %cst_38 = arith.constant dense<0xFF800000> : vector<16xf32>
    %122 = vector.multi_reduction <maximumf>, %121, %cst_38 [1] : vector<16x16xf32> to vector<16xf32>
    %123 = vector.shape_cast %122 : vector<16xf32> to vector<16x1xf32>
    %124 = vector.broadcast %123 : vector<16x1xf32> to vector<16x16xf32>
    %125 = arith.subf %121, %124 : vector<16x16xf32>
    %126 = math.exp %125 : vector<16x16xf32>
    %cst_39 = arith.constant dense<0.000000e+00> : vector<16xf32>
    %127 = vector.multi_reduction <add>, %126, %cst_39 [1] : vector<16x16xf32> to vector<16xf32>
    %128 = vector.shape_cast %127 : vector<16xf32> to vector<16x1xf32>
    %129 = tpu.reciprocal %128 {approx = true} : vector<16x1xf32> -> vector<16x1xf32>
    %130 = arith.mulf %128, %129 : vector<16x1xf32>
    %cst_40 = arith.constant 2.000000e+00 : f32
    %131 = vector.broadcast %cst_40 : f32 to vector<16x1xf32>
    %132 = arith.subf %131, %130 : vector<16x1xf32>
    %133 = arith.mulf %129, %132 : vector<16x1xf32>
    %134 = vector.broadcast %133 : vector<16x1xf32> to vector<16x16xf32>
    %135 = arith.mulf %126, %134 : vector<16x16xf32>
    %136 = vector.extract_strided_slice %90 {offsets = [0, 8], sizes = [16, 8], strides = [1, 1]} : vector<16x32xf32> to vector<16x8xf32>
    %cst_41 = arith.constant dense<0.000000e+00> : vector<16x8xf32>
    %137 = tpu.matmul %135, %136, %cst_41 {dimension_numbers = #tpu.dot_dimension_numbers<[1], [0], [0], [1], [0, 0, 1, 1], [], []>, precision = #tpu.contract_precision<fp32>} : vector<16x16xf32>, vector<16x8xf32>, vector<16x8xf32> -> vector<16x8xf32>
    %138 = vector.extract_strided_slice %91 {offsets = [0, 16], sizes = [16, 8], strides = [1, 1]} : vector<16x32xf32> to vector<16x8xf32>
    %cst_42 = arith.constant 0.353553385 : f32
    %139 = vector.broadcast %cst_42 : f32 to vector<16x8xf32>
    %140 = arith.mulf %138, %139 : vector<16x8xf32>
    %141 = vector.extract_strided_slice %92 {offsets = [0, 16], sizes = [16, 8], strides = [1, 1]} : vector<16x32xf32> to vector<16x8xf32>
    %cst_43 = arith.constant dense<0.000000e+00> : vector<16x16xf32>
    %142 = tpu.matmul %140, %141, %cst_43 {dimension_numbers = #tpu.dot_dimension_numbers<[1], [1], [0], [0], [0, 0, 1, 0], [], []>, precision = #tpu.contract_precision<fp32>} : vector<16x8xf32>, vector<16x8xf32>, vector<16x16xf32> -> vector<16x16xf32>
    %143 = arith.addf %142, %50 : vector<16x16xf32>
    %cst_44 = arith.constant dense<0xFF800000> : vector<16xf32>
    %144 = vector.multi_reduction <maximumf>, %143, %cst_44 [1] : vector<16x16xf32> to vector<16xf32>
    %145 = vector.shape_cast %144 : vector<16xf32> to vector<16x1xf32>
    %146 = vector.broadcast %145 : vector<16x1xf32> to vector<16x16xf32>
    %147 = arith.subf %143, %146 : vector<16x16xf32>
    %148 = math.exp %147 : vector<16x16xf32>
    %cst_45 = arith.constant dense<0.000000e+00> : vector<16xf32>
    %149 = vector.multi_reduction <add>, %148, %cst_45 [1] : vector<16x16xf32> to vector<16xf32>
    %150 = vector.shape_cast %149 : vector<16xf32> to vector<16x1xf32>
    %151 = tpu.reciprocal %150 {approx = true} : vector<16x1xf32> -> vector<16x1xf32>
    %152 = arith.mulf %150, %151 : vector<16x1xf32>
    %cst_46 = arith.constant 2.000000e+00 : f32
    %153 = vector.broadcast %cst_46 : f32 to vector<16x1xf32>
    %154 = arith.subf %153, %152 : vector<16x1xf32>
    %155 = arith.mulf %151, %154 : vector<16x1xf32>
    %156 = vector.broadcast %155 : vector<16x1xf32> to vector<16x16xf32>
    %157 = arith.mulf %148, %156 : vector<16x16xf32>
    %158 = vector.extract_strided_slice %90 {offsets = [0, 16], sizes = [16, 8], strides = [1, 1]} : vector<16x32xf32> to vector<16x8xf32>
    %cst_47 = arith.constant dense<0.000000e+00> : vector<16x8xf32>
    %159 = tpu.matmul %157, %158, %cst_47 {dimension_numbers = #tpu.dot_dimension_numbers<[1], [0], [0], [1], [0, 0, 1, 1], [], []>, precision = #tpu.contract_precision<fp32>} : vector<16x16xf32>, vector<16x8xf32>, vector<16x8xf32> -> vector<16x8xf32>
    %160 = vector.extract_strided_slice %91 {offsets = [0, 24], sizes = [16, 8], strides = [1, 1]} : vector<16x32xf32> to vector<16x8xf32>
    %cst_48 = arith.constant 0.353553385 : f32
    %161 = vector.broadcast %cst_48 : f32 to vector<16x8xf32>
    %162 = arith.mulf %160, %161 : vector<16x8xf32>
    %163 = vector.extract_strided_slice %92 {offsets = [0, 24], sizes = [16, 8], strides = [1, 1]} : vector<16x32xf32> to vector<16x8xf32>
    %cst_49 = arith.constant dense<0.000000e+00> : vector<16x16xf32>
    %164 = tpu.matmul %162, %163, %cst_49 {dimension_numbers = #tpu.dot_dimension_numbers<[1], [1], [0], [0], [0, 0, 1, 0], [], []>, precision = #tpu.contract_precision<fp32>} : vector<16x8xf32>, vector<16x8xf32>, vector<16x16xf32> -> vector<16x16xf32>
    %165 = arith.addf %164, %50 : vector<16x16xf32>
    %cst_50 = arith.constant dense<0xFF800000> : vector<16xf32>
    %166 = vector.multi_reduction <maximumf>, %165, %cst_50 [1] : vector<16x16xf32> to vector<16xf32>
    %167 = vector.shape_cast %166 : vector<16xf32> to vector<16x1xf32>
    %168 = vector.broadcast %167 : vector<16x1xf32> to vector<16x16xf32>
    %169 = arith.subf %165, %168 : vector<16x16xf32>
    %170 = math.exp %169 : vector<16x16xf32>
    %cst_51 = arith.constant dense<0.000000e+00> : vector<16xf32>
    %171 = vector.multi_reduction <add>, %170, %cst_51 [1] : vector<16x16xf32> to vector<16xf32>
    %172 = vector.shape_cast %171 : vector<16xf32> to vector<16x1xf32>
    %173 = tpu.reciprocal %172 {approx = true} : vector<16x1xf32> -> vector<16x1xf32>
    %174 = arith.mulf %172, %173 : vector<16x1xf32>
    %cst_52 = arith.constant 2.000000e+00 : f32
    %175 = vector.broadcast %cst_52 : f32 to vector<16x1xf32>
    %176 = arith.subf %175, %174 : vector<16x1xf32>
    %177 = arith.mulf %173, %176 : vector<16x1xf32>
    %178 = vector.broadcast %177 : vector<16x1xf32> to vector<16x16xf32>
    %179 = arith.mulf %170, %178 : vector<16x16xf32>
    %180 = vector.extract_strided_slice %90 {offsets = [0, 24], sizes = [16, 8], strides = [1, 1]} : vector<16x32xf32> to vector<16x8xf32>
    %cst_53 = arith.constant dense<0.000000e+00> : vector<16x8xf32>
    %181 = tpu.matmul %179, %180, %cst_53 {dimension_numbers = #tpu.dot_dimension_numbers<[1], [0], [0], [1], [0, 0, 1, 1], [], []>, precision = #tpu.contract_precision<fp32>} : vector<16x16xf32>, vector<16x8xf32>, vector<16x8xf32> -> vector<16x8xf32>
    %182 = tpu.concatenate %115, %137, %159, %181 in 1 : vector<16x8xf32>, vector<16x8xf32>, vector<16x8xf32>, vector<16x8xf32> -> vector<16x32xf32>
    %cst_54 = arith.constant dense<0.000000e+00> : vector<16x32xf32>
    %183 = tpu.matmul %182, %93, %cst_54 {dimension_numbers = #tpu.dot_dimension_numbers<[1], [0], [0], [1], [0, 0, 1, 1], [], []>, precision = #tpu.contract_precision<fp32>} : vector<16x32xf32>, vector<32x32xf32>, vector<16x32xf32> -> vector<16x32xf32>
    %184 = vector.broadcast %11 : vector<1x32xf32> to vector<16x32xf32>
    %185 = arith.addf %183, %184 : vector<16x32xf32>
    %186 = arith.addf %0, %185 : vector<16x32xf32>
    %cst_55 = arith.constant dense<0.000000e+00> : vector<16xf32>
    %187 = vector.multi_reduction <add>, %186, %cst_55 [1] : vector<16x32xf32> to vector<16xf32>
    %188 = vector.shape_cast %187 : vector<16xf32> to vector<16x1xf32>
    %cst_56 = arith.constant 3.200000e+01 : f32
    %189 = vector.broadcast %cst_56 : f32 to vector<16x1xf32>
    %190 = arith.divf %188, %189 : vector<16x1xf32>
    %191 = vector.broadcast %190 : vector<16x1xf32> to vector<16x32xf32>
    %192 = arith.subf %186, %191 : vector<16x32xf32>
    %193 = arith.mulf %192, %192 : vector<16x32xf32>
    %cst_57 = arith.constant dense<0.000000e+00> : vector<16xf32>
    %194 = vector.multi_reduction <add>, %193, %cst_57 [1] : vector<16x32xf32> to vector<16xf32>
    %195 = vector.shape_cast %194 : vector<16xf32> to vector<16x1xf32>
    %cst_58 = arith.constant 3.200000e+01 : f32
    %196 = vector.broadcast %cst_58 : f32 to vector<16x1xf32>
    %197 = arith.divf %195, %196 : vector<16x1xf32>
    %198 = vector.broadcast %190 : vector<16x1xf32> to vector<16x32xf32>
    %199 = arith.subf %186, %198 : vector<16x32xf32>
    %cst_59 = arith.constant 9.99999974E-6 : f32
    %200 = vector.broadcast %cst_59 : f32 to vector<16x1xf32>
    %201 = arith.addf %197, %200 : vector<16x1xf32>
    %202 = math.rsqrt %201 : vector<16x1xf32>
    %203 = vector.broadcast %202 : vector<16x1xf32> to vector<16x32xf32>
    %204 = arith.mulf %199, %203 : vector<16x32xf32>
    %205 = vector.broadcast %14 : vector<1x32xf32> to vector<16x32xf32>
    %206 = arith.mulf %204, %205 : vector<16x32xf32>
    %207 = vector.broadcast %15 : vector<1x32xf32> to vector<16x32xf32>
    %208 = arith.addf %206, %207 : vector<16x32xf32>
    %209 = arith.addf %208, %4 : vector<16x32xf32>
    %c32 = arith.constant 32 : index
    %c0_60 = arith.constant 0 : index
    %210 = vector.load %arg1[%c32, %c0_60] : memref<96x96xf32, #tpu.memory_space<vmem>>, vector<32x32xf32>
    %cst_61 = arith.constant dense<0.000000e+00> : vector<16x32xf32>
    %211 = tpu.matmul %209, %210, %cst_61 {dimension_numbers = #tpu.dot_dimension_numbers<[1], [0], [0], [1], [0, 0, 1, 1], [], []>, precision = #tpu.contract_precision<fp32>} : vector<16x32xf32>, vector<32x32xf32>, vector<16x32xf32> -> vector<16x32xf32>
    %212 = vector.broadcast %8 : vector<1x32xf32> to vector<16x32xf32>
    %213 = arith.addf %211, %212 : vector<16x32xf32>
    %c32_62 = arith.constant 32 : index
    %c32_63 = arith.constant 32 : index
    %214 = vector.load %arg1[%c32_62, %c32_63] : memref<96x96xf32, #tpu.memory_space<vmem>>, vector<32x64xf32>
    %cst_64 = arith.constant dense<0.000000e+00> : vector<32x64xf32>
    %215 = tpu.matmul %1, %214, %cst_64 {dimension_numbers = #tpu.dot_dimension_numbers<[1], [0], [0], [1], [0, 0, 1, 1], [], []>, precision = #tpu.contract_precision<fp32>} : vector<32x32xf32>, vector<32x64xf32>, vector<32x64xf32> -> vector<32x64xf32>
    %216 = vector.broadcast %9 : vector<1x64xf32> to vector<32x64xf32>
    %217 = arith.addf %215, %216 : vector<32x64xf32>
    %c32_65 = arith.constant 32 : index
    %c32_66 = arith.constant 32 : index
    %218 = vector.load %arg1[%c32_65, %c32_66] : memref<96x96xf32, #tpu.memory_space<vmem>>, vector<32x32xf32>
    %cst_67 = arith.constant dense<0.000000e+00> : vector<16x32xf32>
    %219 = tpu.matmul %3, %218, %cst_67 {dimension_numbers = #tpu.dot_dimension_numbers<[1], [0], [0], [1], [0, 0, 1, 1], [], []>, precision = #tpu.contract_precision<fp32>} : vector<16x32xf32>, vector<32x32xf32>, vector<16x32xf32> -> vector<16x32xf32>
    %220 = vector.extract_strided_slice %217 {offsets = [0, 0], sizes = [32, 32], strides = [1, 1]} : vector<32x64xf32> to vector<32x32xf32>
    %221 = tpu.concatenate %219, %219 in 0 : vector<16x32xf32>, vector<16x32xf32> -> vector<32x32xf32>
    %222 = arith.addf %220, %221 : vector<32x32xf32>
    %223 = vector.extract_strided_slice %217 {offsets = [0, 32], sizes = [32, 32], strides = [1, 1]} : vector<32x64xf32> to vector<32x32xf32>
    %c32_68 = arith.constant 32 : index
    %c0_69 = arith.constant 0 : index
    %224 = vector.load %arg2[%c32_68, %c0_69] : memref<128x32xf32, #tpu.memory_space<vmem>>, vector<32x32xf32>
    %225 = vector.extract_strided_slice %213 {offsets = [0, 0], sizes = [16, 8], strides = [1, 1]} : vector<16x32xf32> to vector<16x8xf32>
    %cst_70 = arith.constant 0.353553385 : f32
    %226 = vector.broadcast %cst_70 : f32 to vector<16x8xf32>
    %227 = arith.mulf %225, %226 : vector<16x8xf32>
    %228 = vector.extract_strided_slice %222 {offsets = [0, 0], sizes = [32, 8], strides = [1, 1]} : vector<32x32xf32> to vector<32x8xf32>
    %cst_71 = arith.constant dense<0.000000e+00> : vector<16x32xf32>
    %229 = tpu.matmul %227, %228, %cst_71 {dimension_numbers = #tpu.dot_dimension_numbers<[1], [1], [0], [0], [0, 0, 1, 0], [], []>, precision = #tpu.contract_precision<fp32>} : vector<16x8xf32>, vector<32x8xf32>, vector<16x32xf32> -> vector<16x32xf32>
    %230 = arith.addf %229, %81 : vector<16x32xf32>
    %cst_72 = arith.constant dense<0xFF800000> : vector<16xf32>
    %231 = vector.multi_reduction <maximumf>, %230, %cst_72 [1] : vector<16x32xf32> to vector<16xf32>
    %232 = vector.shape_cast %231 : vector<16xf32> to vector<16x1xf32>
    %233 = vector.broadcast %232 : vector<16x1xf32> to vector<16x32xf32>
    %234 = arith.subf %230, %233 : vector<16x32xf32>
    %235 = math.exp %234 : vector<16x32xf32>
    %cst_73 = arith.constant dense<0.000000e+00> : vector<16xf32>
    %236 = vector.multi_reduction <add>, %235, %cst_73 [1] : vector<16x32xf32> to vector<16xf32>
    %237 = vector.shape_cast %236 : vector<16xf32> to vector<16x1xf32>
    %238 = tpu.reciprocal %237 {approx = true} : vector<16x1xf32> -> vector<16x1xf32>
    %239 = arith.mulf %237, %238 : vector<16x1xf32>
    %cst_74 = arith.constant 2.000000e+00 : f32
    %240 = vector.broadcast %cst_74 : f32 to vector<16x1xf32>
    %241 = arith.subf %240, %239 : vector<16x1xf32>
    %242 = arith.mulf %238, %241 : vector<16x1xf32>
    %243 = vector.broadcast %242 : vector<16x1xf32> to vector<16x32xf32>
    %244 = arith.mulf %235, %243 : vector<16x32xf32>
    %245 = vector.extract_strided_slice %223 {offsets = [0, 0], sizes = [32, 8], strides = [1, 1]} : vector<32x32xf32> to vector<32x8xf32>
    %cst_75 = arith.constant dense<0.000000e+00> : vector<16x8xf32>
    %246 = tpu.matmul %244, %245, %cst_75 {dimension_numbers = #tpu.dot_dimension_numbers<[1], [0], [0], [1], [0, 0, 1, 1], [], []>, precision = #tpu.contract_precision<fp32>} : vector<16x32xf32>, vector<32x8xf32>, vector<16x8xf32> -> vector<16x8xf32>
    %247 = vector.extract_strided_slice %213 {offsets = [0, 8], sizes = [16, 8], strides = [1, 1]} : vector<16x32xf32> to vector<16x8xf32>
    %cst_76 = arith.constant 0.353553385 : f32
    %248 = vector.broadcast %cst_76 : f32 to vector<16x8xf32>
    %249 = arith.mulf %247, %248 : vector<16x8xf32>
    %250 = vector.extract_strided_slice %222 {offsets = [0, 8], sizes = [32, 8], strides = [1, 1]} : vector<32x32xf32> to vector<32x8xf32>
    %cst_77 = arith.constant dense<0.000000e+00> : vector<16x32xf32>
    %251 = tpu.matmul %249, %250, %cst_77 {dimension_numbers = #tpu.dot_dimension_numbers<[1], [1], [0], [0], [0, 0, 1, 0], [], []>, precision = #tpu.contract_precision<fp32>} : vector<16x8xf32>, vector<32x8xf32>, vector<16x32xf32> -> vector<16x32xf32>
    %252 = arith.addf %251, %81 : vector<16x32xf32>
    %cst_78 = arith.constant dense<0xFF800000> : vector<16xf32>
    %253 = vector.multi_reduction <maximumf>, %252, %cst_78 [1] : vector<16x32xf32> to vector<16xf32>
    %254 = vector.shape_cast %253 : vector<16xf32> to vector<16x1xf32>
    %255 = vector.broadcast %254 : vector<16x1xf32> to vector<16x32xf32>
    %256 = arith.subf %252, %255 : vector<16x32xf32>
    %257 = math.exp %256 : vector<16x32xf32>
    %cst_79 = arith.constant dense<0.000000e+00> : vector<16xf32>
    %258 = vector.multi_reduction <add>, %257, %cst_79 [1] : vector<16x32xf32> to vector<16xf32>
    %259 = vector.shape_cast %258 : vector<16xf32> to vector<16x1xf32>
    %260 = tpu.reciprocal %259 {approx = true} : vector<16x1xf32> -> vector<16x1xf32>
    %261 = arith.mulf %259, %260 : vector<16x1xf32>
    %cst_80 = arith.constant 2.000000e+00 : f32
    %262 = vector.broadcast %cst_80 : f32 to vector<16x1xf32>
    %263 = arith.subf %262, %261 : vector<16x1xf32>
    %264 = arith.mulf %260, %263 : vector<16x1xf32>
    %265 = vector.broadcast %264 : vector<16x1xf32> to vector<16x32xf32>
    %266 = arith.mulf %257, %265 : vector<16x32xf32>
    %267 = vector.extract_strided_slice %223 {offsets = [0, 8], sizes = [32, 8], strides = [1, 1]} : vector<32x32xf32> to vector<32x8xf32>
    %cst_81 = arith.constant dense<0.000000e+00> : vector<16x8xf32>
    %268 = tpu.matmul %266, %267, %cst_81 {dimension_numbers = #tpu.dot_dimension_numbers<[1], [0], [0], [1], [0, 0, 1, 1], [], []>, precision = #tpu.contract_precision<fp32>} : vector<16x32xf32>, vector<32x8xf32>, vector<16x8xf32> -> vector<16x8xf32>
    %269 = vector.extract_strided_slice %213 {offsets = [0, 16], sizes = [16, 8], strides = [1, 1]} : vector<16x32xf32> to vector<16x8xf32>
    %cst_82 = arith.constant 0.353553385 : f32
    %270 = vector.broadcast %cst_82 : f32 to vector<16x8xf32>
    %271 = arith.mulf %269, %270 : vector<16x8xf32>
    %272 = vector.extract_strided_slice %222 {offsets = [0, 16], sizes = [32, 8], strides = [1, 1]} : vector<32x32xf32> to vector<32x8xf32>
    %cst_83 = arith.constant dense<0.000000e+00> : vector<16x32xf32>
    %273 = tpu.matmul %271, %272, %cst_83 {dimension_numbers = #tpu.dot_dimension_numbers<[1], [1], [0], [0], [0, 0, 1, 0], [], []>, precision = #tpu.contract_precision<fp32>} : vector<16x8xf32>, vector<32x8xf32>, vector<16x32xf32> -> vector<16x32xf32>
    %274 = arith.addf %273, %81 : vector<16x32xf32>
    %cst_84 = arith.constant dense<0xFF800000> : vector<16xf32>
    %275 = vector.multi_reduction <maximumf>, %274, %cst_84 [1] : vector<16x32xf32> to vector<16xf32>
    %276 = vector.shape_cast %275 : vector<16xf32> to vector<16x1xf32>
    %277 = vector.broadcast %276 : vector<16x1xf32> to vector<16x32xf32>
    %278 = arith.subf %274, %277 : vector<16x32xf32>
    %279 = math.exp %278 : vector<16x32xf32>
    %cst_85 = arith.constant dense<0.000000e+00> : vector<16xf32>
    %280 = vector.multi_reduction <add>, %279, %cst_85 [1] : vector<16x32xf32> to vector<16xf32>
    %281 = vector.shape_cast %280 : vector<16xf32> to vector<16x1xf32>
    %282 = tpu.reciprocal %281 {approx = true} : vector<16x1xf32> -> vector<16x1xf32>
    %283 = arith.mulf %281, %282 : vector<16x1xf32>
    %cst_86 = arith.constant 2.000000e+00 : f32
    %284 = vector.broadcast %cst_86 : f32 to vector<16x1xf32>
    %285 = arith.subf %284, %283 : vector<16x1xf32>
    %286 = arith.mulf %282, %285 : vector<16x1xf32>
    %287 = vector.broadcast %286 : vector<16x1xf32> to vector<16x32xf32>
    %288 = arith.mulf %279, %287 : vector<16x32xf32>
    %289 = vector.extract_strided_slice %223 {offsets = [0, 16], sizes = [32, 8], strides = [1, 1]} : vector<32x32xf32> to vector<32x8xf32>
    %cst_87 = arith.constant dense<0.000000e+00> : vector<16x8xf32>
    %290 = tpu.matmul %288, %289, %cst_87 {dimension_numbers = #tpu.dot_dimension_numbers<[1], [0], [0], [1], [0, 0, 1, 1], [], []>, precision = #tpu.contract_precision<fp32>} : vector<16x32xf32>, vector<32x8xf32>, vector<16x8xf32> -> vector<16x8xf32>
    %291 = vector.extract_strided_slice %213 {offsets = [0, 24], sizes = [16, 8], strides = [1, 1]} : vector<16x32xf32> to vector<16x8xf32>
    %cst_88 = arith.constant 0.353553385 : f32
    %292 = vector.broadcast %cst_88 : f32 to vector<16x8xf32>
    %293 = arith.mulf %291, %292 : vector<16x8xf32>
    %294 = vector.extract_strided_slice %222 {offsets = [0, 24], sizes = [32, 8], strides = [1, 1]} : vector<32x32xf32> to vector<32x8xf32>
    %cst_89 = arith.constant dense<0.000000e+00> : vector<16x32xf32>
    %295 = tpu.matmul %293, %294, %cst_89 {dimension_numbers = #tpu.dot_dimension_numbers<[1], [1], [0], [0], [0, 0, 1, 0], [], []>, precision = #tpu.contract_precision<fp32>} : vector<16x8xf32>, vector<32x8xf32>, vector<16x32xf32> -> vector<16x32xf32>
    %296 = arith.addf %295, %81 : vector<16x32xf32>
    %cst_90 = arith.constant dense<0xFF800000> : vector<16xf32>
    %297 = vector.multi_reduction <maximumf>, %296, %cst_90 [1] : vector<16x32xf32> to vector<16xf32>
    %298 = vector.shape_cast %297 : vector<16xf32> to vector<16x1xf32>
    %299 = vector.broadcast %298 : vector<16x1xf32> to vector<16x32xf32>
    %300 = arith.subf %296, %299 : vector<16x32xf32>
    %301 = math.exp %300 : vector<16x32xf32>
    %cst_91 = arith.constant dense<0.000000e+00> : vector<16xf32>
    %302 = vector.multi_reduction <add>, %301, %cst_91 [1] : vector<16x32xf32> to vector<16xf32>
    %303 = vector.shape_cast %302 : vector<16xf32> to vector<16x1xf32>
    %304 = tpu.reciprocal %303 {approx = true} : vector<16x1xf32> -> vector<16x1xf32>
    %305 = arith.mulf %303, %304 : vector<16x1xf32>
    %cst_92 = arith.constant 2.000000e+00 : f32
    %306 = vector.broadcast %cst_92 : f32 to vector<16x1xf32>
    %307 = arith.subf %306, %305 : vector<16x1xf32>
    %308 = arith.mulf %304, %307 : vector<16x1xf32>
    %309 = vector.broadcast %308 : vector<16x1xf32> to vector<16x32xf32>
    %310 = arith.mulf %301, %309 : vector<16x32xf32>
    %311 = vector.extract_strided_slice %223 {offsets = [0, 24], sizes = [32, 8], strides = [1, 1]} : vector<32x32xf32> to vector<32x8xf32>
    %cst_93 = arith.constant dense<0.000000e+00> : vector<16x8xf32>
    %312 = tpu.matmul %310, %311, %cst_93 {dimension_numbers = #tpu.dot_dimension_numbers<[1], [0], [0], [1], [0, 0, 1, 1], [], []>, precision = #tpu.contract_precision<fp32>} : vector<16x32xf32>, vector<32x8xf32>, vector<16x8xf32> -> vector<16x8xf32>
    %313 = tpu.concatenate %246, %268, %290, %312 in 1 : vector<16x8xf32>, vector<16x8xf32>, vector<16x8xf32>, vector<16x8xf32> -> vector<16x32xf32>
    %cst_94 = arith.constant dense<0.000000e+00> : vector<16x32xf32>
    %314 = tpu.matmul %313, %224, %cst_94 {dimension_numbers = #tpu.dot_dimension_numbers<[1], [0], [0], [1], [0, 0, 1, 1], [], []>, precision = #tpu.contract_precision<fp32>} : vector<16x32xf32>, vector<32x32xf32>, vector<16x32xf32> -> vector<16x32xf32>
    %315 = vector.broadcast %12 : vector<1x32xf32> to vector<16x32xf32>
    %316 = arith.addf %314, %315 : vector<16x32xf32>
    %317 = arith.addf %208, %316 : vector<16x32xf32>
    %cst_95 = arith.constant dense<0.000000e+00> : vector<16xf32>
    %318 = vector.multi_reduction <add>, %317, %cst_95 [1] : vector<16x32xf32> to vector<16xf32>
    %319 = vector.shape_cast %318 : vector<16xf32> to vector<16x1xf32>
    %cst_96 = arith.constant 3.200000e+01 : f32
    %320 = vector.broadcast %cst_96 : f32 to vector<16x1xf32>
    %321 = arith.divf %319, %320 : vector<16x1xf32>
    %322 = vector.broadcast %321 : vector<16x1xf32> to vector<16x32xf32>
    %323 = arith.subf %317, %322 : vector<16x32xf32>
    %324 = arith.mulf %323, %323 : vector<16x32xf32>
    %cst_97 = arith.constant dense<0.000000e+00> : vector<16xf32>
    %325 = vector.multi_reduction <add>, %324, %cst_97 [1] : vector<16x32xf32> to vector<16xf32>
    %326 = vector.shape_cast %325 : vector<16xf32> to vector<16x1xf32>
    %cst_98 = arith.constant 3.200000e+01 : f32
    %327 = vector.broadcast %cst_98 : f32 to vector<16x1xf32>
    %328 = arith.divf %326, %327 : vector<16x1xf32>
    %329 = vector.broadcast %321 : vector<16x1xf32> to vector<16x32xf32>
    %330 = arith.subf %317, %329 : vector<16x32xf32>
    %cst_99 = arith.constant 9.99999974E-6 : f32
    %331 = vector.broadcast %cst_99 : f32 to vector<16x1xf32>
    %332 = arith.addf %328, %331 : vector<16x1xf32>
    %333 = math.rsqrt %332 : vector<16x1xf32>
    %334 = vector.broadcast %333 : vector<16x1xf32> to vector<16x32xf32>
    %335 = arith.mulf %330, %334 : vector<16x32xf32>
    %336 = vector.broadcast %16 : vector<1x32xf32> to vector<16x32xf32>
    %337 = arith.mulf %335, %336 : vector<16x32xf32>
    %338 = vector.broadcast %17 : vector<1x32xf32> to vector<16x32xf32>
    %339 = arith.addf %337, %338 : vector<16x32xf32>
    %c64_100 = arith.constant 64 : index
    %c0_101 = arith.constant 0 : index
    %340 = vector.load %arg1[%c64_100, %c0_101] : memref<96x96xf32, #tpu.memory_space<vmem>>, vector<32x64xf32>
    %cst_102 = arith.constant dense<0.000000e+00> : vector<16x64xf32>
    %341 = tpu.matmul %339, %340, %cst_102 {dimension_numbers = #tpu.dot_dimension_numbers<[1], [0], [0], [1], [0, 0, 1, 1], [], []>, precision = #tpu.contract_precision<fp32>} : vector<16x32xf32>, vector<32x64xf32>, vector<16x64xf32> -> vector<16x64xf32>
    %342 = vector.broadcast %10 : vector<1x64xf32> to vector<16x64xf32>
    %343 = arith.addf %341, %342 : vector<16x64xf32>
    %cst_103 = arith.constant 0.000000e+00 : f32
    %344 = vector.broadcast %cst_103 : f32 to vector<16x64xf32>
    %345 = arith.maximumf %343, %344 : vector<16x64xf32>
    %c64_104 = arith.constant 64 : index
    %c0_105 = arith.constant 0 : index
    %346 = vector.load %arg2[%c64_104, %c0_105] : memref<128x32xf32, #tpu.memory_space<vmem>>, vector<64x32xf32>
    %cst_106 = arith.constant dense<0.000000e+00> : vector<16x32xf32>
    %347 = tpu.matmul %345, %346, %cst_106 {dimension_numbers = #tpu.dot_dimension_numbers<[1], [0], [0], [1], [0, 0, 1, 1], [], []>, precision = #tpu.contract_precision<fp32>} : vector<16x64xf32>, vector<64x32xf32>, vector<16x32xf32> -> vector<16x32xf32>
    %348 = vector.broadcast %13 : vector<1x32xf32> to vector<16x32xf32>
    %349 = arith.addf %347, %348 : vector<16x32xf32>
    %350 = arith.addf %339, %349 : vector<16x32xf32>
    %cst_107 = arith.constant dense<0.000000e+00> : vector<16xf32>
    %351 = vector.multi_reduction <add>, %350, %cst_107 [1] : vector<16x32xf32> to vector<16xf32>
    %352 = vector.shape_cast %351 : vector<16xf32> to vector<16x1xf32>
    %cst_108 = arith.constant 3.200000e+01 : f32
    %353 = vector.broadcast %cst_108 : f32 to vector<16x1xf32>
    %354 = arith.divf %352, %353 : vector<16x1xf32>
    %355 = vector.broadcast %354 : vector<16x1xf32> to vector<16x32xf32>
    %356 = arith.subf %350, %355 : vector<16x32xf32>
    %357 = arith.mulf %356, %356 : vector<16x32xf32>
    %cst_109 = arith.constant dense<0.000000e+00> : vector<16xf32>
    %358 = vector.multi_reduction <add>, %357, %cst_109 [1] : vector<16x32xf32> to vector<16xf32>
    %359 = vector.shape_cast %358 : vector<16xf32> to vector<16x1xf32>
    %cst_110 = arith.constant 3.200000e+01 : f32
    %360 = vector.broadcast %cst_110 : f32 to vector<16x1xf32>
    %361 = arith.divf %359, %360 : vector<16x1xf32>
    %362 = vector.broadcast %354 : vector<16x1xf32> to vector<16x32xf32>
    %363 = arith.subf %350, %362 : vector<16x32xf32>
    %cst_111 = arith.constant 9.99999974E-6 : f32
    %364 = vector.broadcast %cst_111 : f32 to vector<16x1xf32>
    %365 = arith.addf %361, %364 : vector<16x1xf32>
    %366 = math.rsqrt %365 : vector<16x1xf32>
    %367 = vector.broadcast %366 : vector<16x1xf32> to vector<16x32xf32>
    %368 = arith.mulf %363, %367 : vector<16x32xf32>
    %369 = vector.broadcast %18 : vector<1x32xf32> to vector<16x32xf32>
    %370 = arith.mulf %368, %369 : vector<16x32xf32>
    %371 = vector.broadcast %19 : vector<1x32xf32> to vector<16x32xf32>
    %372 = arith.addf %370, %371 : vector<16x32xf32>
    %c0_112 = arith.constant 0 : index
    %c0_113 = arith.constant 0 : index
    %373 = vector.load %arg4[%c0_112, %c0_113] : memref<16x32xf32, #tpu.memory_space<vmem>>, vector<16x32xf32>
    tpu.vector_store %arg4[%c0_112, %c0_113], %372 {strides = array<i32>} : memref<16x32xf32, #tpu.memory_space<vmem>>, vector<16x32xf32>,
    return
  }
}

</mosaic_0001>

<bundles_post_ra>
// kernel: fwd.1
= control target key start
LH: loop header
LB: loop body
LE: loop exit
PB: predicated region body
PF: predicated region fallthrough
CT: control target
= control target key end

     0   :  { %vm89_vm0 = vcmask 261120   ;;  %v31_v49 = vlaneseq  ;;  %vm1190_vm1 = vcmask 64512   ;;  %s17872_s5 = smov 96   ;;  %s17873_s6 = smov 64   ;;  %vm1703_vm6 = vcmask 130048   ;;  %s19102_s1 = inlined_call_operand.vmem [shape: f32[96,96], index: 1, kind: input, shape index: {}]   ;;  %s19103_s0 = inlined_call_operand.vmem [shape: f32[72,32], index: 0, kind: input, shape index: {}]   ;;  %s19104_s3 = inlined_call_operand.vmem [shape: f32[12,96], index: 3, kind: input, shape index: {}]   ;;  %s19105_s2 = inlined_call_operand.vmem [shape: f32[128,32], index: 2, kind: input, shape index: {}]   ;;  %s19106_s4 = inlined_call_operand.vmem [shape: f32[16,32], index: 4, kind: output, shape index: {}]  }
   0x1   :  { %v17912_v0 = vld [vmem:[%s19102_s1] sm:$0xff]  ;;  %v17917_v1 = vld [vmem:[%s19102_s1 + $0x8] sm:$0xff]  ;;  %v17922_v2 = vld [vmem:[%s19102_s1 + $0x10] sm:$0xff]  ;;  %s17875_s7 = smov 88   ;;  %s17876_s8 = smov 120   ;;  %vm5450_vm7 = vcmask 195584  }
   0x2   :  { %v97_v3 = vand.u32 4294901760, %v17912_v0  ;;  %v100_v4 = vand.u32 4294901760, %v17917_v1  ;;  %v17929_v5 = vld [vmem:[%s19102_s1 + $0x18] sm:$0xff]  ;;  %v103_v6 = vand.u32 4294901760, %v17922_v2  ;;  %v17935_v7 = vld [vmem:[%s19103_s0] sm:$0xff]  ;;  %v23_v8 = vld [vmem:[%s19103_s0 + $0x30] sm:$0xff]  ;;  %628 = vrot.lane.b32.xlu1 %v17912_v0, %s17873_s6 }
   0x3   :  { %v106_v9 = vand.u32 4294901760, %v17929_v5  ;;  %v79_v10 = vadd.f32 %v23_v8, %v17935_v7  ;;  %v17945_v11 = vld [vmem:[%s19103_s0 + $0x8] sm:$0xff]  ;;  %v17971_v50 = vshrl.u32 %v31_v49, 7  ;;  %v26_v52 = vld [vmem:[%s19104_s3] sm:$0xff]  ;;  %s17877_s9 = smov 80   ;;  %s17878_s10 = smov 112  }
   0x4   :  { %v17947_v12 = vpack.c.bf16 %v100_v4, %v97_v3  ;;  %v80_v13 = vadd.f32 %v23_v8, %v17945_v11  ;;  %v187_v14 = vsub.f32 %v17912_v0, %v97_v3  ;;  %v194_v15 = vsub.f32 %v17917_v1, %v100_v4  ;;  %s17879_s11 = smov 72   ;;  %s17880_s12 = smov 104  }
   0x5   :  { %v17952_v16 = vpack.c.bf16 %v106_v9, %v103_v6  ;;  %v91_v17 = vsel %vm89_vm0, %v79_v10, 0  ;;  %v201_v18 = vsub.f32 %v17922_v2, %v103_v6  ;;  %v208_v19 = vsub.f32 %v17929_v5, %v106_v9  ;;  %s17881_s13 = smov 8   ;;  %s17882_s14 = smov 16  }
   0x6   :  { %16430 = vmatprep.subr.bf16.mxu0 %v17947_v12  ;;  %v165_v20 = vand.u32 4294901760, %v91_v17  ;;  %v94_v21 = vsel %vm89_vm0, %v80_v13, 0  ;;  %v188_v22 = vand.u32 4294901760, %v187_v14  ;;  %v195_v23 = vand.u32 4294901760, %v194_v15  ;;  %630 = vrot.lane.b32.xlu1 %v17917_v1, %s17873_s6  ;;  %s17883_s23 = smov 24  }
   0x7   :  { %16432 = vmatpush3.bf16.msra.mxu0 %v17947_v12  ;;  %v175_v24 = vand.u32 4294901760, %v94_v21  ;;  %v202_v25 = vand.u32 4294901760, %v201_v18  ;;  %v209_v26 = vand.u32 4294901760, %v208_v19  ;;  %v16445_v45 = vpack.c.bf16 %v194_v15, %v187_v14 }
   0x8   :  { %16434 = vmatprep.subr.bf16.mxu0 %v17952_v16  ;;  %v166_v27 = vsub.f32 %v91_v17, %v165_v20  ;;  %v189_v28 = vsub.f32 %v187_v14, %v188_v22  ;;  %v196_v29 = vsub.f32 %v194_v15, %v195_v23  ;;  %v16449_v46 = vpack.c.bf16 %v208_v19, %v201_v18 }
   0x9   :  { %v176_v30 = vsub.f32 %v94_v21, %v175_v24  ;;  %v203_v31 = vsub.f32 %v201_v18, %v202_v25  ;;  %v210_v32 = vsub.f32 %v208_v19, %v209_v26  ;;  %v16461_v47 = vpack.c.bf16 %v195_v23, %v188_v22 }
   0xa   :  { %v167_v33 = vand.u32 4294901760, %v166_v27  ;;  %v190_v34 = vand.u32 4294901760, %v189_v28  ;;  %v197_v35 = vand.u32 4294901760, %v196_v29  ;;  %v16465_v48 = vpack.c.bf16 %v209_v26, %v202_v25  ;;  %634 = vrot.lane.b32.xlu1 %v17929_v5, %s17873_s6 }
   0xb   :  { %16436 = vmatpush3.bf16.msra.mxu0 %v17952_v16  ;;  %v177_v36 = vand.u32 4294901760, %v176_v30  ;;  %v204_v37 = vand.u32 4294901760, %v203_v31  ;;  %v211_v38 = vand.u32 4294901760, %v210_v32  ;;  %v87_v51 = vsub.s32 0, %v17971_v50 }
   0xc   :  { %v168_v39 = vsub.f32 %v166_v27, %v167_v33  ;;  %v16437_v40 = vpack.c.bf16 %v197_v35, %v190_v34  ;;  %vm13432_vm11 = vcmask 523264  }
   0xd   :  { %v178_v41 = vsub.f32 %v176_v30, %v177_v36  ;;  %v16441_v44 = vpack.c.bf16 %v211_v38, %v204_v37  ;;  %v17979_v53 = vrot.slane %v26_v52, %v87_v51 }
   0xe   :  { %v169_v42 = vand.u32 4294901760, %v168_v39  ;;  %16438 = vmatprep.subr.bf16.mxu0 %v16437_v40 }
   0xf   :  { %v179_v43 = vand.u32 4294901760, %v178_v41 }
  0x10   :  { %14913 = vmatprep.mubr.f32.mxu0 %v169_v42 }
  0x11   :  { %14914 = vmatmul.mubr.f32.vlgmr.msra.gmra.mrb[0].mxu0 %v179_v43  ;;  %v648_v43 = vsel %vm89_vm0, %v17945_v11, 0 }
  0x12   :  { %16440 = vmatpush3.bf16.msra.mxu0 %v16437_v40  ;;  %14924 = vmatprep.mubr.f32.mxu0 %v165_v20  ;;  %v645_v40 = vsel %vm89_vm0, %v17935_v7, 0 }
  0x13   :  { %16442 = vmatprep.subr.bf16.mxu0 %v16441_v44  ;;  %v719_v42 = vand.u32 4294901760, %v645_v40 }
  0x16   :  { %16444 = vmatpush3.bf16.msra.mxu0 %v16441_v44 }
  0x17   :  { %16446 = vmatprep.subr.bf16.mxu0 %v16445_v45 }
  0x19   :  { %14925 = vmatmul.mubr.f32.vlgmr.msra.gmra.mrb[0].mxu0 %v175_v24 }
  0x1a   :  { %16448 = vmatpush3.bf16.msra.mxu0 %v16445_v45  ;;  %14935 = vmatprep.mubr.f32.mxu0 %v166_v27 }
  0x1b   :  { %16450 = vmatprep.subr.bf16.mxu0 %v16449_v46 }
  0x1e   :  { %16452 = vmatpush3.bf16.msra.mxu0 %v16449_v46 }
  0x1f   :  { %16454 = vmatprep.subr.bf16.mxu0 %v17947_v12 }
  0x21   :  { %14936 = vmatmul.mubr.f32.vlgmr.msra.gmra.mrb[0].mxu0 %v176_v30 }
  0x22   :  { %16456 = vmatpush3.bf16.msra.mxu0 %v17947_v12  ;;  %14946 = vmatprep.mubr.f32.mxu0 %v167_v33 }
  0x23   :  { %16458 = vmatprep.subr.bf16.mxu0 %v17952_v16 }
  0x26   :  { %16460 = vmatpush3.bf16.msra.mxu0 %v17952_v16 }
  0x27   :  { %16462 = vmatprep.subr.bf16.mxu0 %v16461_v47 }
  0x29   :  { %14947 = vmatmul.mubr.f32.vlgmr.msra.gmra.mrb[0].mxu0 %v177_v36 }
  0x2a   :  { %16464 = vmatpush3.bf16.msra.mxu0 %v16461_v47  ;;  %14957 = vmatprep.mubr.f32.mxu0 %v165_v20  ;;  %v729_v47 = vand.u32 4294901760, %v648_v43 }
  0x2b   :  { %16466 = vmatprep.subr.bf16.mxu0 %v16465_v48 }
  0x2c   :  { %v730_v52 = vsub.f32 %v648_v43, %v729_v47 }
  0x2e   :  { %16468 = vmatpush3.bf16.msra.mxu0 %v16465_v48  ;;  %v720_v48 = vsub.f32 %v645_v40, %v719_v42 }
  0x2f   :  { %16470 = vmatprep.subr.bf16.mxu0 %v17947_v12 }
  0x31   :  { %14958 = vmatmul.mubr.f32.vlgmr.msra.gmra.mrb[0].mxu0 %v175_v24 }
  0x32   :  { %16472 = vmatpush3.bf16.msra.mxu0 %v17947_v12  ;;  %14968 = vmatprep.mubr.f32.mxu0 %v165_v20 }
  0x33   :  { %16474 = vmatprep.subr.bf16.mxu0 %v17952_v16 }
  0x36   :  { %16476 = vmatpush3.bf16.msra.mxu0 %v17952_v16 }
  0x39   :  { %14969 = vmatmul.mubr.f32.vlgmr.msra.gmra.mrb[0].mxu0 %v175_v24 }
  0x74   :  { %v629_v28 = vpop.permute.xlu1 %628 }
  0x75   :  { %v651_v29 = vand.u32 4294901760, %v629_v28 }
  0x77   :  { %v741_v38 = vsub.f32 %v629_v28, %v651_v29 }
  0x78   :  { %v631_v30 = vpop.permute.xlu1 %630 }
  0x79   :  { %v654_v32 = vand.u32 4294901760, %v631_v30  ;;  %v742_v44 = vand.u32 4294901760, %v741_v38 }
  0x7b   :  { %v18011_v33 = vpack.c.bf16 %v654_v32, %v651_v29  ;;  %v748_v39 = vsub.f32 %v631_v30, %v654_v32 }
  0x7c   :  { %v635_v35 = vpop.permute.xlu1 %634 }
  0x7d   :  { %v660_v36 = vand.u32 4294901760, %v635_v35  ;;  %16478 = vmatprep.subr.bf16.mxu1 %v18011_v33  ;;  %v749_v45 = vand.u32 4294901760, %v748_v39 }
  0x7e   :  { %16480 = vmatpush3.bf16.msra.mxu1 %v18011_v33 }
  0x7f   :  { %v762_v46 = vsub.f32 %v635_v35, %v660_v36 }
 0x10c   :  { %v14970_v54 = vpop.f32.mrb[0].mxu0 }
 0x10d   :  { %v614_v55 = vpop.f32.mrb[1].mxu0  ;;  %v17990_v58 = vadd.f32 %v14970_v54, %v17979_v53 }
 0x10e   :  { %v17982_v56 = vadd.f32 %v614_v55, %v17979_v53  ;;  %v721_v55 = vand.u32 4294901760, %v720_v48 }
 0x10f   :  { %v18005_v4 = vmul.f32 0.35355338, %v17990_v58 }
 0x110   :  { %v17985_v57 = vmul.f32 0.35355338, %v17982_v56  ;;  %1186 = vrot.lane.b32.xlu0 %v17982_v56, %s17872_s5 }
 0x111   :  { %v1195_v6 = vsel %vm1190_vm1, %v18005_v4, 0 }
 0x112   :  { %v1192_v59 = vsel %vm1190_vm1, %v17985_v57, 0  ;;  %v1278_v9 = vand.u32 4294901760, %v1195_v6 }
 0x113   :  { %v1268_v60 = vand.u32 4294901760, %v1192_v59 }
 0x114   :  { %1188 = vrot.lane.b32.xlu0 %v17990_v58, %s17872_s5 }
 0x115   :  { %v1269_v61 = vsub.f32 %v1192_v59, %v1268_v60  ;;  %v763_v59 = vand.u32 4294901760, %v762_v46 }
 0x117   :  { %v1270_v62 = vand.u32 4294901760, %v1269_v61 }
 0x118   :  { %632 = vrot.lane.b32.xlu0 %v17922_v2, %s17873_s6  ;;  %v1279_v2 = vsub.f32 %v1195_v6, %v1278_v9 }
 0x119   :  { %v1271_v63 = vsub.f32 %v1269_v61, %v1270_v62 }
 0x11a   :  { %v1280_v17 = vand.u32 4294901760, %v1279_v2 }
 0x11b   :  { %v1272_v3 = vand.u32 4294901760, %v1271_v63  ;;  %v722_v63 = vsub.f32 %v720_v48, %v721_v55 }
 0x11c   :  { %v1281_v20 = vsub.f32 %v1279_v2, %v1280_v17 }
 0x11d   :  { %15041 = vmatprep.mubr.f32.mxu0 %v1272_v3 }
 0x11e   :  { %v1282_v24 = vand.u32 4294901760, %v1281_v20 }
 0x182   :  { %v1187_v8 = vpop.permute.xlu0 %1186 }
 0x183   :  { %v1197_v10 = vsel %vm1190_vm1, %v1187_v8, 0  ;;  %v723_v8 = vand.u32 4294901760, %v722_v63 }
 0x184   :  { %v1202_v0 = vand.u32 4294901760, %v1197_v10 }
 0x185   :  { %14979 = vmatprep.mubr.f32.mxu1 %v723_v8 }
 0x186   :  { %v1290_v12 = vsub.f32 %v1197_v10, %v1202_v0  ;;  %v1189_v13 = vpop.permute.xlu0 %1188 }
 0x187   :  { %v1199_v14 = vsel %vm1190_vm1, %v1189_v13, 0 }
 0x188   :  { %v1291_v1 = vand.u32 4294901760, %v1290_v12  ;;  %v1205_v15 = vand.u32 4294901760, %v1199_v14 }
 0x18a   :  { %v16525_v16 = vpack.c.bf16 %v1205_v15, %v1202_v0  ;;  %v1297_v5 = vsub.f32 %v1199_v14, %v1205_v15  ;;  %v1292_v19 = vsub.f32 %v1290_v12, %v1291_v1  ;;  %v633_v31 = vpop.permute.xlu0 %632  ;;  %v764_v0 = vsub.f32 %v762_v46, %v763_v59 }
 0x18b   :  { %v657_v34 = vand.u32 4294901760, %v633_v31  ;;  %v16493_v14 = vpack.c.bf16 %v748_v39, %v741_v38  ;;  %v16509_v15 = vpack.c.bf16 %v749_v45, %v742_v44 }
 0x18c   :  { %v1298_v18 = vand.u32 4294901760, %v1297_v5  ;;  %16526 = vmatprep.subr.bf16.mxu0 %v16525_v16  ;;  %v1293_v22 = vand.u32 4294901760, %v1292_v19  ;;  %v16533_v26 = vpack.c.bf16 %v1297_v5, %v1290_v12  ;;  %v765_v13 = vand.u32 4294901760, %v764_v0 }
 0x18d   :  { %16528 = vmatpush3.bf16.xpose.msra.mxu0 %v16525_v16  ;;  %v18015_v37 = vpack.c.bf16 %v660_v36, %v657_v34  ;;  %v755_v41 = vsub.f32 %v633_v31, %v657_v34 }
 0x18e   :  { %v1299_v21 = vsub.f32 %v1297_v5, %v1298_v18  ;;  %v16541_v27 = vpack.c.bf16 %v1298_v18, %v1291_v1  ;;  %v18032_v5 = vand.u32 127, %v31_v49 }
 0x18f   :  { %16482 = vmatprep.subr.bf16.mxu1 %v18015_v37  ;;  %v756_v54 = vand.u32 4294901760, %v755_v41  ;;  %v16497_v1 = vpack.c.bf16 %v762_v46, %v755_v41 }
 0x190   :  { %v1300_v23 = vand.u32 4294901760, %v1299_v21  ;;  %16484 = vmatpush3.bf16.msra.mxu1 %v18015_v37  ;;  %vm55_vm2 = vcmp.ge.s32.totalorder %v18032_v5, 8  ;;  %vm58_vm3 = vcmp.lt.s32.totalorder %v18032_v5, 16  ;;  %vm44_vm5 = vcmp.lt.s32.totalorder %v18032_v5, 8 }
 0x191   :  { %v757_v11 = vsub.f32 %v755_v41, %v756_v54  ;;  %vm60_vm4 = vmand %vm55_vm2, %vm58_vm3  ;;  %vm69_vm8 = vcmp.ge.s32.totalorder %v18032_v5, 16  ;;  %vm72_vm9 = vcmp.lt.s32.totalorder %v18032_v5, 32 }
 0x192   :  { %v16529_v25 = vpack.c.bf16 %v1300_v23, %v1293_v22  ;;  %vm74_vm10 = vmand %vm69_vm8, %vm72_vm9 }
 0x193   :  { %v758_v12 = vand.u32 4294901760, %v757_v11 }
 0x194   :  { %15042 = vmatmul.mubr.f32.vlgmr.msra.gmra.mrb[2].mxu0 %v1282_v24  ;;  %16530 = vmatprep.subr.bf16.mxu0 %v16529_v25 }
 0x195   :  { %16532 = vmatpush3.bf16.xpose.msra.mxu0 %v16529_v25  ;;  %15048 = vmatprep.mubr.f32.mxu0 %v1268_v60 }
 0x196   :  { %16534 = vmatprep.subr.bf16.mxu0 %v16533_v26 }
 0x19c   :  { %15049 = vmatmul.mubr.f32.vlgmr.msra.gmra.mrb[2].mxu0 %v1278_v9 }
 0x19d   :  { %16536 = vmatpush3.bf16.xpose.msra.mxu0 %v16533_v26  ;;  %15055 = vmatprep.mubr.f32.mxu0 %v1269_v61  ;;  %v743_v61 = vsub.f32 %v741_v38, %v742_v44 }
 0x19e   :  { %16538 = vmatprep.subr.bf16.mxu0 %v16525_v16 }
 0x19f   :  { %v744_v7 = vand.u32 4294901760, %v743_v61 }
 0x1a4   :  { %15056 = vmatmul.mubr.f32.vlgmr.msra.gmra.mrb[2].mxu0 %v1279_v2  ;;  %v16489_v2 = vpack.c.bf16 %v765_v13, %v758_v12 }
 0x1a5   :  { %16540 = vmatpush3.bf16.xpose.msra.mxu0 %v16525_v16  ;;  %15062 = vmatprep.mubr.f32.mxu0 %v1270_v62  ;;  %v750_v62 = vsub.f32 %v748_v39, %v749_v45 }
 0x1a6   :  { %16542 = vmatprep.subr.bf16.mxu0 %v16541_v27 }
 0x1a7   :  { %v751_v6 = vand.u32 4294901760, %v750_v62 }
 0x1a9   :  { %v16485_v10 = vpack.c.bf16 %v751_v6, %v744_v7 }
 0x1ab   :  { %16486 = vmatprep.subr.bf16.mxu1 %v16485_v10 }
 0x1ac   :  { %15063 = vmatmul.mubr.f32.vlgmr.msra.gmra.mrb[2].mxu0 %v1280_v17  ;;  %v17874_v17 = vmov -1e+30  }
 0x1ad   :  { %16544 = vmatpush3.bf16.xpose.msra.mxu0 %v16541_v27  ;;  %15069 = vmatprep.mubr.f32.mxu0 %v1268_v60  ;;  %v18040_v18 = vsel %vm60_vm4, 0.0, %v17874_v17  ;;  %v18043_v19 = vsel %vm44_vm5, 0.0, %v17874_v17 }
 0x1ae   :  { %16546 = vmatprep.subr.bf16.mxu0 %v16525_v16 }
 0x1b4   :  { %15070 = vmatmul.mubr.f32.vlgmr.msra.gmra.mrb[2].mxu0 %v1278_v9 }
 0x1b5   :  { %16548 = vmatpush3.bf16.xpose.msra.mxu0 %v16525_v16  ;;  %15076 = vmatprep.mubr.f32.mxu0 %v1268_v60  ;;  %v731_v60 = vand.u32 4294901760, %v730_v52  ;;  %v16513_v16 = vpack.c.bf16 %v763_v59, %v756_v54 }
 0x1b7   :  { %v732_v3 = vsub.f32 %v730_v52, %v731_v60 }
 0x1bc   :  { %15077 = vmatmul.mubr.f32.vlgmr.msra.gmra.mrb[2].mxu0 %v1278_v9  ;;  %v733_v9 = vand.u32 4294901760, %v732_v3 }
 0x1be   :  { %14980 = vmatmul.mubr.f32.vlgmr.msra.gmra.mrb[0].mxu1 %v733_v9 }
 0x1bf   :  { %16488 = vmatpush3.bf16.msra.mxu1 %v16485_v10  ;;  %14990 = vmatprep.mubr.f32.mxu1 %v719_v42 }
 0x1c0   :  { %16490 = vmatprep.subr.bf16.mxu1 %v16489_v2 }
 0x1c3   :  { %16492 = vmatpush3.bf16.msra.mxu1 %v16489_v2 }
 0x1c4   :  { %16494 = vmatprep.subr.bf16.mxu1 %v16493_v14 }
 0x1c6   :  { %14991 = vmatmul.mubr.f32.vlgmr.msra.gmra.mrb[0].mxu1 %v729_v47 }
 0x1c7   :  { %16496 = vmatpush3.bf16.msra.mxu1 %v16493_v14  ;;  %15001 = vmatprep.mubr.f32.mxu1 %v720_v48 }
 0x1c8   :  { %16498 = vmatprep.subr.bf16.mxu1 %v16497_v1 }
 0x1cb   :  { %16500 = vmatpush3.bf16.msra.mxu1 %v16497_v1 }
 0x1cc   :  { %16502 = vmatprep.subr.bf16.mxu1 %v18011_v33 }
 0x1ce   :  { %15002 = vmatmul.mubr.f32.vlgmr.msra.gmra.mrb[0].mxu1 %v730_v52 }
 0x1cf   :  { %16504 = vmatpush3.bf16.msra.mxu1 %v18011_v33  ;;  %15012 = vmatprep.mubr.f32.mxu1 %v721_v55 }
 0x1d0   :  { %16506 = vmatprep.subr.bf16.mxu1 %v18015_v37 }
 0x1d3   :  { %16508 = vmatpush3.bf16.msra.mxu1 %v18015_v37 }
 0x1d4   :  { %16510 = vmatprep.subr.bf16.mxu1 %v16509_v15 }
 0x1d6   :  { %15013 = vmatmul.mubr.f32.vlgmr.msra.gmra.mrb[0].mxu1 %v731_v60 }
 0x1d7   :  { %16512 = vmatpush3.bf16.msra.mxu1 %v16509_v15  ;;  %15023 = vmatprep.mubr.f32.mxu1 %v719_v42 }
 0x1d8   :  { %16514 = vmatprep.subr.bf16.mxu1 %v16513_v16 }
 0x1db   :  { %16516 = vmatpush3.bf16.msra.mxu1 %v16513_v16 }
 0x1dc   :  { %16518 = vmatprep.subr.bf16.mxu1 %v18011_v33 }
 0x1de   :  { %15024 = vmatmul.mubr.f32.vlgmr.msra.gmra.mrb[0].mxu1 %v729_v47 }
 0x1df   :  { %16520 = vmatpush3.bf16.msra.mxu1 %v18011_v33  ;;  %15034 = vmatprep.mubr.f32.mxu1 %v719_v42 }
 0x1e0   :  { %16522 = vmatprep.subr.bf16.mxu1 %v18015_v37 }
 0x1e3   :  { %16524 = vmatpush3.bf16.msra.mxu1 %v18015_v37 }
 0x1e6   :  { %15035 = vmatmul.mubr.f32.vlgmr.msra.gmra.mrb[0].mxu1 %v729_v47 }
 0x28f   :  { %v15078_v20 = vpop.f32.mrb[2].mxu0 }
 0x290   :  { %v17489_v49 = vadd.f32 %v15078_v20, %v18040_v18  ;;  %v1693_v21 = vpop.f32.mrb[3].mxu0 }
 0x291   :  { %v17490_v22 = vadd.f32 %v1693_v21, %v18043_v19 }
 0x292   :  { %v1707_v23 = vsel %vm1703_vm6, %v17489_v49, -inf }
 0x293   :  { %1708 = vmax.xlane.f32.xlu1 %v1707_v23  ;;  %v1704_v24 = vsel %vm1703_vm6, %v17490_v22, -inf }
 0x294   :  { %1705 = vmax.xlane.f32.xlu0 %v1704_v24 }
 0x2a4   :  { %641 = vrot.lane.b32.xlu1 %v17979_v53, %s17873_s6 }
 0x2a8   :  { %2246 = vrot.lane.b32.xlu1 %v17990_v58, %s17875_s7 }
 0x2ac   :  { %2240 = vrot.lane.b32.xlu1 %v17985_v57, %s17876_s8 }
 0x2b9   :  { %v15036_v32 = vpop.f32.mrb[0].mxu1 }
 0x2ba   :  { %v1168_v53 = vpop.f32.mrb[1].mxu1 }
 0x320   :  { %v1709_v25 = vpop.xlane.xlu1 %1708 }
 0x321   :  { %v1711_v26 = vsub.f32 %v17489_v49, %v1709_v25  ;;  %v1706_v27 = vpop.xlane.xlu0 %1705 }
 0x322   :  { %v1710_v28 = vsub.f32 %v17490_v22, %v1706_v27 }
 0x323   :  { %v1714_v29 = vmul.f32 1.442695, %v1711_v26 }
 0x324   :  { %v1712_v30 = vmul.f32 1.442695, %v1710_v28  ;;  %v642_v31 = vpop.permute.xlu1 %641 }
 0x325   :  { %v18055_v33 = vadd.f32 %v15036_v32, %v642_v31  ;;  %v18057_v34 = vadd.f32 %v1168_v53, %v642_v31 }
 0x326   :  { %17791 = vpow2.f32 %v1712_v30 }
 0x327   :  { %17793 = vpow2.f32 %v1714_v29  ;;  %v1742_v35 = vand.u32 4294901760, %v18055_v33  ;;  %v1739_v36 = vand.u32 4294901760, %v18057_v34 }
 0x328   :  { %v2247_v24 = vpop.permute.xlu1 %2246 }
 0x329   :  { %v1834_v37 = vsub.f32 %v18055_v33, %v1742_v35  ;;  %v18062_v38 = vpack.c.bf16 %v1742_v35, %v1739_v36  ;;  %v1827_v39 = vsub.f32 %v18057_v34, %v1739_v36  ;;  %v2254_v28 = vsel %vm1190_vm1, %v2247_v24, 0 }
 0x32a   :  { %v2260_v31 = vand.u32 4294901760, %v2254_v28 }
 0x32b   :  { %v1835_v41 = vand.u32 4294901760, %v1834_v37  ;;  %16550 = vmatprep.subr.bf16.mxu1 %v18062_v38  ;;  %v1828_v43 = vand.u32 4294901760, %v1827_v39  ;;  %v16557_v48 = vpack.c.bf16 %v1834_v37, %v1827_v39 }
 0x32c   :  { %16552 = vmatpush3.bf16.msra.mxu1 %v18062_v38  ;;  %v2241_v26 = vpop.permute.xlu1 %2240  ;;  %v2352_v36 = vsub.f32 %v2254_v28, %v2260_v31 }
 0x32d   :  { %v1836_v45 = vsub.f32 %v1834_v37, %v1835_v41  ;;  %v1829_v46 = vsub.f32 %v1827_v39, %v1828_v43  ;;  %v16565_v55 = vpack.c.bf16 %v1835_v41, %v1828_v43  ;;  %v2248_v29 = vsel %vm1190_vm1, %v2241_v26, 0 }
 0x32e   :  { %v2323_v32 = vand.u32 4294901760, %v2248_v29  ;;  %v2353_v41 = vand.u32 4294901760, %v2352_v36 }
 0x32f   :  { %v1837_v47 = vand.u32 4294901760, %v1836_v45  ;;  %v1830_v54 = vand.u32 4294901760, %v1829_v46 }
 0x330   :  { %v17792_v40 = vpop.eup %17791  ;;  %v2324_v37 = vsub.f32 %v2248_v29, %v2323_v32 }
 0x331   :  { %v1716_v42 = vsel %vm1703_vm6, %v17792_v40, 0.0  ;;  %v17794_v44 = vpop.eup %17793  ;;  %v16553_v59 = vpack.c.bf16 %v1837_v47, %v1830_v54 }
 0x332   :  { %1717 = vadd.xlane.f32.xlu0 %v1716_v42  ;;  %v1719_v52 = vsel %vm1703_vm6, %v17794_v44, 0.0  ;;  %v2325_v43 = vand.u32 4294901760, %v2324_v37 }
 0x333   :  { %16554 = vmatprep.subr.bf16.mxu1 %v16553_v59 }
 0x334   :  { %v2326_v47 = vsub.f32 %v2324_v37, %v2325_v43 }
 0x336   :  { %1720 = vadd.xlane.f32.xlu0 %v1719_v52 }
 0x34c   :  { %2244 = vrot.lane.b32.xlu0 %v17982_v56, %s17875_s7 }
 0x350   :  { %2242 = vrot.lane.b32.xlu0 %v18005_v4, %s17876_s8 }
 0x3bf   :  { %v1718_v60 = vpop.xlane.xlu0 %1717 }
 0x3c0   :  { %17795 = vrcp.f32 %v1718_v60 }
 0x3c3   :  { %v1721_v61 = vpop.xlane.xlu0 %1720 }
 0x3c4   :  { %17797 = vrcp.f32 %v1721_v61 }
 0x3c7   :  { %v2245_v25 = vpop.permute.xlu0 %2244 }
 0x3c8   :  { %v2252_v27 = vsel %vm1190_vm1, %v2245_v25, 0 }
 0x3c9   :  { %v2257_v30 = vand.u32 4294901760, %v2252_v27 }
 0x3ca   :  { %v17796_v62 = vpop.eup %17795 }
 0x3cb   :  { %v1724_v63 = vmul.f32 %v17796_v62, %v1718_v60  ;;  %v2345_v53 = vsub.f32 %v2252_v27, %v2257_v30  ;;  %v2243_v35 = vpop.permute.xlu0 %2242 }
 0x3cc   :  { %v2250_v39 = vsel %vm1190_vm1, %v2243_v35, 0 }
 0x3cd   :  { %v1726_v3 = vsub.f32 2.0, %v1724_v63  ;;  %v2333_v42 = vand.u32 4294901760, %v2250_v39  ;;  %v16581_v63 = vpack.c.bf16 %v2352_v36, %v2345_v53 }
 0x3ce   :  { %v17798_v7 = vpop.eup %17797 }
 0x3cf   :  { %v1728_v6 = vmul.f32 %v17796_v62, %v1726_v3  ;;  %v1725_v8 = vmul.f32 %v17798_v7, %v1721_v61  ;;  %v2334_v46 = vsub.f32 %v2250_v39, %v2333_v42 }
 0x3d1   :  { %v1730_v9 = vmul.f32 %v17792_v40, %v1728_v6  ;;  %v1727_v10 = vsub.f32 2.0, %v1725_v8  ;;  %v2346_v40 = vand.u32 4294901760, %v2345_v53  ;;  %v2335_v54 = vand.u32 4294901760, %v2334_v46 }
 0x3d3   :  { %v1729_v11 = vmul.f32 %v17798_v7, %v1727_v10  ;;  %v1733_v0 = vsel %vm1703_vm6, %v1730_v9, 0  ;;  %v2347_v45 = vsub.f32 %v2345_v53, %v2346_v40  ;;  %v2336_v61 = vsub.f32 %v2334_v46, %v2335_v54 }
 0x3d4   :  { %v1805_v12 = vand.u32 4294901760, %v1733_v0 }
 0x3d5   :  { %v1731_v13 = vmul.f32 %v17794_v44, %v1729_v11  ;;  %v16573_v44 = vpack.c.bf16 %v2260_v31, %v2257_v30  ;;  %v2348_v52 = vand.u32 4294901760, %v2347_v45  ;;  %v2337_v62 = vand.u32 4294901760, %v2336_v61 }
 0x3d6   :  { %v1806_v2 = vsub.f32 %v1733_v0, %v1805_v12 }
 0x3d7   :  { %v1736_v14 = vsel %vm1703_vm6, %v1731_v13, 0 }
 0x3d8   :  { %v1815_v1 = vand.u32 4294901760, %v1736_v14  ;;  %v1807_v15 = vand.u32 4294901760, %v1806_v2 }
 0x3da   :  { %v1816_v16 = vsub.f32 %v1736_v14, %v1815_v1  ;;  %v1808_v20 = vsub.f32 %v1806_v2, %v1807_v15 }
 0x3dc   :  { %v1809_v49 = vand.u32 4294901760, %v1808_v20  ;;  %v1817_v21 = vand.u32 4294901760, %v1816_v16 }
 0x3de   :  { %15083 = vmatprep.mubr.f32.mxu1 %v1809_v49  ;;  %v1818_v22 = vsub.f32 %v1816_v16, %v1817_v21 }
 0x3e0   :  { %v1819_v23 = vand.u32 4294901760, %v1818_v22 }
 0x3e2   :  { %15084 = vmatmul.mubr.f32.vlgmr.msra.gmra.mrb[2].mxu1 %v1819_v23 }
 0x3e3   :  { %16556 = vmatpush3.bf16.msra.mxu1 %v16553_v59  ;;  %15090 = vmatprep.mubr.f32.mxu1 %v1805_v12 }
 0x3e4   :  { %16558 = vmatprep.subr.bf16.mxu1 %v16557_v48 }
 0x3ea   :  { %15091 = vmatmul.mubr.f32.vlgmr.msra.gmra.mrb[2].mxu1 %v1815_v1 }
 0x3eb   :  { %16560 = vmatpush3.bf16.msra.mxu1 %v16557_v48  ;;  %15097 = vmatprep.mubr.f32.mxu1 %v1806_v2  ;;  %v2354_v48 = vsub.f32 %v2352_v36, %v2353_v41 }
 0x3ec   :  { %16562 = vmatprep.subr.bf16.mxu1 %v18062_v38 }
 0x3ed   :  { %v2355_v59 = vand.u32 4294901760, %v2354_v48 }
 0x3ef   :  { %v16577_v60 = vpack.c.bf16 %v2355_v59, %v2348_v52 }
 0x3f2   :  { %15098 = vmatmul.mubr.f32.vlgmr.msra.gmra.mrb[2].mxu1 %v1816_v16 }
 0x3f3   :  { %16564 = vmatpush3.bf16.msra.mxu1 %v18062_v38  ;;  %15104 = vmatprep.mubr.f32.mxu1 %v1807_v15 }
 0x3f4   :  { %16566 = vmatprep.subr.bf16.mxu1 %v16565_v55 }
 0x3fa   :  { %15105 = vmatmul.mubr.f32.vlgmr.msra.gmra.mrb[2].mxu1 %v1817_v21 }
 0x3fb   :  { %16568 = vmatpush3.bf16.msra.mxu1 %v16565_v55  ;;  %15111 = vmatprep.mubr.f32.mxu1 %v1805_v12  ;;  %v2327_v55 = vand.u32 4294901760, %v2326_v47 }
 0x3fc   :  { %16570 = vmatprep.subr.bf16.mxu1 %v18062_v38 }
 0x402   :  { %15112 = vmatmul.mubr.f32.vlgmr.msra.gmra.mrb[2].mxu1 %v1815_v1 }
 0x403   :  { %16572 = vmatpush3.bf16.msra.mxu1 %v18062_v38  ;;  %15118 = vmatprep.mubr.f32.mxu1 %v1805_v12  ;;  %v16589_v38 = vpack.c.bf16 %v2353_v41, %v2346_v40 }
 0x404   :  { %16574 = vmatprep.subr.bf16.mxu1 %v16573_v44 }
 0x40a   :  { %15119 = vmatmul.mubr.f32.vlgmr.msra.gmra.mrb[2].mxu1 %v1815_v1 }
 0x40b   :  { %15125 = vmatprep.mubr.f32.mxu1 %v2327_v55 }
 0x40c   :  { %16576 = vmatpush3.bf16.xpose.msra.mxu1 %v16573_v44 }
 0x40d   :  { %16578 = vmatprep.subr.bf16.mxu1 %v16577_v60 }
 0x413   :  { %15126 = vmatmul.mubr.f32.vlgmr.msra.gmra.mrb[4].mxu1 %v2337_v62 }
 0x414   :  { %16580 = vmatpush3.bf16.xpose.msra.mxu1 %v16577_v60  ;;  %15132 = vmatprep.mubr.f32.mxu1 %v2323_v32 }
 0x415   :  { %16582 = vmatprep.subr.bf16.mxu1 %v16581_v63 }
 0x41b   :  { %15133 = vmatmul.mubr.f32.vlgmr.msra.gmra.mrb[4].mxu1 %v2333_v42 }
 0x41c   :  { %16584 = vmatpush3.bf16.xpose.msra.mxu1 %v16581_v63  ;;  %15139 = vmatprep.mubr.f32.mxu1 %v2324_v37 }
 0x41d   :  { %16586 = vmatprep.subr.bf16.mxu1 %v16573_v44 }
 0x423   :  { %15140 = vmatmul.mubr.f32.vlgmr.msra.gmra.mrb[4].mxu1 %v2334_v46 }
 0x424   :  { %16588 = vmatpush3.bf16.xpose.msra.mxu1 %v16573_v44  ;;  %15146 = vmatprep.mubr.f32.mxu1 %v2325_v43 }
 0x425   :  { %16590 = vmatprep.subr.bf16.mxu1 %v16589_v38 }
 0x42b   :  { %15147 = vmatmul.mubr.f32.vlgmr.msra.gmra.mrb[4].mxu1 %v2335_v54 }
 0x42c   :  { %16592 = vmatpush3.bf16.xpose.msra.mxu1 %v16589_v38  ;;  %15153 = vmatprep.mubr.f32.mxu1 %v2323_v32 }
 0x42d   :  { %16594 = vmatprep.subr.bf16.mxu1 %v16573_v44 }
 0x433   :  { %15154 = vmatmul.mubr.f32.vlgmr.msra.gmra.mrb[4].mxu1 %v2333_v42 }
 0x434   :  { %16596 = vmatpush3.bf16.xpose.msra.mxu1 %v16573_v44  ;;  %15160 = vmatprep.mubr.f32.mxu1 %v2323_v32 }
 0x43b   :  { %15161 = vmatmul.mubr.f32.vlgmr.msra.gmra.mrb[4].mxu1 %v2333_v42 }
 0x4dd   :  { %v18083_v3 = vpop.f32.mrb[2].mxu1 }
 0x4de   :  { %v18085_v7 = vpop.f32.mrb[3].mxu1 }
 0x50e   :  { %v15162_v6 = vpop.f32.mrb[4].mxu1 }
 0x50f   :  { %v17491_v8 = vadd.f32 %v15162_v6, %v18040_v18  ;;  %v2748_v9 = vpop.f32.mrb[5].mxu1 }
 0x510   :  { %v17492_v10 = vadd.f32 %v2748_v9, %v18043_v19 }
 0x511   :  { %v2761_v11 = vsel %vm1703_vm6, %v17491_v8, -inf }
 0x512   :  { %2762 = vmax.xlane.f32.xlu0 %v2761_v11  ;;  %v2758_v0 = vsel %vm1703_vm6, %v17492_v10, -inf }
 0x513   :  { %2759 = vmax.xlane.f32.xlu1 %v2758_v0 }
 0x59f   :  { %v2763_v12 = vpop.xlane.xlu0 %2762 }
 0x5a0   :  { %v2765_v13 = vsub.f32 %v17491_v8, %v2763_v12  ;;  %v2760_v2 = vpop.xlane.xlu1 %2759 }
 0x5a1   :  { %v2764_v14 = vsub.f32 %v17492_v10, %v2760_v2 }
 0x5a2   :  { %v2768_v1 = vmul.f32 1.442695, %v2765_v13 }
 0x5a3   :  { %v2766_v15 = vmul.f32 1.442695, %v2764_v14 }
 0x5a4   :  { %17799 = vpow2.f32 %v2768_v1 }
 0x5a5   :  { %17801 = vpow2.f32 %v2766_v15 }
 0x5ae   :  { %v17800_v16 = vpop.eup %17799 }
 0x5af   :  { %v17802_v20 = vpop.eup %17801  ;;  %v2773_v49 = vsel %vm1703_vm6, %v17800_v16, 0.0 }
 0x5b0   :  { %2774 = vadd.xlane.f32.xlu1 %v2773_v49  ;;  %v2770_v21 = vsel %vm1703_vm6, %v17802_v20, 0.0 }
 0x5b1   :  { %2771 = vadd.xlane.f32.xlu0 %v2770_v21 }
 0x5c1   :  { %2790 = vrot.lane.b32.xlu1 %v18055_v33, %s17876_s8 }
 0x5c5   :  { %3306 = vrot.lane.b32.xlu1 %v17982_v56, %s17877_s9 }
 0x5c7   :  { %2788 = vrot.lane.b32.xlu0 %v18057_v34, %s17876_s8 }
 0x5c9   :  { %3302 = vrot.lane.b32.xlu1 %v17985_v57, %s17878_s10 }
 0x5cb   :  { %3308 = vrot.lane.b32.xlu0 %v17990_v58, %s17877_s9 }
 0x5cf   :  { %3304 = vrot.lane.b32.xlu0 %v18005_v4, %s17878_s10 }
 0x63d   :  { %v2775_v22 = vpop.xlane.xlu1 %2774 }
 0x63e   :  { %17803 = vrcp.f32 %v2775_v22  ;;  %v2772_v23 = vpop.xlane.xlu0 %2771 }
 0x63f   :  { %17805 = vrcp.f32 %v2772_v23 }
 0x641   :  { %v2791_v24 = vpop.permute.xlu1 %2790 }
 0x642   :  { %v2804_v25 = vand.u32 4294901760, %v2791_v24  ;;  %v2789_v26 = vpop.permute.xlu0 %2788 }
 0x643   :  { %v2801_v27 = vand.u32 4294901760, %v2789_v26 }
 0x644   :  { %v2896_v28 = vsub.f32 %v2791_v24, %v2804_v25 }
 0x645   :  { %v18105_v29 = vpack.c.bf16 %v2804_v25, %v2801_v27  ;;  %v2889_v30 = vsub.f32 %v2789_v26, %v2801_v27  ;;  %v3307_v0 = vpop.permute.xlu1 %3306 }
 0x646   :  { %v2897_v31 = vand.u32 4294901760, %v2896_v28  ;;  %v3309_v12 = vpop.permute.xlu0 %3308  ;;  %v3314_v14 = vsel %vm1190_vm1, %v3307_v0, 0 }
 0x647   :  { %v2890_v32 = vand.u32 4294901760, %v2889_v30  ;;  %16598 = vmatprep.subr.bf16.mxu0 %v18105_v29  ;;  %v16605_v11 = vpack.c.bf16 %v2896_v28, %v2889_v30  ;;  %v3316_v1 = vsel %vm1190_vm1, %v3309_v12, 0 }
 0x648   :  { %v17804_v53 = vpop.eup %17803  ;;  %16600 = vmatpush3.bf16.msra.mxu0 %v18105_v29  ;;  %v2898_v39 = vsub.f32 %v2896_v28, %v2897_v31 }
 0x649   :  { %v17806_v35 = vpop.eup %17805  ;;  %v2779_v36 = vmul.f32 %v17804_v53, %v2775_v22  ;;  %v2891_v37 = vsub.f32 %v2889_v30, %v2890_v32  ;;  %v16613_v13 = vpack.c.bf16 %v2897_v31, %v2890_v32  ;;  %v3303_v2 = vpop.permute.xlu1 %3302 }
 0x64a   :  { %v2778_v40 = vmul.f32 %v17806_v35, %v2772_v23  ;;  %v2899_v45 = vand.u32 4294901760, %v2898_v39  ;;  %v3310_v15 = vsel %vm1190_vm1, %v3303_v2, 0  ;;  %v3305_v23 = vpop.permute.xlu0 %3304 }
 0x64b   :  { %v2781_v41 = vsub.f32 2.0, %v2779_v36  ;;  %v2892_v43 = vand.u32 4294901760, %v2891_v37  ;;  %v3385_v49 = vand.u32 4294901760, %v3310_v15  ;;  %v3312_v25 = vsel %vm1190_vm1, %v3305_v23, 0 }
 0x64c   :  { %v2780_v42 = vsub.f32 2.0, %v2778_v40  ;;  %v3395_v30 = vand.u32 4294901760, %v3312_v25 }
 0x64d   :  { %v2783_v44 = vmul.f32 %v17804_v53, %v2781_v41  ;;  %v16601_v48 = vpack.c.bf16 %v2899_v45, %v2892_v43  ;;  %v3386_v24 = vsub.f32 %v3310_v15, %v3385_v49 }
 0x64e   :  { %v2782_v46 = vmul.f32 %v17806_v35, %v2780_v42  ;;  %v3396_v35 = vsub.f32 %v3312_v25, %v3395_v30 }
 0x64f   :  { %v2785_v47 = vmul.f32 %v17800_v16, %v2783_v44  ;;  %16602 = vmatprep.subr.bf16.mxu0 %v16601_v48  ;;  %v3319_v16 = vand.u32 4294901760, %v3314_v14  ;;  %v3387_v28 = vand.u32 4294901760, %v3386_v24 }
 0x650   :  { %v2784_v52 = vmul.f32 %v17802_v20, %v2782_v46  ;;  %v3322_v20 = vand.u32 4294901760, %v3316_v1  ;;  %v3397_v40 = vand.u32 4294901760, %v3396_v35 }
 0x651   :  { %v2798_v54 = vsel %vm1703_vm6, %v2785_v47, 0  ;;  %v3407_v21 = vsub.f32 %v3314_v14, %v3319_v16  ;;  %v3388_v36 = vsub.f32 %v3386_v24, %v3387_v28 }
 0x652   :  { %v2877_v55 = vand.u32 4294901760, %v2798_v54  ;;  %v2795_v59 = vsel %vm1703_vm6, %v2784_v52, 0  ;;  %v3414_v22 = vsub.f32 %v3316_v1, %v3322_v20  ;;  %v16621_v31 = vpack.c.bf16 %v3322_v20, %v3319_v16 }
 0x653   :  { %v2867_v60 = vand.u32 4294901760, %v2795_v59  ;;  %v3408_v26 = vand.u32 4294901760, %v3407_v21  ;;  %v3389_v41 = vand.u32 4294901760, %v3388_v36  ;;  %v3398_v43 = vsub.f32 %v3396_v35, %v3397_v40 }
 0x654   :  { %v2878_v61 = vsub.f32 %v2798_v54, %v2877_v55  ;;  %v3415_v27 = vand.u32 4294901760, %v3414_v22  ;;  %v16629_v45 = vpack.c.bf16 %v3414_v22, %v3407_v21 }
 0x655   :  { %v2868_v62 = vsub.f32 %v2795_v59, %v2867_v60  ;;  %v3409_v32 = vsub.f32 %v3407_v21, %v3408_v26  ;;  %v3399_v44 = vand.u32 4294901760, %v3398_v43 }
 0x656   :  { %v2879_v63 = vand.u32 4294901760, %v2878_v61  ;;  %v3416_v53 = vsub.f32 %v3414_v22, %v3415_v27 }
 0x657   :  { %v2869_v38 = vand.u32 4294901760, %v2868_v62  ;;  %v3410_v37 = vand.u32 4294901760, %v3409_v32 }
 0x658   :  { %v2880_v6 = vsub.f32 %v2878_v61, %v2879_v63  ;;  %v3417_v39 = vand.u32 4294901760, %v3416_v53 }
 0x659   :  { %v2870_v8 = vsub.f32 %v2868_v62, %v2869_v38 }
 0x65a   :  { %v2881_v10 = vand.u32 4294901760, %v2880_v6  ;;  %v16625_v42 = vpack.c.bf16 %v3417_v39, %v3410_v37 }
 0x65b   :  { %v2871_v9 = vand.u32 4294901760, %v2870_v8 }
 0x65d   :  { %15167 = vmatprep.mubr.f32.mxu0 %v2871_v9 }
 0x65e   :  { %15168 = vmatmul.mubr.f32.vlgmr.msra.gmra.mrb[4].mxu0 %v2881_v10 }
 0x65f   :  { %16604 = vmatpush3.bf16.msra.mxu0 %v16601_v48  ;;  %15174 = vmatprep.mubr.f32.mxu0 %v2867_v60 }
 0x660   :  { %16606 = vmatprep.subr.bf16.mxu0 %v16605_v11 }
 0x666   :  { %15175 = vmatmul.mubr.f32.vlgmr.msra.gmra.mrb[4].mxu0 %v2877_v55 }
 0x667   :  { %16608 = vmatpush3.bf16.msra.mxu0 %v16605_v11  ;;  %15181 = vmatprep.mubr.f32.mxu0 %v2868_v62 }
 0x668   :  { %16610 = vmatprep.subr.bf16.mxu0 %v18105_v29 }
 0x66e   :  { %15182 = vmatmul.mubr.f32.vlgmr.msra.gmra.mrb[4].mxu0 %v2878_v61 }
 0x66f   :  { %16612 = vmatpush3.bf16.msra.mxu0 %v18105_v29  ;;  %15188 = vmatprep.mubr.f32.mxu0 %v2869_v38 }
 0x670   :  { %16614 = vmatprep.subr.bf16.mxu0 %v16613_v13 }
 0x676   :  { %15189 = vmatmul.mubr.f32.vlgmr.msra.gmra.mrb[4].mxu0 %v2879_v63 }
 0x677   :  { %16616 = vmatpush3.bf16.msra.mxu0 %v16613_v13  ;;  %15195 = vmatprep.mubr.f32.mxu0 %v2867_v60 }
 0x678   :  { %16618 = vmatprep.subr.bf16.mxu0 %v18105_v29 }
 0x67e   :  { %15196 = vmatmul.mubr.f32.vlgmr.msra.gmra.mrb[4].mxu0 %v2877_v55 }
 0x67f   :  { %16620 = vmatpush3.bf16.msra.mxu0 %v18105_v29  ;;  %15202 = vmatprep.mubr.f32.mxu0 %v2867_v60  ;;  %v16637_v29 = vpack.c.bf16 %v3415_v27, %v3408_v26 }
 0x680   :  { %16622 = vmatprep.subr.bf16.mxu0 %v16621_v31 }
 0x686   :  { %15203 = vmatmul.mubr.f32.vlgmr.msra.gmra.mrb[4].mxu0 %v2877_v55 }
 0x687   :  { %15209 = vmatprep.mubr.f32.mxu0 %v3389_v41 }
 0x688   :  { %16624 = vmatpush3.bf16.xpose.msra.mxu0 %v16621_v31 }
 0x689   :  { %16626 = vmatprep.subr.bf16.mxu0 %v16625_v42 }
 0x68f   :  { %15210 = vmatmul.mubr.f32.vlgmr.msra.gmra.mrb[6].mxu0 %v3399_v44 }
 0x690   :  { %16628 = vmatpush3.bf16.xpose.msra.mxu0 %v16625_v42  ;;  %15216 = vmatprep.mubr.f32.mxu0 %v3385_v49 }
 0x691   :  { %16630 = vmatprep.subr.bf16.mxu0 %v16629_v45 }
 0x697   :  { %15217 = vmatmul.mubr.f32.vlgmr.msra.gmra.mrb[6].mxu0 %v3395_v30 }
 0x698   :  { %16632 = vmatpush3.bf16.xpose.msra.mxu0 %v16629_v45  ;;  %15223 = vmatprep.mubr.f32.mxu0 %v3386_v24 }
 0x699   :  { %16634 = vmatprep.subr.bf16.mxu0 %v16621_v31 }
 0x69f   :  { %15224 = vmatmul.mubr.f32.vlgmr.msra.gmra.mrb[6].mxu0 %v3396_v35 }
 0x6a0   :  { %16636 = vmatpush3.bf16.xpose.msra.mxu0 %v16621_v31  ;;  %15230 = vmatprep.mubr.f32.mxu0 %v3387_v28 }
 0x6a1   :  { %16638 = vmatprep.subr.bf16.mxu0 %v16637_v29 }
 0x6a7   :  { %15231 = vmatmul.mubr.f32.vlgmr.msra.gmra.mrb[6].mxu0 %v3397_v40 }
 0x6a8   :  { %16640 = vmatpush3.bf16.xpose.msra.mxu0 %v16637_v29  ;;  %15237 = vmatprep.mubr.f32.mxu0 %v3385_v49 }
 0x6a9   :  { %16642 = vmatprep.subr.bf16.mxu0 %v16621_v31 }
 0x6af   :  { %15238 = vmatmul.mubr.f32.vlgmr.msra.gmra.mrb[6].mxu0 %v3395_v30 }
 0x6b0   :  { %16644 = vmatpush3.bf16.xpose.msra.mxu0 %v16621_v31  ;;  %15244 = vmatprep.mubr.f32.mxu0 %v3385_v49 }
 0x6b7   :  { %15245 = vmatmul.mubr.f32.vlgmr.msra.gmra.mrb[6].mxu0 %v3395_v30 }
 0x759   :  { %v18119_v46 = vpop.f32.mrb[4].mxu0 }
 0x75a   :  { %v18121_v47 = vpop.f32.mrb[5].mxu0 }
 0x78a   :  { %v15246_v48 = vpop.f32.mrb[6].mxu0 }
 0x78b   :  { %v17493_v52 = vadd.f32 %v15246_v48, %v18040_v18  ;;  %v3810_v54 = vpop.f32.mrb[7].mxu0 }
 0x78c   :  { %v17494_v55 = vadd.f32 %v3810_v54, %v18043_v19 }
 0x78d   :  { %v3823_v59 = vsel %vm1703_vm6, %v17493_v52, -inf }
 0x78e   :  { %3824 = vmax.xlane.f32.xlu0 %v3823_v59  ;;  %v3820_v60 = vsel %vm1703_vm6, %v17494_v55, -inf }
 0x78f   :  { %3821 = vmax.xlane.f32.xlu1 %v3820_v60 }
 0x81b   :  { %v3825_v61 = vpop.xlane.xlu0 %3824 }
 0x81c   :  { %v3827_v62 = vsub.f32 %v17493_v52, %v3825_v61  ;;  %v3822_v63 = vpop.xlane.xlu1 %3821 }
 0x81d   :  { %v3826_v38 = vsub.f32 %v17494_v55, %v3822_v63 }
 0x81e   :  { %v3830_v6 = vmul.f32 1.442695, %v3827_v62 }
 0x81f   :  { %v3828_v8 = vmul.f32 1.442695, %v3826_v38 }
 0x820   :  { %17807 = vpow2.f32 %v3830_v6 }
 0x821   :  { %17809 = vpow2.f32 %v3828_v8 }
 0x82a   :  { %v17808_v9 = vpop.eup %17807 }
 0x82b   :  { %v17810_v10 = vpop.eup %17809  ;;  %v3835_v11 = vsel %vm1703_vm6, %v17808_v9, 0.0 }
 0x82c   :  { %3836 = vadd.xlane.f32.xlu1 %v3835_v11  ;;  %v3832_v0 = vsel %vm1703_vm6, %v17810_v10, 0.0 }
 0x82d   :  { %3833 = vadd.xlane.f32.xlu0 %v3832_v0 }
 0x83d   :  { %3850 = vrot.lane.b32.xlu1 %v18055_v33, %s17878_s10 }
 0x841   :  { %4366 = vrot.lane.b32.xlu1 %v17982_v56, %s17879_s11 }
 0x843   :  { %3848 = vrot.lane.b32.xlu0 %v18057_v34, %s17878_s10 }
 0x845   :  { %4362 = vrot.lane.b32.xlu1 %v17985_v57, %s17880_s12 }
 0x847   :  { %4368 = vrot.lane.b32.xlu0 %v17990_v58, %s17879_s11 }
 0x84b   :  { %4364 = vrot.lane.b32.xlu0 %v18005_v4, %s17880_s12 }
 0x8b9   :  { %v3837_v12 = vpop.xlane.xlu1 %3836 }
 0x8ba   :  { %17811 = vrcp.f32 %v3837_v12  ;;  %v3834_v13 = vpop.xlane.xlu0 %3833 }
 0x8bb   :  { %17813 = vrcp.f32 %v3834_v13 }
 0x8bd   :  { %v3851_v2 = vpop.permute.xlu1 %3850 }
 0x8be   :  { %v3864_v14 = vand.u32 4294901760, %v3851_v2  ;;  %v3849_v56 = vpop.permute.xlu0 %3848 }
 0x8bf   :  { %v3861_v1 = vand.u32 4294901760, %v3849_v56 }
 0x8c0   :  { %v3956_v15 = vsub.f32 %v3851_v2, %v3864_v14 }
 0x8c1   :  { %v18141_v16 = vpack.c.bf16 %v3864_v14, %v3861_v1  ;;  %v3949_v20 = vsub.f32 %v3849_v56, %v3861_v1  ;;  %v4367_v55 = vpop.permute.xlu1 %4366 }
 0x8c2   :  { %v3957_v49 = vand.u32 4294901760, %v3956_v15  ;;  %v4369_v59 = vpop.permute.xlu0 %4368  ;;  %v4374_v62 = vsel %vm1190_vm1, %v4367_v55, 0 }
 0x8c3   :  { %v3950_v57 = vand.u32 4294901760, %v3949_v20  ;;  %16646 = vmatprep.subr.bf16.mxu1 %v18141_v16  ;;  %v16653_v54 = vpack.c.bf16 %v3956_v15, %v3949_v20  ;;  %v4376_v63 = vsel %vm1190_vm1, %v4369_v59, 0  ;;  %v4379_v6 = vand.u32 4294901760, %v4374_v62 }
 0x8c4   :  { %v17812_v58 = vpop.eup %17811  ;;  %16648 = vmatpush3.bf16.msra.mxu1 %v18141_v16  ;;  %v3958_v22 = vsub.f32 %v3956_v15, %v3957_v49  ;;  %v4382_v8 = vand.u32 4294901760, %v4376_v63 }
 0x8c5   :  { %v17814_v4 = vpop.eup %17813  ;;  %v3841_v21 = vmul.f32 %v17812_v58, %v3837_v12  ;;  %v3951_v23 = vsub.f32 %v3949_v20, %v3950_v57  ;;  %v16661_v60 = vpack.c.bf16 %v3957_v49, %v3950_v57  ;;  %v4363_v61 = vpop.permute.xlu1 %4362 }
 0x8c6   :  { %v3840_v24 = vmul.f32 %v17814_v4, %v3834_v13  ;;  %v3959_v30 = vand.u32 4294901760, %v3958_v22  ;;  %v4370_v38 = vsel %vm1190_vm1, %v4363_v61, 0  ;;  %v4474_v11 = vsub.f32 %v4376_v63, %v4382_v8  ;;  %v4365_v0 = vpop.permute.xlu0 %4364 }
 0x8c7   :  { %v3843_v25 = vsub.f32 2.0, %v3841_v21  ;;  %v3952_v27 = vand.u32 4294901760, %v3951_v23  ;;  %v4372_v13 = vsel %vm1190_vm1, %v4365_v0, 0  ;;  %v16669_v15 = vpack.c.bf16 %v4382_v8, %v4379_v6 }
 0x8c8   :  { %v3842_v26 = vsub.f32 2.0, %v3840_v24  ;;  %v4475_v14 = vand.u32 4294901760, %v4474_v11  ;;  %v4455_v1 = vand.u32 4294901760, %v4372_v13 }
 0x8c9   :  { %v3845_v28 = vmul.f32 %v17812_v58, %v3843_v25  ;;  %v16649_v53 = vpack.c.bf16 %v3959_v30, %v3952_v27 }
 0x8ca   :  { %v3844_v31 = vmul.f32 %v17814_v4, %v3842_v26  ;;  %v4476_v49 = vsub.f32 %v4474_v11, %v4475_v14  ;;  %v4456_v57 = vsub.f32 %v4372_v13, %v4455_v1 }
 0x8cb   :  { %v3847_v32 = vmul.f32 %v17808_v9, %v3845_v28  ;;  %16650 = vmatprep.subr.bf16.mxu1 %v16649_v53  ;;  %v4445_v9 = vand.u32 4294901760, %v4370_v38 }
 0x8cc   :  { %v3846_v35 = vmul.f32 %v17810_v10, %v3844_v31  ;;  %v4467_v10 = vsub.f32 %v4374_v62, %v4379_v6  ;;  %v4477_v21 = vand.u32 4294901760, %v4476_v49  ;;  %v4457_v22 = vand.u32 4294901760, %v4456_v57 }
 0x8cd   :  { %v3858_v36 = vsel %vm1703_vm6, %v3847_v32, 0  ;;  %v4446_v12 = vsub.f32 %v4370_v38, %v4445_v9 }
 0x8ce   :  { %v3937_v37 = vand.u32 4294901760, %v3858_v36  ;;  %v3855_v39 = vsel %vm1703_vm6, %v3846_v35, 0  ;;  %v4468_v2 = vand.u32 4294901760, %v4467_v10  ;;  %v4458_v25 = vsub.f32 %v4456_v57, %v4457_v22 }
 0x8cf   :  { %v3927_v40 = vand.u32 4294901760, %v3855_v39  ;;  %v4447_v56 = vand.u32 4294901760, %v4446_v12  ;;  %v16677_v27 = vpack.c.bf16 %v4474_v11, %v4467_v10 }
 0x8d0   :  { %v3938_v41 = vsub.f32 %v3858_v36, %v3937_v37  ;;  %v4469_v20 = vsub.f32 %v4467_v10, %v4468_v2  ;;  %v4459_v26 = vand.u32 4294901760, %v4458_v25 }
 0x8d1   :  { %v3928_v42 = vsub.f32 %v3855_v39, %v3927_v40  ;;  %v4448_v58 = vsub.f32 %v4446_v12, %v4447_v56 }
 0x8d2   :  { %v3939_v43 = vand.u32 4294901760, %v3938_v41  ;;  %v4470_v4 = vand.u32 4294901760, %v4469_v20 }
 0x8d3   :  { %v3929_v44 = vand.u32 4294901760, %v3928_v42  ;;  %v4449_v23 = vand.u32 4294901760, %v4448_v58 }
 0x8d4   :  { %v3940_v45 = vsub.f32 %v3938_v41, %v3939_v43  ;;  %v16673_v24 = vpack.c.bf16 %v4477_v21, %v4470_v4 }
 0x8d5   :  { %v3930_v29 = vsub.f32 %v3928_v42, %v3929_v44 }
 0x8d6   :  { %v3941_v52 = vand.u32 4294901760, %v3940_v45 }
 0x8d7   :  { %v3931_v48 = vand.u32 4294901760, %v3930_v29 }
 0x8d9   :  { %15251 = vmatprep.mubr.f32.mxu1 %v3931_v48 }
 0x8da   :  { %15252 = vmatmul.mubr.f32.vlgmr.msra.gmra.mrb[6].mxu1 %v3941_v52 }
 0x8db   :  { %16652 = vmatpush3.bf16.msra.mxu1 %v16649_v53  ;;  %15258 = vmatprep.mubr.f32.mxu1 %v3927_v40 }
 0x8dc   :  { %16654 = vmatprep.subr.bf16.mxu1 %v16653_v54 }
 0x8e2   :  { %15259 = vmatmul.mubr.f32.vlgmr.msra.gmra.mrb[6].mxu1 %v3937_v37 }
 0x8e3   :  { %16656 = vmatpush3.bf16.msra.mxu1 %v16653_v54  ;;  %15265 = vmatprep.mubr.f32.mxu1 %v3928_v42 }
 0x8e4   :  { %16658 = vmatprep.subr.bf16.mxu1 %v18141_v16 }
 0x8ea   :  { %15266 = vmatmul.mubr.f32.vlgmr.msra.gmra.mrb[6].mxu1 %v3938_v41 }
 0x8eb   :  { %16660 = vmatpush3.bf16.msra.mxu1 %v18141_v16  ;;  %15272 = vmatprep.mubr.f32.mxu1 %v3929_v44 }
 0x8ec   :  { %16662 = vmatprep.subr.bf16.mxu1 %v16661_v60 }
 0x8f2   :  { %15273 = vmatmul.mubr.f32.vlgmr.msra.gmra.mrb[6].mxu1 %v3939_v43 }
 0x8f3   :  { %16664 = vmatpush3.bf16.msra.mxu1 %v16661_v60  ;;  %15279 = vmatprep.mubr.f32.mxu1 %v3927_v40 }
 0x8f4   :  { %16666 = vmatprep.subr.bf16.mxu1 %v18141_v16 }
 0x8fa   :  { %15280 = vmatmul.mubr.f32.vlgmr.msra.gmra.mrb[6].mxu1 %v3937_v37 }
 0x8fb   :  { %16668 = vmatpush3.bf16.msra.mxu1 %v18141_v16  ;;  %15286 = vmatprep.mubr.f32.mxu1 %v3927_v40  ;;  %v16685_v16 = vpack.c.bf16 %v4475_v14, %v4468_v2 }
 0x8fc   :  { %16670 = vmatprep.subr.bf16.mxu1 %v16669_v15 }
 0x902   :  { %15287 = vmatmul.mubr.f32.vlgmr.msra.gmra.mrb[6].mxu1 %v3937_v37 }
 0x903   :  { %15293 = vmatprep.mubr.f32.mxu1 %v4449_v23 }
 0x904   :  { %16672 = vmatpush3.bf16.xpose.msra.mxu1 %v16669_v15 }
 0x905   :  { %16674 = vmatprep.subr.bf16.mxu1 %v16673_v24 }
 0x90b   :  { %15294 = vmatmul.mubr.f32.vlgmr.msra.gmra.mrb[8].mxu1 %v4459_v26 }
 0x90c   :  { %16676 = vmatpush3.bf16.xpose.msra.mxu1 %v16673_v24  ;;  %15300 = vmatprep.mubr.f32.mxu1 %v4445_v9 }
 0x90d   :  { %16678 = vmatprep.subr.bf16.mxu1 %v16677_v27 }
 0x913   :  { %15301 = vmatmul.mubr.f32.vlgmr.msra.gmra.mrb[8].mxu1 %v4455_v1 }
 0x914   :  { %16680 = vmatpush3.bf16.xpose.msra.mxu1 %v16677_v27  ;;  %15307 = vmatprep.mubr.f32.mxu1 %v4446_v12 }
 0x915   :  { %16682 = vmatprep.subr.bf16.mxu1 %v16669_v15 }
 0x91b   :  { %15308 = vmatmul.mubr.f32.vlgmr.msra.gmra.mrb[8].mxu1 %v4456_v57 }
 0x91c   :  { %16684 = vmatpush3.bf16.xpose.msra.mxu1 %v16669_v15  ;;  %15314 = vmatprep.mubr.f32.mxu1 %v4447_v56 }
 0x91d   :  { %16686 = vmatprep.subr.bf16.mxu1 %v16685_v16 }
 0x923   :  { %15315 = vmatmul.mubr.f32.vlgmr.msra.gmra.mrb[8].mxu1 %v4457_v22 }
 0x924   :  { %16688 = vmatpush3.bf16.xpose.msra.mxu1 %v16685_v16  ;;  %15321 = vmatprep.mubr.f32.mxu1 %v4445_v9 }
 0x925   :  { %16690 = vmatprep.subr.bf16.mxu1 %v16669_v15 }
 0x92b   :  { %15322 = vmatmul.mubr.f32.vlgmr.msra.gmra.mrb[8].mxu1 %v4455_v1 }
 0x92c   :  { %16692 = vmatpush3.bf16.xpose.msra.mxu1 %v16669_v15  ;;  %15328 = vmatprep.mubr.f32.mxu1 %v4445_v9 }
 0x933   :  { %15329 = vmatmul.mubr.f32.vlgmr.msra.gmra.mrb[8].mxu1 %v4455_v1 }
 0x9d5   :  { %v15288_v28 = vpop.f32.mrb[6].mxu1 }
 0x9d6   :  { %v4352_v30 = vpop.f32.mrb[7].mxu1 }
 0xa06   :  { %v15330_v31 = vpop.f32.mrb[8].mxu1 }
 0xa07   :  { %v17495_v32 = vadd.f32 %v15330_v31, %v18040_v18  ;;  %v4870_v53 = vpop.f32.mrb[9].mxu1 }
 0xa08   :  { %v17496_v35 = vadd.f32 %v4870_v53, %v18043_v19 }
 0xa09   :  { %v4883_v36 = vsel %vm1703_vm6, %v17495_v32, -inf }
 0xa0a   :  { %4884 = vmax.xlane.f32.xlu0 %v4883_v36  ;;  %v4880_v37 = vsel %vm1703_vm6, %v17496_v35, -inf  ;;  %v1181_v36 = vld [vmem:[%s19105_s2 + $0x18] sm:$0xff] }
 0xa0b   :  { %4881 = vmax.xlane.f32.xlu1 %v4880_v37 }
 0xa97   :  { %v4885_v39 = vpop.xlane.xlu0 %4884 }
 0xa98   :  { %v4887_v40 = vsub.f32 %v17495_v32, %v4885_v39  ;;  %v4882_v41 = vpop.xlane.xlu1 %4881 }
 0xa99   :  { %v4886_v42 = vsub.f32 %v17496_v35, %v4882_v41  ;;  %v1180_v35 = vld [vmem:[%s19105_s2 + $0x10] sm:$0xff]  ;;  %v5473_v41 = vand.u32 4294901760, %v1181_v36 }
 0xa9a   :  { %v4890_v43 = vmul.f32 1.442695, %v4887_v40  ;;  %v5470_v40 = vand.u32 4294901760, %v1180_v35 }
 0xa9b   :  { %v4888_v44 = vmul.f32 1.442695, %v4886_v42 }
 0xa9c   :  { %17815 = vpow2.f32 %v4890_v43 }
 0xa9d   :  { %17817 = vpow2.f32 %v4888_v44  ;;  %v18189_v44 = vpack.c.bf16 %v5473_v41, %v5470_v40 }
 0xaa6   :  { %v17816_v45 = vpop.eup %17815 }
 0xaa7   :  { %v17818_v29 = vpop.eup %17817  ;;  %v4895_v18 = vsel %vm1703_vm6, %v17816_v45, 0.0 }
 0xaa8   :  { %4896 = vadd.xlane.f32.xlu1 %v4895_v18  ;;  %v4892_v19 = vsel %vm1703_vm6, %v17818_v29, 0.0  ;;  %v5568_v18 = vsub.f32 %v1180_v35, %v5470_v40  ;;  %v17868_v35 = vld [vmem:[%s19103_s0 + $0x8] sm:$0xff] }
 0xaa9   :  { %4893 = vadd.xlane.f32.xlu0 %v4892_v19  ;;  %v5575_v19 = vsub.f32 %v1181_v36, %v5473_v41 }
 0xab9   :  { %4910 = vrot.lane.b32.xlu1 %v18055_v33, %s17880_s12 }
 0xabd   :  { %5424 = vrot.lane.b32.xlu1 %v18121_v47, %s17881_s13 }
 0xabf   :  { %4908 = vrot.lane.b32.xlu0 %v18057_v34, %s17880_s12 }
 0xac1   :  { %5432 = vrot.lane.b32.xlu1 %v4352_v30, %s17882_s14  ;;  %v1179_v30 = vld [vmem:[%s19105_s2 + $0x8] sm:$0xff] }
 0xac2   :  { %v5467_v32 = vand.u32 4294901760, %v1179_v30 }
 0xac3   :  { %5426 = vrot.lane.b32.xlu0 %v18119_v46, %s17881_s13 }
 0xac4   :  { %v5561_v39 = vsub.f32 %v1179_v30, %v5467_v32 }
 0xac6   :  { %v5562_v43 = vand.u32 4294901760, %v5561_v39 }
 0xac7   :  { %5434 = vrot.lane.b32.xlu0 %v15288_v28, %s17882_s14  ;;  %v1178_v28 = vld [vmem:[%s19105_s2] sm:$0xff] }
 0xac8   :  { %v5464_v31 = vand.u32 4294901760, %v1178_v28 }
 0xaca   :  { %v18179_v53 = vpack.c.bf16 %v5467_v32, %v5464_v31  ;;  %v5554_v37 = vsub.f32 %v1178_v28, %v5464_v31 }
 0xacc   :  { %v5555_v42 = vand.u32 4294901760, %v5554_v37 }
 0xb35   :  { %v4897_v48 = vpop.xlane.xlu1 %4896 }
 0xb36   :  { %17819 = vrcp.f32 %v4897_v48  ;;  %v4894_v52 = vpop.xlane.xlu0 %4893 }
 0xb37   :  { %17821 = vrcp.f32 %v4894_v52 }
 0xb39   :  { %v4911_v33 = vpop.permute.xlu1 %4910 }
 0xb3a   :  { %v4924_v54 = vand.u32 4294901760, %v4911_v33  ;;  %v4909_v55 = vpop.permute.xlu0 %4908 }
 0xb3b   :  { %v4921_v59 = vand.u32 4294901760, %v4909_v55 }
 0xb3c   :  { %v5016_v47 = vsub.f32 %v4911_v33, %v4924_v54 }
 0xb3d   :  { %v16693_v60 = vpack.c.bf16 %v4924_v54, %v4921_v59  ;;  %v5009_v61 = vsub.f32 %v4909_v55, %v4921_v59  ;;  %v5569_v54 = vand.u32 4294901760, %v5568_v18  ;;  %v5576_v55 = vand.u32 4294901760, %v5575_v19 }
 0xb3e   :  { %v5017_v34 = vand.u32 4294901760, %v5016_v47 }
 0xb3f   :  { %v5010_v62 = vand.u32 4294901760, %v5009_v61  ;;  %16694 = vmatprep.subr.bf16.mxu0 %v16693_v60  ;;  %v16701_v27 = vpack.c.bf16 %v5016_v47, %v5009_v61 }
 0xb40   :  { %v17820_v63 = vpop.eup %17819  ;;  %v5018_v38 = vsub.f32 %v5016_v47, %v5017_v34  ;;  %16696 = vmatpush3.bf16.msra.mxu0 %v16693_v60 }
 0xb41   :  { %v17822_v46 = vpop.eup %17821  ;;  %v4901_v6 = vmul.f32 %v17820_v63, %v4897_v48  ;;  %v5011_v8 = vsub.f32 %v5009_v61, %v5010_v62  ;;  %v16709_v16 = vpack.c.bf16 %v5017_v34, %v5010_v62  ;;  %v5577_v61 = vsub.f32 %v5575_v19, %v5576_v55 }
 0xb42   :  { %v4900_v9 = vmul.f32 %v17822_v46, %v4894_v52  ;;  %v5019_v10 = vand.u32 4294901760, %v5018_v38  ;;  %v16733_v38 = vpack.c.bf16 %v5561_v39, %v5554_v37 }
 0xb43   :  { %v4903_v11 = vsub.f32 2.0, %v4901_v6  ;;  %v5012_v0 = vand.u32 4294901760, %v5011_v8  ;;  %v5578_v62 = vand.u32 4294901760, %v5577_v61  ;;  %v16749_v6 = vpack.c.bf16 %v5562_v43, %v5555_v42 }
 0xb44   :  { %v4902_v12 = vsub.f32 2.0, %v4900_v9  ;;  %v16753_v8 = vpack.c.bf16 %v5576_v55, %v5569_v54  ;;  %v5427_v9 = vpop.permute.xlu0 %5426 }
 0xb45   :  { %v4905_v13 = vmul.f32 %v17820_v63, %v4903_v11  ;;  %v16697_v2 = vpack.c.bf16 %v5019_v10, %v5012_v0  ;;  %v5425_v10 = vpop.permute.xlu1 %5424 }
 0xb46   :  { %v4904_v14 = vmul.f32 %v17822_v46, %v4902_v12  ;;  %v16737_v46 = vpack.c.bf16 %v5575_v19, %v5568_v18  ;;  %v5447_v12 = vsel %vm1190_vm1, %v18083_v3, %v5427_v9  ;;  %v6037_v19 = vld [vmem:[%s19102_s1 + $0x38] sm:$0xff] }
 0xb47   :  { %v4907_v56 = vmul.f32 %v17816_v45, %v4905_v13  ;;  %16698 = vmatprep.subr.bf16.mxu0 %v16697_v2  ;;  %v5556_v45 = vsub.f32 %v5554_v37, %v5555_v42  ;;  %v5446_v13 = vsel %vm1190_vm1, %v18085_v7, %v5425_v10  ;;  %v17869_v37 = vld [vmem:[%s19103_s0] sm:$0xff]  ;;  %v6035_v42 = vld [vmem:[%s19102_s1 + $0x28] sm:$0xff] }
 0xb48   :  { %v4906_v1 = vmul.f32 %v17818_v29, %v4904_v14  ;;  %v5563_v29 = vsub.f32 %v5561_v39, %v5562_v43  ;;  %v5435_v11 = vpop.permute.xlu0 %5434  ;;  %v6052_v43 = vand.u32 4294901760, %v6035_v42 }
 0xb49   :  { %v4918_v15 = vsel %vm1703_vm6, %v4907_v56, 0  ;;  %v5557_v52 = vand.u32 4294901760, %v5556_v45  ;;  %v5433_v0 = vpop.permute.xlu1 %5432 }
 0xb4a   :  { %v4997_v20 = vand.u32 4294901760, %v4918_v15  ;;  %v4915_v49 = vsel %vm1703_vm6, %v4906_v1, 0  ;;  %v5564_v33 = vand.u32 4294901760, %v5563_v29  ;;  %v5448_v56 = vsel %vm1703_vm6, %v5446_v13, %v5433_v0  ;;  %v19_v0 = vld [vmem:[%s19103_s0 + $0x10] sm:$0xff] }
 0xb4b   :  { %v4987_v57 = vand.u32 4294901760, %v4915_v49 }
 0xb4c   :  { %v4998_v58 = vsub.f32 %v4918_v15, %v4997_v20  ;;  %v16725_v47 = vpack.c.bf16 %v5564_v33, %v5557_v52  ;;  %v6058_v52 = vand.u32 4294901760, %v6037_v19 }
 0xb4d   :  { %v4988_v4 = vsub.f32 %v4915_v49, %v4987_v57 }
 0xb4e   :  { %v4999_v21 = vand.u32 4294901760, %v4998_v58  ;;  %v6160_v9 = vsub.f32 %v6037_v19, %v6058_v52 }
 0xb4f   :  { %v4989_v22 = vand.u32 4294901760, %v4988_v4 }
 0xb50   :  { %v5000_v23 = vsub.f32 %v4998_v58, %v4999_v21 }
 0xb51   :  { %v4990_v24 = vsub.f32 %v4988_v4, %v4989_v22 }
 0xb52   :  { %v5001_v26 = vand.u32 4294901760, %v5000_v23 }
 0xb53   :  { %v4991_v25 = vand.u32 4294901760, %v4990_v24 }
 0xb55   :  { %15335 = vmatprep.mubr.f32.mxu0 %v4991_v25 }
 0xb56   :  { %15336 = vmatmul.mubr.f32.vlgmr.msra.gmra.mrb[8].mxu0 %v5001_v26 }
 0xb57   :  { %16700 = vmatpush3.bf16.msra.mxu0 %v16697_v2  ;;  %15342 = vmatprep.mubr.f32.mxu0 %v4987_v57  ;;  %v5449_v2 = vsel %vm1703_vm6, %v5447_v12, %v5435_v11  ;;  %v6597_v12 = vsel %vm89_vm0, %v19_v0, 0 }
 0xb58   :  { %16702 = vmatprep.subr.bf16.mxu0 %v16701_v27 }
 0xb5e   :  { %15343 = vmatmul.mubr.f32.vlgmr.msra.gmra.mrb[8].mxu0 %v4997_v20 }
 0xb5f   :  { %16704 = vmatpush3.bf16.msra.mxu0 %v16701_v27  ;;  %15349 = vmatprep.mubr.f32.mxu0 %v4988_v4  ;;  %v5455_v27 = vsub.s32 3, %v17971_v50 }
 0xb60   :  { %16706 = vmatprep.subr.bf16.mxu0 %v16693_v60 }
 0xb66   :  { %15350 = vmatmul.mubr.f32.vlgmr.msra.gmra.mrb[8].mxu0 %v4998_v58 }
 0xb67   :  { %16708 = vmatpush3.bf16.msra.mxu0 %v16693_v60  ;;  %15356 = vmatprep.mubr.f32.mxu0 %v4989_v22 }
 0xb68   :  { %16710 = vmatprep.subr.bf16.mxu0 %v16709_v16 }
 0xb6e   :  { %15357 = vmatmul.mubr.f32.vlgmr.msra.gmra.mrb[8].mxu0 %v4999_v21 }
 0xb6f   :  { %16712 = vmatpush3.bf16.msra.mxu0 %v16709_v16  ;;  %15363 = vmatprep.mubr.f32.mxu0 %v4987_v57  ;;  %v18217_v16 = vld [vmem:[%s19104_s3] sm:$0xff] }
 0xb70   :  { %16714 = vmatprep.subr.bf16.mxu0 %v16693_v60  ;;  %v5456_v28 = vrot.slane %v18217_v16, %v5455_v27 }
 0xb76   :  { %15364 = vmatmul.mubr.f32.vlgmr.msra.gmra.mrb[8].mxu0 %v4997_v20 }
 0xb77   :  { %16716 = vmatpush3.bf16.msra.mxu0 %v16693_v60  ;;  %15370 = vmatprep.mubr.f32.mxu0 %v4987_v57  ;;  %v5570_v60 = vsub.f32 %v5568_v18, %v5569_v54  ;;  %v6036_v18 = vld [vmem:[%s19102_s1 + $0x30] sm:$0xff] }
 0xb78   :  { %16718 = vmatprep.subr.bf16.mxu0 %v18179_v53 }
 0xb79   :  { %v5571_v34 = vand.u32 4294901760, %v5570_v60 }
 0xb7b   :  { %v16729_v63 = vpack.c.bf16 %v5578_v62, %v5571_v34 }
 0xb7e   :  { %15371 = vmatmul.mubr.f32.vlgmr.msra.gmra.mrb[8].mxu0 %v4997_v20 }
 0xb7f   :  { %16720 = vmatpush3.bf16.msra.mxu0 %v18179_v53 }
 0xb80   :  { %16722 = vmatprep.subr.bf16.mxu0 %v18189_v44 }
 0xb83   :  { %16724 = vmatpush3.bf16.msra.mxu0 %v18189_v44 }
 0xb84   :  { %16726 = vmatprep.subr.bf16.mxu0 %v16725_v47 }
 0xc51   :  { %v15372_v48 = vpop.f32.mrb[8].mxu0 }
 0xc52   :  { %5442 = vrot.lane.b32.xlu0 %v15372_v48, %s17883_s23  ;;  %v5412_v59 = vpop.f32.mrb[9].mxu0  ;;  %v6055_v48 = vand.u32 4294901760, %v6036_v18 }
 0xc53   :  { %5440 = vrot.lane.b32.xlu1 %v5412_v59, %s17883_s23 }
 0xc54   :  { %v18246_v33 = vpack.c.bf16 %v6058_v52, %v6055_v48 }
 0xcc4   :  { %v5443_v14 = vpop.permute.xlu0 %5442 }
 0xcc5   :  { %v5452_v1 = vsel %vm5450_vm7, %v5449_v2, %v5443_v14  ;;  %v5441_v15 = vpop.permute.xlu1 %5440  ;;  %v18268_v14 = vand.u32 4294901760, %v6597_v12 }
 0xcc6   :  { %v5461_v20 = vsel %vm89_vm0, %v5452_v1, 0  ;;  %v5451_v49 = vsel %vm5450_vm7, %v5448_v56, %v5441_v15 }
 0xcc7   :  { %v5542_v57 = vand.u32 4294901760, %v5461_v20  ;;  %v5458_v58 = vsel %vm89_vm0, %v5451_v49, 0  ;;  %v18271_v49 = vsub.f32 %v6597_v12, %v18268_v14 }
 0xcc8   :  { %v5532_v4 = vand.u32 4294901760, %v5458_v58 }
 0xcc9   :  { %v5543_v3 = vsub.f32 %v5461_v20, %v5542_v57  ;;  %v6161_v20 = vand.u32 4294901760, %v6160_v9 }
 0xcca   :  { %v5533_v21 = vsub.f32 %v5458_v58, %v5532_v4 }
 0xccb   :  { %v5544_v22 = vand.u32 4294901760, %v5543_v3 }
 0xccc   :  { %v5534_v7 = vand.u32 4294901760, %v5533_v21 }
 0xccd   :  { %v5545_v23 = vsub.f32 %v5543_v3, %v5544_v22 }
 0xcce   :  { %v5535_v24 = vsub.f32 %v5533_v21, %v5534_v7 }
 0xccf   :  { %v5546_v26 = vand.u32 4294901760, %v5545_v23 }
 0xcd0   :  { %v5536_v25 = vand.u32 4294901760, %v5535_v24 }
 0xcd2   :  { %15381 = vmatprep.mubr.f32.mxu0 %v5536_v25 }
 0xcd3   :  { %15382 = vmatmul.mubr.f32.vlgmr.msra.gmra.mrb[10].mxu0 %v5546_v26 }
 0xcd4   :  { %16728 = vmatpush3.bf16.msra.mxu0 %v16725_v47  ;;  %15392 = vmatprep.mubr.f32.mxu0 %v5532_v4 }
 0xcd5   :  { %16730 = vmatprep.subr.bf16.mxu0 %v16729_v63 }
 0xcd8   :  { %16732 = vmatpush3.bf16.msra.mxu0 %v16729_v63 }
 0xcd9   :  { %16734 = vmatprep.subr.bf16.mxu0 %v16733_v38 }
 0xcdb   :  { %15393 = vmatmul.mubr.f32.vlgmr.msra.gmra.mrb[10].mxu0 %v5542_v57 }
 0xcdc   :  { %16736 = vmatpush3.bf16.msra.mxu0 %v16733_v38  ;;  %15403 = vmatprep.mubr.f32.mxu0 %v5533_v21 }
 0xcdd   :  { %16738 = vmatprep.subr.bf16.mxu0 %v16737_v46 }
 0xce0   :  { %16740 = vmatpush3.bf16.msra.mxu0 %v16737_v46  ;;  %v6146_v46 = vsub.f32 %v6035_v42, %v6052_v43 }
 0xce1   :  { %16742 = vmatprep.subr.bf16.mxu0 %v18179_v53 }
 0xce2   :  { %v6147_v11 = vand.u32 4294901760, %v6146_v46 }
 0xce3   :  { %15404 = vmatmul.mubr.f32.vlgmr.msra.gmra.mrb[10].mxu0 %v5543_v3  ;;  %v6679_v3 = vand.u32 4294901760, %v18271_v49 }
 0xce4   :  { %16744 = vmatpush3.bf16.msra.mxu0 %v18179_v53  ;;  %15414 = vmatprep.mubr.f32.mxu0 %v5534_v7  ;;  %v6148_v2 = vsub.f32 %v6146_v46, %v6147_v11 }
 0xce5   :  { %16746 = vmatprep.subr.bf16.mxu0 %v18189_v44  ;;  %v6680_v7 = vsub.f32 %v18271_v49, %v6679_v3 }
 0xce6   :  { %v6149_v1 = vand.u32 4294901760, %v6148_v2 }
 0xce7   :  { %v6681_v24 = vand.u32 4294901760, %v6680_v7 }
 0xce8   :  { %16748 = vmatpush3.bf16.msra.mxu0 %v18189_v44 }
 0xce9   :  { %16750 = vmatprep.subr.bf16.mxu0 %v16749_v6 }
 0xceb   :  { %15415 = vmatmul.mubr.f32.vlgmr.msra.gmra.mrb[10].mxu0 %v5544_v22 }
 0xcec   :  { %16752 = vmatpush3.bf16.msra.mxu0 %v16749_v6  ;;  %15425 = vmatprep.mubr.f32.mxu0 %v5532_v4 }
 0xced   :  { %16754 = vmatprep.subr.bf16.mxu0 %v16753_v8 }
 0xcf0   :  { %16756 = vmatpush3.bf16.msra.mxu0 %v16753_v8  ;;  %v6153_v8 = vsub.f32 %v6036_v18, %v6055_v48 }
 0xcf1   :  { %16758 = vmatprep.subr.bf16.mxu0 %v18179_v53 }
 0xcf2   :  { %v6154_v15 = vand.u32 4294901760, %v6153_v8  ;;  %v18284_v26 = vpack.c.bf16 %v6160_v9, %v6153_v8 }
 0xcf3   :  { %15426 = vmatmul.mubr.f32.vlgmr.msra.gmra.mrb[10].mxu0 %v5542_v57 }
 0xcf4   :  { %16760 = vmatpush3.bf16.msra.mxu0 %v18179_v53  ;;  %15436 = vmatprep.mubr.f32.mxu0 %v5532_v4  ;;  %v6155_v58 = vsub.f32 %v6153_v8, %v6154_v15  ;;  %v6162_v4 = vsub.f32 %v6160_v9, %v6161_v20 }
 0xcf5   :  { %16762 = vmatprep.subr.bf16.mxu0 %v18189_v44 }
 0xcf6   :  { %v6156_v21 = vand.u32 4294901760, %v6155_v58  ;;  %v6163_v22 = vand.u32 4294901760, %v6162_v4 }
 0xcf8   :  { %16764 = vmatpush3.bf16.msra.mxu0 %v18189_v44  ;;  %v6034_v44 = vld [vmem:[%s19102_s1 + $0x20] sm:$0xff]  ;;  %v18280_v23 = vpack.c.bf16 %v6163_v22, %v6156_v21 }
 0xcf9   :  { %v6049_v45 = vand.u32 4294901760, %v6034_v44 }
 0xcfb   :  { %15437 = vmatmul.mubr.f32.vlgmr.msra.gmra.mrb[10].mxu0 %v5542_v57  ;;  %v18236_v29 = vpack.c.bf16 %v6052_v43, %v6049_v45  ;;  %v6139_v6 = vsub.f32 %v6034_v44, %v6049_v45 }
 0xcfc   :  { %15513 = vmatprep.mubr.f32.mxu0 %v6681_v24  ;;  %v6028_v24 = vsub.s32 7, %v17971_v50 }
 0xcfd   :  { %16766 = vmatprep.subr.bf16.mxu1 %v18236_v29  ;;  %v6140_v10 = vand.u32 4294901760, %v6139_v6  ;;  %v18282_v25 = vpack.c.bf16 %v6146_v46, %v6139_v6 }
 0xcfe   :  { %16768 = vmatpush3.bf16.msra.mxu1 %v18236_v29 }
 0xcff   :  { %16770 = vmatprep.subr.bf16.mxu1 %v18246_v33  ;;  %v6141_v13 = vsub.f32 %v6139_v6, %v6140_v10 }
 0xd01   :  { %v6142_v56 = vand.u32 4294901760, %v6141_v13 }
 0xd02   :  { %16772 = vmatpush3.bf16.msra.mxu1 %v18246_v33 }
 0xd03   :  { %v18273_v57 = vpack.c.bf16 %v6149_v1, %v6142_v56 }
 0xd05   :  { %16774 = vmatprep.subr.bf16.mxu1 %v18273_v57 }
 0xdce   :  { %v15438_v30 = vpop.f32.mrb[10].mxu0 }
 0xdcf   :  { %v17497_v31 = vadd.f32 %v15438_v30, %v5456_v28  ;;  %v5981_v32 = vpop.f32.mrb[11].mxu0  ;;  %v18288_v30 = vpack.c.bf16 %v6161_v20, %v6154_v15 }
 0xdd0   :  { %v17498_v53 = vadd.f32 %v5981_v32, %v5456_v28  ;;  %v18286_v28 = vpack.c.bf16 %v6147_v11, %v6140_v10  ;;  %v21_v32 = vld [vmem:[%s19103_s0 + $0x20] sm:$0xff]  ;;  %v6022_v11 = vsub.s32 6, %v17971_v50 }
 0xdd1   :  { %v5992_v36 = vadd.f32 %v17868_v35, %v17497_v31  ;;  %v20_v31 = vld [vmem:[%s19103_s0 + $0x18] sm:$0xff]  ;;  %v6603_v35 = vsel %vm89_vm0, %v21_v32, 0 }
 0xdd2   :  { %v5991_v39 = vadd.f32 %v17869_v37, %v17498_v53  ;;  %v6600_v53 = vsel %vm89_vm0, %v20_v31, 0  ;;  %v6040_v37 = vsub.s32 1, %v17971_v50  ;;  %v6023_v31 = vrot.slane %v18217_v16, %v6022_v11 }
 0xdd3   :  { %v5996_v40 = vsel %vm89_vm0, %v5992_v36, 0.0 }
 0xdd4   :  { %5997 = vadd.xlane.f32.xlu0 %v5996_v40  ;;  %v5993_v41 = vsel %vm89_vm0, %v5991_v39, 0.0  ;;  %v18304_v40 = vand.u32 4294901760, %v6603_v35 }
 0xdd5   :  { %5994 = vadd.xlane.f32.xlu1 %v5993_v41 }
 0xe61   :  { %v5998_v54 = vpop.xlane.xlu0 %5997 }
 0xe62   :  { %v6001_v55 = vmul.f32 0.03125, %v5998_v54  ;;  %v5995_v59 = vpop.xlane.xlu1 %5994  ;;  %v18320_v54 = vsub.f32 %v6603_v35, %v18304_v40 }
 0xe63   :  { %v6000_v47 = vmul.f32 0.03125, %v5995_v59 }
 0xe64   :  { %v18250_v60 = vsub.f32 %v5992_v36, %v6001_v55  ;;  %v22_v36 = vld [vmem:[%s19103_s0 + $0x28] sm:$0xff]  ;;  %v6699_v6 = vand.u32 4294901760, %v18320_v54 }
 0xe65   :  { %v18252_v61 = vsub.f32 %v5991_v39, %v6000_v47  ;;  %v18302_v39 = vand.u32 4294901760, %v6600_v53  ;;  %v6606_v41 = vsel %vm89_vm0, %v22_v36, 0 }
 0xe66   :  { %v6005_v34 = vmul.f32 %v18250_v60, %v18250_v60  ;;  %v18317_v48 = vand.u32 4294901760, %v6606_v41  ;;  %v6700_v4 = vsub.f32 %v18320_v54, %v6699_v6 }
 0xe67   :  { %v6004_v62 = vmul.f32 %v18252_v61, %v18252_v61 }
 0xe68   :  { %v6009_v63 = vsel %vm89_vm0, %v6005_v34, 0.0 }
 0xe69   :  { %6010 = vadd.xlane.f32.xlu1 %v6009_v63  ;;  %v6006_v38 = vsel %vm89_vm0, %v6004_v62, 0.0 }
 0xe6a   :  { %6007 = vadd.xlane.f32.xlu0 %v6006_v38  ;;  %v18324_v38 = vsub.f32 %v6606_v41, %v18317_v48 }
 0xe6c   :  { %v6709_v15 = vand.u32 4294901760, %v18324_v38 }
 0xe7a   :  { %6582 = vrot.lane.b32.xlu1 %v6035_v42, %s17872_s5  ;;  %v18310_v42 = vrot.slane %v18217_v16, %v6040_v37 }
 0xe7e   :  { %6584 = vrot.lane.b32.xlu1 %v6036_v18, %s17872_s5 }
 0xe80   :  { %6580 = vrot.lane.b32.xlu0 %v6034_v44, %s17872_s5 }
 0xe82   :  { %6593 = vrot.lane.b32.xlu1 %v18310_v42, %s17872_s5 }
 0xe84   :  { %6586 = vrot.lane.b32.xlu0 %v6037_v19, %s17872_s5  ;;  %v18315_v19 = vsub.f32 %v6600_v53, %v18302_v39 }
 0xe86   :  { %v6689_v63 = vand.u32 4294901760, %v18315_v19 }
 0xe88   :  { %v6690_v1 = vsub.f32 %v18315_v19, %v6689_v63 }
 0xe8a   :  { %v6691_v41 = vand.u32 4294901760, %v6690_v1 }
 0xef6   :  { %v6011_v43 = vpop.xlane.xlu1 %6010 }
 0xef7   :  { %v6013_v44 = vmul.f32 0.03125, %v6011_v43  ;;  %v6008_v45 = vpop.xlane.xlu0 %6007  ;;  %v6710_v43 = vsub.f32 %v18324_v38, %v6709_v15 }
 0xef8   :  { %v6012_v18 = vmul.f32 0.03125, %v6008_v45 }
 0xef9   :  { %v6015_v52 = vadd.f32 1e-05, %v6013_v44 }
 0xefa   :  { %v6014_v55 = vadd.f32 1e-05, %v6012_v18  ;;  %v6583_v59 = vpop.permute.xlu1 %6582  ;;  %v6701_v18 = vand.u32 4294901760, %v6700_v4 }
 0xefb   :  { %17823 = vrsqrt.f32 %v6015_v52  ;;  %v6581_v47 = vpop.permute.xlu0 %6580  ;;  %v6612_v34 = vand.u32 4294901760, %v6583_v59 }
 0xefc   :  { %17825 = vrsqrt.f32 %v6014_v55  ;;  %v6609_v62 = vand.u32 4294901760, %v6581_v47 }
 0xefd   :  { %v18326_v46 = vsub.f32 %v6583_v59, %v6612_v34 }
 0xefe   :  { %v18329_v8 = vsub.f32 %v6581_v47, %v6609_v62  ;;  %v18331_v9 = vpack.c.bf16 %v6612_v34, %v6609_v62  ;;  %v6585_v10 = vpop.permute.xlu1 %6584  ;;  %v6029_v47 = vrot.slane %v18217_v16, %v6028_v24 }
 0xeff   :  { %v6727_v0 = vand.u32 4294901760, %v18326_v46  ;;  %v6587_v12 = vpop.permute.xlu0 %6586  ;;  %v6615_v13 = vand.u32 4294901760, %v6585_v10 }
 0xf00   :  { %v6720_v2 = vand.u32 4294901760, %v18329_v8  ;;  %v6618_v56 = vand.u32 4294901760, %v6587_v12  ;;  %16814 = vmatprep.subr.bf16.mxu0 %v18331_v9 }
 0xf01   :  { %v6728_v20 = vsub.f32 %v18326_v46, %v6727_v0  ;;  %v18344_v58 = vsub.f32 %v6585_v10, %v6615_v13  ;;  %16816 = vmatpush3.bf16.msra.mxu0 %v18331_v9 }
 0xf02   :  { %v6721_v21 = vsub.f32 %v18329_v8, %v6720_v2  ;;  %v18353_v22 = vsub.f32 %v6587_v12, %v6618_v56  ;;  %v18355_v7 = vpack.c.bf16 %v6618_v56, %v6615_v13  ;;  %v6711_v13 = vand.u32 4294901760, %v6710_v43 }
 0xf03   :  { %v6729_v32 = vand.u32 4294901760, %v6728_v20  ;;  %v6734_v53 = vand.u32 4294901760, %v18344_v58  ;;  %v17870_v20 = vld [vmem:[%s19103_s0 + $0x30] sm:$0xff] }
 0xf04   :  { %v6722_v35 = vand.u32 4294901760, %v6721_v21  ;;  %v6741_v36 = vand.u32 4294901760, %v18353_v22  ;;  %16818 = vmatprep.subr.bf16.mxu0 %v18355_v7  ;;  %v18399_v24 = vpack.c.bf16 %v18353_v22, %v18344_v58 }
 0xf05   :  { %v17824_v44 = vpop.eup %17823  ;;  %v6735_v45 = vsub.f32 %v18344_v58, %v6734_v53  ;;  %16820 = vmatpush3.bf16.msra.mxu0 %v18355_v7 }
 0xf06   :  { %v17826_v52 = vpop.eup %17825  ;;  %v6019_v55 = vmul.f32 %v17824_v44, %v18250_v60  ;;  %v6742_v59 = vsub.f32 %v18353_v22, %v6741_v36  ;;  %v18374_v34 = vpack.c.bf16 %v6729_v32, %v6722_v35  ;;  %v18381_v60 = vpack.c.bf16 %v18326_v46, %v18329_v8 }
 0xf07   :  { %v6018_v62 = vmul.f32 %v17826_v52, %v18252_v61  ;;  %v6736_v10 = vand.u32 4294901760, %v6735_v45  ;;  %v18444_v46 = vpack.c.bf16 %v6741_v36, %v6734_v53 }
 0xf08   :  { %v6025_v11 = vmul.f32 %v6023_v31, %v6019_v55  ;;  %v6743_v12 = vand.u32 4294901760, %v6742_v59  ;;  %16822 = vmatprep.subr.bf16.mxu0 %v18374_v34  ;;  %15514 = vmatmul.mubr.f32.vlgmr.msra.gmra.mrb[12].mxu0 %v6691_v41 }
 0xf09   :  { %v6024_v56 = vmul.f32 %v6023_v31, %v6018_v62  ;;  %16824 = vmatpush3.bf16.msra.mxu0 %v18374_v34  ;;  %15516 = vmatprep.mubr.f32.mxu0 %v6701_v18  ;;  %v18430_v62 = vpack.c.bf16 %v6727_v0, %v6720_v2 }
 0xf0a   :  { %v18383_v16 = vadd.f32 %v6029_v47, %v6025_v11  ;;  %v18385_v1 = vpack.c.bf16 %v6743_v12, %v6736_v10 }
 0xf0b   :  { %v18387_v61 = vadd.f32 %v6029_v47, %v6024_v56 }
 0xf0c   :  { %v6033_v4 = vadd.f32 %v17870_v20, %v18383_v16  ;;  %16826 = vmatprep.subr.bf16.mxu0 %v18385_v1  ;;  %15517 = vmatmul.mubr.f32.gmra.mrb[14].mxu0 %v6711_v13 }
 0xf0d   :  { %v6032_v21 = vadd.f32 %v17870_v20, %v18387_v61  ;;  %16828 = vmatpush3.bf16.msra.mxu0 %v18385_v1  ;;  %15527 = vmatprep.mubr.f32.mxu0 %v18268_v14 }
 0xf0e   :  { %v6046_v31 = vsel %vm89_vm0, %v6033_v4, 0  ;;  %16830 = vmatprep.subr.bf16.mxu0 %v18381_v60 }
 0xf0f   :  { %v6043_v32 = vsel %vm89_vm0, %v6032_v21, 0  ;;  %v18404_v35 = vand.u32 4294901760, %v6046_v31 }
 0xf10   :  { %v18406_v41 = vand.u32 4294901760, %v6043_v32  ;;  %15528 = vmatmul.mubr.f32.vlgmr.msra.gmra.mrb[12].mxu0 %v18302_v39 }
 0xf11   :  { %v18410_v43 = vsub.f32 %v6046_v31, %v18404_v35  ;;  %16832 = vmatpush3.bf16.msra.mxu0 %v18381_v60  ;;  %15530 = vmatprep.mubr.f32.mxu0 %v18304_v40 }
 0xf12   :  { %v6118_v44 = vsub.f32 %v6043_v32, %v18406_v41  ;;  %16834 = vmatprep.subr.bf16.mxu0 %v18399_v24 }
 0xf13   :  { %v6129_v45 = vand.u32 4294901760, %v18410_v43 }
 0xf14   :  { %v6119_v18 = vand.u32 4294901760, %v6118_v44  ;;  %15531 = vmatmul.mubr.f32.gmra.mrb[14].mxu0 %v18317_v48 }
 0xf15   :  { %v6130_v52 = vsub.f32 %v18410_v43, %v6129_v45  ;;  %16836 = vmatpush3.bf16.msra.mxu0 %v18399_v24  ;;  %15541 = vmatprep.mubr.f32.mxu0 %v18271_v49  ;;  %v24_v49 = vld [vmem:[%s19103_s0 + $0x38] sm:$0xff] }
 0xf16   :  { %v6120_v55 = vsub.f32 %v6118_v44, %v6119_v18  ;;  %16838 = vmatprep.subr.bf16.mxu0 %v18331_v9 }
 0xf17   :  { %v6131_v47 = vand.u32 4294901760, %v6130_v52 }
 0xf18   :  { %v6121_v59 = vand.u32 4294901760, %v6120_v55  ;;  %15542 = vmatmul.mubr.f32.vlgmr.msra.gmra.mrb[12].mxu0 %v18315_v19 }
 0xf19   :  { %16840 = vmatpush3.bf16.msra.mxu0 %v18331_v9  ;;  %15544 = vmatprep.mubr.f32.mxu0 %v18320_v54 }
 0xf1a   :  { %15447 = vmatprep.mubr.f32.mxu1 %v6121_v59  ;;  %16842 = vmatprep.subr.bf16.mxu0 %v18355_v7 }
 0xf1b   :  { %15448 = vmatmul.mubr.f32.vlgmr.msra.gmra.mrb[10].mxu1 %v6131_v47 }
 0xf1c   :  { %16776 = vmatpush3.bf16.msra.mxu1 %v18273_v57  ;;  %15458 = vmatprep.mubr.f32.mxu1 %v18406_v41  ;;  %v7223_v57 = vsel %vm89_vm0, %v24_v49, 0 }
 0xf1d   :  { %16778 = vmatprep.subr.bf16.mxu1 %v18280_v23  ;;  %15545 = vmatmul.mubr.f32.gmra.mrb[14].mxu0 %v18324_v38 }
 0xf1e   :  { %16844 = vmatpush3.bf16.msra.mxu0 %v18355_v7  ;;  %15555 = vmatprep.mubr.f32.mxu0 %v6679_v3  ;;  %v7297_v3 = vand.u32 4294901760, %v7223_v57 }
 0xf1f   :  { %16846 = vmatprep.subr.bf16.mxu0 %v18430_v62 }
 0xf20   :  { %16780 = vmatpush3.bf16.msra.mxu1 %v18280_v23  ;;  %v25_v23 = vld [vmem:[%s19103_s0 + $0x40] sm:$0xff] }
 0xf21   :  { %16782 = vmatprep.subr.bf16.mxu1 %v18282_v25  ;;  %15556 = vmatmul.mubr.f32.vlgmr.msra.gmra.mrb[12].mxu0 %v6689_v63 }
 0xf22   :  { %16848 = vmatpush3.bf16.msra.mxu0 %v18430_v62  ;;  %15558 = vmatprep.mubr.f32.mxu0 %v6699_v6 }
 0xf23   :  { %15459 = vmatmul.mubr.f32.vlgmr.msra.gmra.mrb[10].mxu1 %v18404_v35  ;;  %16850 = vmatprep.subr.bf16.mxu0 %v18444_v46 }
 0xf24   :  { %16784 = vmatpush3.bf16.msra.mxu1 %v18282_v25  ;;  %15469 = vmatprep.mubr.f32.mxu1 %v6118_v44  ;;  %v7298_v25 = vsub.f32 %v7223_v57, %v7297_v3 }
 0xf25   :  { %16786 = vmatprep.subr.bf16.mxu1 %v18284_v26  ;;  %15559 = vmatmul.mubr.f32.gmra.mrb[14].mxu0 %v6709_v15 }
 0xf26   :  { %16852 = vmatpush3.bf16.msra.mxu0 %v18444_v46  ;;  %15569 = vmatprep.mubr.f32.mxu0 %v18268_v14 }
 0xf27   :  { %16854 = vmatprep.subr.bf16.mxu0 %v18331_v9 }
 0xf28   :  { %16788 = vmatpush3.bf16.msra.mxu1 %v18284_v26 }
 0xf29   :  { %16790 = vmatprep.subr.bf16.mxu1 %v18236_v29  ;;  %15570 = vmatmul.mubr.f32.vlgmr.msra.gmra.mrb[12].mxu0 %v18302_v39 }
 0xf2a   :  { %16856 = vmatpush3.bf16.msra.mxu0 %v18331_v9  ;;  %15572 = vmatprep.mubr.f32.mxu0 %v18304_v40 }
 0xf2b   :  { %15470 = vmatmul.mubr.f32.vlgmr.msra.gmra.mrb[10].mxu1 %v18410_v43  ;;  %16858 = vmatprep.subr.bf16.mxu0 %v18355_v7 }
 0xf2c   :  { %16792 = vmatpush3.bf16.msra.mxu1 %v18236_v29  ;;  %15480 = vmatprep.mubr.f32.mxu1 %v6119_v18 }
 0xf2d   :  { %16794 = vmatprep.subr.bf16.mxu1 %v18246_v33  ;;  %15573 = vmatmul.mubr.f32.gmra.mrb[14].mxu0 %v18317_v48 }
 0xf2e   :  { %16860 = vmatpush3.bf16.msra.mxu0 %v18355_v7  ;;  %15583 = vmatprep.mubr.f32.mxu0 %v18268_v14  ;;  %v7226_v14 = vsel %vm89_vm0, %v25_v23, 0 }
 0xf2f   :  { %v7307_v26 = vand.u32 4294901760, %v7226_v14 }
 0xf30   :  { %16796 = vmatpush3.bf16.msra.mxu1 %v18246_v33 }
 0xf31   :  { %16798 = vmatprep.subr.bf16.mxu1 %v18286_v28  ;;  %15584 = vmatmul.mubr.f32.vlgmr.msra.gmra.mrb[12].mxu0 %v18302_v39  ;;  %v7299_v39 = vand.u32 4294901760, %v7298_v25 }
 0xf32   :  { %15586 = vmatprep.mubr.f32.mxu0 %v18304_v40  ;;  %v7308_v40 = vsub.f32 %v7226_v14, %v7307_v26 }
 0xf33   :  { %15481 = vmatmul.mubr.f32.vlgmr.msra.gmra.mrb[10].mxu1 %v6129_v45 }
 0xf34   :  { %16800 = vmatpush3.bf16.msra.mxu1 %v18286_v28  ;;  %15491 = vmatprep.mubr.f32.mxu1 %v18406_v41  ;;  %v7300_v28 = vsub.f32 %v7298_v25, %v7299_v39  ;;  %v7309_v19 = vand.u32 4294901760, %v7308_v40 }
 0xf35   :  { %16802 = vmatprep.subr.bf16.mxu1 %v18288_v30  ;;  %15587 = vmatmul.mubr.f32.gmra.mrb[14].mxu0 %v18317_v48 }
 0xf36   :  { %v7301_v48 = vand.u32 4294901760, %v7300_v28 }
 0xf38   :  { %16804 = vmatpush3.bf16.msra.mxu1 %v18288_v30  ;;  %v7310_v30 = vsub.f32 %v7308_v40, %v7309_v19 }
 0xf39   :  { %16806 = vmatprep.subr.bf16.mxu1 %v18236_v29 }
 0xf3b   :  { %15492 = vmatmul.mubr.f32.vlgmr.msra.gmra.mrb[10].mxu1 %v18404_v35 }
 0xf3c   :  { %16808 = vmatpush3.bf16.msra.mxu1 %v18236_v29  ;;  %15502 = vmatprep.mubr.f32.mxu1 %v18406_v41  ;;  %v7311_v29 = vand.u32 4294901760, %v7310_v30 }
 0xf3d   :  { %16810 = vmatprep.subr.bf16.mxu1 %v18246_v33 }
 0xf40   :  { %16812 = vmatpush3.bf16.msra.mxu1 %v18246_v33 }
 0xf41   :  { %16862 = vmatprep.subr.bf16.mxu1 %v18331_v9 }
 0xf43   :  { %15503 = vmatmul.mubr.f32.vlgmr.msra.gmra.mrb[10].mxu1 %v18404_v35 }
 0xf44   :  { %16864 = vmatpush3.bf16.msra.mxu1 %v18331_v9  ;;  %15597 = vmatprep.mubr.f32.mxu1 %v7301_v48 }
 0xf45   :  { %16866 = vmatprep.subr.bf16.mxu1 %v18355_v7 }
 0xf48   :  { %16868 = vmatpush3.bf16.msra.mxu1 %v18355_v7 }
 0xf49   :  { %16870 = vmatprep.subr.bf16.mxu1 %v18374_v34 }
 0xf4b   :  { %15598 = vmatmul.mubr.f32.vlgmr.msra.gmra.mrb[12].mxu1 %v7311_v29 }
 0xf4c   :  { %16872 = vmatpush3.bf16.msra.mxu1 %v18374_v34  ;;  %15608 = vmatprep.mubr.f32.mxu1 %v7297_v3  ;;  %v6594_v34 = vpop.permute.xlu1 %6593 }
 0xf4d   :  { %16874 = vmatprep.subr.bf16.mxu1 %v18385_v1 }
 0xf50   :  { %16876 = vmatpush3.bf16.msra.mxu1 %v18385_v1 }
 0xf51   :  { %16878 = vmatprep.subr.bf16.mxu1 %v18381_v60 }
 0xf53   :  { %15609 = vmatmul.mubr.f32.vlgmr.msra.gmra.mrb[12].mxu1 %v7307_v26 }
 0xf54   :  { %16880 = vmatpush3.bf16.msra.mxu1 %v18381_v60  ;;  %15619 = vmatprep.mubr.f32.mxu1 %v7298_v25 }
 0xf55   :  { %16882 = vmatprep.subr.bf16.mxu1 %v18399_v24 }
 0xf58   :  { %16884 = vmatpush3.bf16.msra.mxu1 %v18399_v24 }
 0xf59   :  { %16886 = vmatprep.subr.bf16.mxu1 %v18331_v9 }
 0xf5b   :  { %15620 = vmatmul.mubr.f32.vlgmr.msra.gmra.mrb[12].mxu1 %v7308_v40 }
 0xf5c   :  { %16888 = vmatpush3.bf16.msra.mxu1 %v18331_v9  ;;  %15630 = vmatprep.mubr.f32.mxu1 %v7299_v39 }
 0xf5d   :  { %16890 = vmatprep.subr.bf16.mxu1 %v18355_v7 }
 0xf60   :  { %16892 = vmatpush3.bf16.msra.mxu1 %v18355_v7 }
 0xf61   :  { %16894 = vmatprep.subr.bf16.mxu1 %v18430_v62 }
 0xf63   :  { %15631 = vmatmul.mubr.f32.vlgmr.msra.gmra.mrb[12].mxu1 %v7309_v19 }
 0xf64   :  { %16896 = vmatpush3.bf16.msra.mxu1 %v18430_v62  ;;  %15641 = vmatprep.mubr.f32.mxu1 %v7297_v3 }
 0xf65   :  { %16898 = vmatprep.subr.bf16.mxu1 %v18444_v46 }
 0xf68   :  { %16900 = vmatpush3.bf16.msra.mxu1 %v18444_v46 }
 0xf69   :  { %16902 = vmatprep.subr.bf16.mxu1 %v18331_v9 }
 0xf6b   :  { %15642 = vmatmul.mubr.f32.vlgmr.msra.gmra.mrb[12].mxu1 %v7307_v26 }
 0xf6c   :  { %16904 = vmatpush3.bf16.msra.mxu1 %v18331_v9  ;;  %15652 = vmatprep.mubr.f32.mxu1 %v7297_v3 }
 0xf6d   :  { %16906 = vmatprep.subr.bf16.mxu1 %v18355_v7 }
 0xf70   :  { %16908 = vmatpush3.bf16.msra.mxu1 %v18355_v7 }
 0xf73   :  { %15653 = vmatmul.mubr.f32.vlgmr.msra.gmra.mrb[12].mxu1 %v7307_v26 }
0x1004   :  { %v15585_v33 = vpop.f32.mrb[12].mxu0 }
0x1005   :  { %v7200_v54 = vpop.f32.mrb[13].mxu0  ;;  %v18535_v10 = vadd.f32 %v15585_v33, %v6594_v34 }
0x1006   :  { %v18541_v13 = vadd.f32 %v7200_v54, %v6594_v34 }
0x1008   :  { %v15588_v63 = vpop.f32.mrb[14].mxu0 }
0x1009   :  { %v7212_v38 = vpop.f32.mrb[15].mxu0  ;;  %v18537_v11 = vadd.f32 %v15588_v63, %v6594_v34 }
0x100a   :  { %v18543_v56 = vadd.f32 %v7212_v38, %v6594_v34 }
0x1016   :  { %v15504_v6 = vpop.f32.mrb[10].mxu1 }
0x1017   :  { %v6566_v8 = vpop.f32.mrb[11].mxu1  ;;  %v17499_v36 = vadd.f32 %v15504_v6, %v18310_v42 }
0x1018   :  { %v17500_v0 = vadd.f32 %v6566_v8, %v18310_v42 }
0x1019   :  { %v18539_v12 = vmul.f32 0.35355338, %v17499_v36 }
0x101a   :  { %v18523_v2 = vmul.f32 0.35355338, %v17500_v0 }
0x101b   :  { %v7770_v32 = vsel %vm1190_vm1, %v18539_v12, 0 }
0x101c   :  { %v7767_v15 = vsel %vm1190_vm1, %v18523_v2, 0  ;;  %v7863_v55 = vand.u32 4294901760, %v7770_v32 }
0x101d   :  { %v18527_v9 = vand.u32 4294901760, %v7767_v15 }
0x101e   :  { %v7864_v25 = vsub.f32 %v7770_v32, %v7863_v55 }
0x101f   :  { %v18530_v58 = vsub.f32 %v7767_v15, %v18527_v9 }
0x1020   :  { %v7865_v19 = vand.u32 4294901760, %v7864_v25 }
0x1021   :  { %v7855_v22 = vand.u32 4294901760, %v18530_v58 }
0x1022   :  { %v7866_v54 = vsub.f32 %v7864_v25, %v7865_v19 }
0x1023   :  { %15696 = vmatprep.mubr.f32.mxu0 %v7855_v22  ;;  %v7856_v7 = vsub.f32 %v18530_v58, %v7855_v22 }
0x1024   :  { %v7867_v6 = vand.u32 4294901760, %v7866_v54 }
0x1025   :  { %v7857_v53 = vand.u32 4294901760, %v7856_v7  ;;  %v18574_v7 = vsel %vm74_vm10, 0.0, %v17874_v17 }
0x1027   :  { %15663 = vmatprep.mubr.f32.mxu1 %v7857_v53 }
0x1046   :  { %v15654_v60 = vpop.f32.mrb[12].mxu1 }
0x1047   :  { %v18546_v1 = vadd.f32 %v18535_v10, %v15654_v60  ;;  %v18549_v20 = vadd.f32 %v18537_v11, %v15654_v60  ;;  %v7746_v4 = vpop.f32.mrb[13].mxu1 }
0x1048   :  { %v18552_v42 = vadd.f32 %v18541_v13, %v7746_v4  ;;  %v18555_v21 = vadd.f32 %v18543_v56, %v7746_v4 }
0x1049   :  { %v7776_v24 = vsel %vm1190_vm1, %v18546_v1, 0  ;;  %v7782_v31 = vsel %vm1190_vm1, %v18549_v20, 0 }
0x104a   :  { %v7788_v35 = vand.u32 4294901760, %v7776_v24  ;;  %v7773_v41 = vsel %vm1190_vm1, %v18552_v42, 0  ;;  %v7779_v43 = vsel %vm1190_vm1, %v18555_v21, 0  ;;  %v7794_v44 = vand.u32 4294901760, %v7782_v31 }
0x104b   :  { %v7785_v45 = vand.u32 4294901760, %v7773_v41  ;;  %v7791_v18 = vand.u32 4294901760, %v7779_v43 }
0x104c   :  { %v7882_v52 = vsub.f32 %v7776_v24, %v7788_v35  ;;  %v7896_v57 = vsub.f32 %v7782_v31, %v7794_v44 }
0x104d   :  { %v16909_v59 = vpack.c.bf16 %v7788_v35, %v7785_v45  ;;  %v7875_v47 = vsub.f32 %v7773_v41, %v7785_v45  ;;  %v16913_v46 = vpack.c.bf16 %v7794_v44, %v7791_v18  ;;  %v7889_v3 = vsub.f32 %v7779_v43, %v7791_v18 }
0x104e   :  { %v7883_v62 = vand.u32 4294901760, %v7882_v52  ;;  %v7897_v28 = vand.u32 4294901760, %v7896_v57 }
0x104f   :  { %16910 = vmatprep.subr.bf16.mxu1 %v16909_v59  ;;  %16934 = vmatprep.subr.bf16.mxu0 %v16909_v59  ;;  %v7876_v49 = vand.u32 4294901760, %v7875_v47  ;;  %v7890_v40 = vand.u32 4294901760, %v7889_v3  ;;  %v16925_v15 = vpack.c.bf16 %v7882_v52, %v7875_v47  ;;  %v16929_v22 = vpack.c.bf16 %v7896_v57, %v7889_v3 }
0x1050   :  { %16912 = vmatpush3.bf16.xpose.msra.mxu1 %v16909_v59  ;;  %16936 = vmatpush3.bf16.xpose.msra.mxu0 %v16909_v59  ;;  %v7884_v23 = vsub.f32 %v7882_v52, %v7883_v62  ;;  %v7898_v33 = vsub.f32 %v7896_v57, %v7897_v28 }
0x1051   :  { %16914 = vmatprep.subr.bf16.mxu1 %v16913_v46  ;;  %16938 = vmatprep.subr.bf16.mxu0 %v16913_v46  ;;  %v7877_v14 = vsub.f32 %v7875_v47, %v7876_v49  ;;  %v16941_v30 = vpack.c.bf16 %v7883_v62, %v7876_v49  ;;  %v7891_v29 = vsub.f32 %v7889_v3, %v7890_v40 }
0x1052   :  { %v7885_v39 = vand.u32 4294901760, %v7884_v23  ;;  %v7899_v38 = vand.u32 4294901760, %v7898_v33  ;;  %v16945_v0 = vpack.c.bf16 %v7897_v28, %v7890_v40 }
0x1053   :  { %v7878_v26 = vand.u32 4294901760, %v7877_v14  ;;  %v7892_v63 = vand.u32 4294901760, %v7891_v29 }
0x1055   :  { %v16917_v48 = vpack.c.bf16 %v7885_v39, %v7878_v26  ;;  %v16921_v8 = vpack.c.bf16 %v7899_v38, %v7892_v63 }
0x1058   :  { %16916 = vmatpush3.bf16.xpose.msra.mxu1 %v16913_v46  ;;  %16940 = vmatpush3.bf16.xpose.msra.mxu0 %v16913_v46 }
0x1059   :  { %16918 = vmatprep.subr.bf16.mxu1 %v16917_v48  ;;  %16942 = vmatprep.subr.bf16.mxu0 %v16941_v30 }
0x105f   :  { %15664 = vmatmul.mubr.f32.vlgmr.msra.gmra.mrb[14].mxu1 %v7867_v6  ;;  %15697 = vmatmul.mubr.f32.vlgmr.msra.gmra.mrb[16].mxu0 %v7865_v19 }
0x1060   :  { %16920 = vmatpush3.bf16.xpose.msra.mxu1 %v16917_v48  ;;  %15674 = vmatprep.mubr.f32.mxu1 %v18527_v9 }
0x1061   :  { %16944 = vmatpush3.bf16.xpose.msra.mxu0 %v16941_v30  ;;  %15707 = vmatprep.mubr.f32.mxu0 %v18527_v9 }
0x1062   :  { %16922 = vmatprep.subr.bf16.mxu1 %v16921_v8  ;;  %16946 = vmatprep.subr.bf16.mxu0 %v16945_v0 }
0x1068   :  { %16924 = vmatpush3.bf16.xpose.msra.mxu1 %v16921_v8 }
0x1069   :  { %16948 = vmatpush3.bf16.xpose.msra.mxu0 %v16945_v0  ;;  %16926 = vmatprep.subr.bf16.mxu1 %v16925_v15 }
0x106a   :  { %16950 = vmatprep.subr.bf16.mxu0 %v16909_v59 }
0x106f   :  { %15675 = vmatmul.mubr.f32.vlgmr.msra.gmra.mrb[14].mxu1 %v7863_v55 }
0x1070   :  { %15708 = vmatmul.mubr.f32.vlgmr.msra.gmra.mrb[16].mxu0 %v7863_v55  ;;  %16928 = vmatpush3.bf16.xpose.msra.mxu1 %v16925_v15 }
0x1071   :  { %15685 = vmatprep.mubr.f32.mxu1 %v18530_v58  ;;  %16952 = vmatpush3.bf16.xpose.msra.mxu0 %v16909_v59  ;;  %v18579_v58 = vsel %vm58_vm3, 0.0, %v17874_v17 }
0x1072   :  { %15718 = vmatprep.mubr.f32.mxu0 %v18527_v9  ;;  %16930 = vmatprep.subr.bf16.mxu1 %v16929_v22 }
0x1073   :  { %16954 = vmatprep.subr.bf16.mxu0 %v16913_v46 }
0x1078   :  { %16932 = vmatpush3.bf16.xpose.msra.mxu1 %v16929_v22 }
0x1079   :  { %16956 = vmatpush3.bf16.xpose.msra.mxu0 %v16913_v46 }
0x107f   :  { %15686 = vmatmul.mubr.f32.vlgmr.msra.gmra.mrb[14].mxu1 %v7864_v25 }
0x1080   :  { %15719 = vmatmul.mubr.f32.vlgmr.msra.gmra.mrb[16].mxu0 %v7863_v55 }
0x1152   :  { %v15687_v9 = vpop.f32.mrb[14].mxu1 }
0x1153   :  { %v17505_v53 = vadd.f32 %v15687_v9, %v18574_v7  ;;  %v15720_v36 = vpop.f32.mrb[16].mxu0  ;;  %v8046_v34 = vpop.f32.mrb[15].mxu1 }
0x1154   :  { %v17507_v60 = vadd.f32 %v8046_v34, %v18579_v58  ;;  %v8302_v4 = vpop.f32.mrb[17].mxu0 }
0x1155   :  { %v17506_v24 = vadd.f32 %v17505_v53, %v15720_v36 }
0x1156   :  { %v17508_v31 = vadd.f32 %v17507_v60, %v8302_v4 }
0x1157   :  { %v8315_v32 = vsel %vm89_vm0, %v17506_v24, -inf }
0x1158   :  { %8316 = vmax.xlane.f32.xlu1 %v8315_v32  ;;  %v8312_v35 = vsel %vm89_vm0, %v17508_v31, -inf }
0x1159   :  { %8313 = vmax.xlane.f32.xlu0 %v8312_v35 }
0x1169   :  { %8344 = vrot.lane.b32.xlu1 %v18541_v13, %s17872_s5 }
0x116d   :  { %8348 = vrot.lane.b32.xlu1 %v18543_v56, %s17872_s5 }
0x1171   :  { %8350 = vrot.lane.b32.xlu1 %v18537_v11, %s17872_s5 }
0x1175   :  { %8896 = vrot.lane.b32.xlu1 %v18546_v1, %s17876_s8 }
0x1179   :  { %8900 = vrot.lane.b32.xlu1 %v18549_v20, %s17876_s8 }
0x117d   :  { %8892 = vrot.lane.b32.xlu1 %v18539_v12, %s17876_s8 }
0x11e5   :  { %v8317_v5 = vpop.xlane.xlu1 %8316 }
0x11e6   :  { %v8319_v17 = vsub.f32 %v17506_v24, %v8317_v5  ;;  %v8314_v41 = vpop.xlane.xlu0 %8313 }
0x11e7   :  { %v8318_v43 = vsub.f32 %v17508_v31, %v8314_v41 }
0x11e8   :  { %v8322_v44 = vmul.f32 1.442695, %v8319_v17 }
0x11e9   :  { %v8320_v45 = vmul.f32 1.442695, %v8318_v43  ;;  %v8345_v47 = vpop.permute.xlu1 %8344 }
0x11ea   :  { %v8363_v49 = vand.u32 4294901760, %v8345_v47 }
0x11eb   :  { %17827 = vpow2.f32 %v8320_v45 }
0x11ec   :  { %17829 = vpow2.f32 %v8322_v44  ;;  %v18607_v3 = vsub.f32 %v8345_v47, %v8363_v49 }
0x11ed   :  { %v8349_v62 = vpop.permute.xlu1 %8348 }
0x11ee   :  { %v8454_v14 = vand.u32 4294901760, %v18607_v3  ;;  %v8369_v28 = vand.u32 4294901760, %v8349_v62 }
0x11f0   :  { %v8455_v29 = vsub.f32 %v18607_v3, %v8454_v14  ;;  %v8467_v24 = vsub.f32 %v8349_v62, %v8369_v28 }
0x11f1   :  { %v8351_v23 = vpop.permute.xlu1 %8350 }
0x11f2   :  { %v8372_v26 = vand.u32 4294901760, %v8351_v23  ;;  %v8456_v15 = vand.u32 4294901760, %v8455_v29  ;;  %v8468_v41 = vand.u32 4294901760, %v8467_v24 }
0x11f4   :  { %v18617_v33 = vpack.c.bf16 %v8372_v26, %v8369_v28  ;;  %v8474_v36 = vsub.f32 %v8351_v23, %v8372_v26 }
0x11f5   :  { %v17828_v18 = vpop.eup %17827 }
0x11f6   :  { %v8324_v52 = vsel %vm89_vm0, %v17828_v18, 0.0  ;;  %v17830_v55 = vpop.eup %17829  ;;  %v8475_v35 = vand.u32 4294901760, %v8474_v36 }
0x11f7   :  { %8325 = vadd.xlane.f32.xlu0 %v8324_v52  ;;  %v8327_v59 = vsel %vm89_vm0, %v17830_v55, 0.0 }
0x11f8   :  { %v8476_v45 = vsub.f32 %v8474_v36, %v8475_v35 }
0x11fb   :  { %8328 = vadd.xlane.f32.xlu0 %v8327_v59  ;;  %v8469_v59 = vsub.f32 %v8467_v24, %v8468_v41 }
0x1211   :  { %8346 = vrot.lane.b32.xlu0 %v18535_v10, %s17872_s5 }
0x1215   :  { %8894 = vrot.lane.b32.xlu0 %v18552_v42, %s17876_s8 }
0x1219   :  { %8898 = vrot.lane.b32.xlu0 %v18555_v21, %s17876_s8 }
0x121d   :  { %8890 = vrot.lane.b32.xlu0 %v18523_v2, %s17876_s8 }
0x1284   :  { %v8326_v46 = vpop.xlane.xlu0 %8325 }
0x1285   :  { %17831 = vrcp.f32 %v8326_v46 }
0x1288   :  { %v8329_v57 = vpop.xlane.xlu0 %8328 }
0x1289   :  { %17833 = vrcp.f32 %v8329_v57 }
0x128c   :  { %v8347_v25 = vpop.permute.xlu0 %8346 }
0x128d   :  { %v8366_v39 = vand.u32 4294901760, %v8347_v25 }
0x128f   :  { %v17832_v40 = vpop.eup %17831  ;;  %v18610_v19 = vpack.c.bf16 %v8366_v39, %v8363_v49  ;;  %v18612_v48 = vsub.f32 %v8347_v25, %v8366_v39  ;;  %v8477_v49 = vand.u32 4294901760, %v8476_v45  ;;  %v16977_v39 = vpack.c.bf16 %v8474_v36, %v8467_v24 }
0x1290   :  { %v8332_v30 = vmul.f32 %v17832_v40, %v8326_v46  ;;  %v8895_v26 = vpop.permute.xlu0 %8894 }
0x1291   :  { %v8461_v54 = vand.u32 4294901760, %v18612_v48  ;;  %16958 = vmatprep.subr.bf16.mxu1 %v18610_v19  ;;  %v16973_v25 = vpack.c.bf16 %v18612_v48, %v18607_v3 }
0x1292   :  { %v8334_v63 = vsub.f32 2.0, %v8332_v30  ;;  %16960 = vmatpush3.bf16.msra.mxu1 %v18610_v19 }
0x1293   :  { %v17834_v38 = vpop.eup %17833  ;;  %v8462_v6 = vsub.f32 %v18612_v48, %v8461_v54  ;;  %16962 = vmatprep.subr.bf16.mxu1 %v18617_v33  ;;  %v16989_v30 = vpack.c.bf16 %v8461_v54, %v8454_v14 }
0x1294   :  { %v8336_v8 = vmul.f32 %v17832_v40, %v8334_v63  ;;  %v8333_v0 = vmul.f32 %v17834_v38, %v8329_v57  ;;  %v8899_v40 = vpop.permute.xlu0 %8898  ;;  %v16993_v63 = vpack.c.bf16 %v8475_v35, %v8468_v41 }
0x1295   :  { %v8463_v22 = vand.u32 4294901760, %v8462_v6 }
0x1296   :  { %v8338_v9 = vmul.f32 %v17828_v18, %v8336_v8  ;;  %v8335_v53 = vsub.f32 2.0, %v8333_v0  ;;  %16964 = vmatpush3.bf16.msra.mxu1 %v18617_v33  ;;  %v8906_v8 = vsel %vm1190_vm1, %v8895_v26, 0 }
0x1297   :  { %v16965_v34 = vpack.c.bf16 %v8463_v22, %v8456_v15  ;;  %v8915_v0 = vand.u32 4294901760, %v8906_v8 }
0x1298   :  { %v8357_v60 = vsel %vm89_vm0, %v8338_v9, 0  ;;  %v8337_v4 = vmul.f32 %v17834_v38, %v8335_v53  ;;  %v8891_v28 = vpop.permute.xlu0 %8890  ;;  %v8897_v38 = vpop.permute.xlu1 %8896 }
0x1299   :  { %v8431_v31 = vand.u32 4294901760, %v8357_v60  ;;  %16966 = vmatprep.subr.bf16.mxu1 %v16965_v34  ;;  %v8902_v48 = vsel %vm1190_vm1, %v8891_v28, 0  ;;  %v8908_v3 = vsel %vm1190_vm1, %v8897_v38, 0  ;;  %v9005_v36 = vsub.f32 %v8906_v8, %v8915_v0 }
0x129a   :  { %v8339_v32 = vmul.f32 %v17830_v55, %v8337_v4  ;;  %v8470_v55 = vand.u32 4294901760, %v8469_v59  ;;  %v18640_v29 = vand.u32 4294901760, %v8902_v48  ;;  %v8918_v15 = vand.u32 4294901760, %v8908_v3 }
0x129b   :  { %v8432_v5 = vsub.f32 %v8357_v60, %v8431_v31 }
0x129c   :  { %v8360_v17 = vsel %vm89_vm0, %v8339_v32, 0  ;;  %v16969_v23 = vpack.c.bf16 %v8477_v49, %v8470_v55  ;;  %v18643_v6 = vsub.f32 %v8902_v48, %v18640_v29  ;;  %v8901_v14 = vpop.permute.xlu1 %8900  ;;  %v18655_v9 = vpack.c.bf16 %v8918_v15, %v8915_v0 }
0x129d   :  { %v18627_v43 = vand.u32 4294901760, %v8360_v17  ;;  %v8433_v44 = vand.u32 4294901760, %v8432_v5  ;;  %v9012_v60 = vsub.f32 %v8908_v3, %v8918_v15  ;;  %v8912_v4 = vsel %vm1190_vm1, %v8901_v14, 0 }
0x129e   :  { %v8985_v54 = vand.u32 4294901760, %v18643_v6 }
0x129f   :  { %v8442_v18 = vsub.f32 %v8360_v17, %v18627_v43  ;;  %v8434_v52 = vsub.f32 %v8432_v5, %v8433_v44  ;;  %v9013_v35 = vand.u32 4294901760, %v9012_v60  ;;  %v17021_v28 = vpack.c.bf16 %v9012_v60, %v9005_v36 }
0x12a0   :  { %v8986_v22 = vsub.f32 %v18643_v6, %v8985_v54  ;;  %v8893_v53 = vpop.permute.xlu1 %8892 }
0x12a1   :  { %v8435_v47 = vand.u32 4294901760, %v8434_v52  ;;  %v8443_v46 = vand.u32 4294901760, %v8442_v18  ;;  %v8904_v24 = vsel %vm1190_vm1, %v8893_v53, 0  ;;  %v9014_v45 = vsub.f32 %v9012_v60, %v9013_v35 }
0x12a2   :  { %v8993_v17 = vand.u32 4294901760, %v8904_v24 }
0x12a3   :  { %15729 = vmatprep.mubr.f32.mxu1 %v8435_v47  ;;  %v8444_v62 = vsub.f32 %v8442_v18, %v8443_v46 }
0x12a4   :  { %v8994_v52 = vsub.f32 %v8904_v24, %v8993_v17 }
0x12a5   :  { %v8445_v57 = vand.u32 4294901760, %v8444_v62 }
0x12a6   :  { %v8995_v62 = vand.u32 4294901760, %v8994_v52 }
0x12a7   :  { %15730 = vmatmul.mubr.f32.vlgmr.msra.gmra.mrb[16].mxu1 %v8445_v57 }
0x12a8   :  { %16968 = vmatpush3.bf16.msra.mxu1 %v16965_v34  ;;  %15740 = vmatprep.mubr.f32.mxu1 %v8431_v31  ;;  %v8910_v34 = vsel %vm1190_vm1, %v8899_v40, 0 }
0x12a9   :  { %16970 = vmatprep.subr.bf16.mxu1 %v16969_v23  ;;  %v8921_v32 = vand.u32 4294901760, %v8910_v34 }
0x12ac   :  { %16972 = vmatpush3.bf16.msra.mxu1 %v16969_v23  ;;  %v8996_v23 = vsub.f32 %v8994_v52, %v8995_v62 }
0x12ad   :  { %16974 = vmatprep.subr.bf16.mxu1 %v16973_v25 }
0x12ae   :  { %v8997_v26 = vand.u32 4294901760, %v8996_v23 }
0x12af   :  { %15741 = vmatmul.mubr.f32.vlgmr.msra.gmra.mrb[16].mxu1 %v18627_v43 }
0x12b0   :  { %16976 = vmatpush3.bf16.msra.mxu1 %v16973_v25  ;;  %15751 = vmatprep.mubr.f32.mxu1 %v8432_v5  ;;  %v8924_v5 = vand.u32 4294901760, %v8912_v4 }
0x12b1   :  { %16978 = vmatprep.subr.bf16.mxu1 %v16977_v39 }
0x12b4   :  { %16980 = vmatpush3.bf16.msra.mxu1 %v16977_v39 }
0x12b5   :  { %16982 = vmatprep.subr.bf16.mxu1 %v18610_v19 }
0x12b7   :  { %15752 = vmatmul.mubr.f32.vlgmr.msra.gmra.mrb[16].mxu1 %v8442_v18  ;;  %v9026_v18 = vsub.f32 %v8912_v4, %v8924_v5 }
0x12b8   :  { %16984 = vmatpush3.bf16.msra.mxu1 %v18610_v19  ;;  %15762 = vmatprep.mubr.f32.mxu1 %v8433_v44  ;;  %v9019_v44 = vsub.f32 %v8910_v34, %v8921_v32 }
0x12b9   :  { %16986 = vmatprep.subr.bf16.mxu1 %v18617_v33 }
0x12ba   :  { %v9020_v59 = vand.u32 4294901760, %v9019_v44  ;;  %v17025_v48 = vpack.c.bf16 %v9026_v18, %v9019_v44 }
0x12bc   :  { %16988 = vmatpush3.bf16.msra.mxu1 %v18617_v33  ;;  %v9021_v49 = vsub.f32 %v9019_v44, %v9020_v59 }
0x12bd   :  { %16990 = vmatprep.subr.bf16.mxu1 %v16989_v30 }
0x12be   :  { %v9022_v25 = vand.u32 4294901760, %v9021_v49 }
0x12bf   :  { %15763 = vmatmul.mubr.f32.vlgmr.msra.gmra.mrb[16].mxu1 %v8443_v46  ;;  %v9027_v46 = vand.u32 4294901760, %v9026_v18 }
0x12c0   :  { %16992 = vmatpush3.bf16.msra.mxu1 %v16989_v30  ;;  %15773 = vmatprep.mubr.f32.mxu1 %v8431_v31 }
0x12c1   :  { %16994 = vmatprep.subr.bf16.mxu1 %v16993_v63  ;;  %v9028_v55 = vsub.f32 %v9026_v18, %v9027_v46 }
0x12c3   :  { %v9029_v39 = vand.u32 4294901760, %v9028_v55 }
0x12c4   :  { %16996 = vmatpush3.bf16.msra.mxu1 %v16993_v63  ;;  %v17041_v63 = vpack.c.bf16 %v9027_v46, %v9020_v59 }
0x12c5   :  { %16998 = vmatprep.subr.bf16.mxu1 %v18610_v19  ;;  %v17017_v40 = vpack.c.bf16 %v9029_v39, %v9022_v25 }
0x12c7   :  { %15774 = vmatmul.mubr.f32.vlgmr.msra.gmra.mrb[16].mxu1 %v18627_v43 }
0x12c8   :  { %17000 = vmatpush3.bf16.msra.mxu1 %v18610_v19  ;;  %15784 = vmatprep.mubr.f32.mxu1 %v8431_v31  ;;  %v8987_v19 = vand.u32 4294901760, %v8986_v22  ;;  %v9006_v31 = vand.u32 4294901760, %v9005_v36 }
0x12c9   :  { %17002 = vmatprep.subr.bf16.mxu1 %v18617_v33 }
0x12ca   :  { %v9007_v41 = vsub.f32 %v9005_v36, %v9006_v31  ;;  %v17037_v30 = vpack.c.bf16 %v9013_v35, %v9006_v31 }
0x12cc   :  { %17004 = vmatpush3.bf16.msra.mxu1 %v18617_v33  ;;  %v17009_v33 = vpack.c.bf16 %v8924_v5, %v8921_v32  ;;  %v9008_v47 = vand.u32 4294901760, %v9007_v41 }
0x12cd   :  { %17006 = vmatprep.subr.bf16.mxu1 %v18655_v9 }
0x12cf   :  { %15785 = vmatmul.mubr.f32.vlgmr.msra.gmra.mrb[16].mxu1 %v18627_v43  ;;  %v9015_v43 = vand.u32 4294901760, %v9014_v45 }
0x12d0   :  { %15795 = vmatprep.mubr.f32.mxu1 %v8987_v19 }
0x12d1   :  { %v17013_v57 = vpack.c.bf16 %v9015_v43, %v9008_v47 }
0x12d5   :  { %17008 = vmatpush3.bf16.xpose.msra.mxu1 %v18655_v9 }
0x12d6   :  { %17010 = vmatprep.subr.bf16.mxu1 %v17009_v33 }
0x12dd   :  { %17012 = vmatpush3.bf16.xpose.msra.mxu1 %v17009_v33 }
0x12de   :  { %17014 = vmatprep.subr.bf16.mxu1 %v17013_v57 }
0x12e4   :  { %15796 = vmatmul.mubr.f32.vlgmr.msra.gmra.mrb[18].mxu1 %v8997_v26 }
0x12e5   :  { %17016 = vmatpush3.bf16.xpose.msra.mxu1 %v17013_v57  ;;  %15806 = vmatprep.mubr.f32.mxu1 %v18640_v29 }
0x12e6   :  { %17018 = vmatprep.subr.bf16.mxu1 %v17017_v40 }
0x12ed   :  { %17020 = vmatpush3.bf16.xpose.msra.mxu1 %v17017_v40 }
0x12ee   :  { %17022 = vmatprep.subr.bf16.mxu1 %v17021_v28 }
0x12f4   :  { %15807 = vmatmul.mubr.f32.vlgmr.msra.gmra.mrb[18].mxu1 %v8993_v17 }
0x12f5   :  { %17024 = vmatpush3.bf16.xpose.msra.mxu1 %v17021_v28  ;;  %15817 = vmatprep.mubr.f32.mxu1 %v18643_v6 }
0x12f6   :  { %17026 = vmatprep.subr.bf16.mxu1 %v17025_v48 }
0x12fd   :  { %17028 = vmatpush3.bf16.xpose.msra.mxu1 %v17025_v48 }
0x12fe   :  { %17030 = vmatprep.subr.bf16.mxu1 %v18655_v9 }
0x1304   :  { %15818 = vmatmul.mubr.f32.vlgmr.msra.gmra.mrb[18].mxu1 %v8994_v52 }
0x1305   :  { %17032 = vmatpush3.bf16.xpose.msra.mxu1 %v18655_v9  ;;  %15828 = vmatprep.mubr.f32.mxu1 %v8985_v54 }
0x1306   :  { %17034 = vmatprep.subr.bf16.mxu1 %v17009_v33 }
0x130d   :  { %17036 = vmatpush3.bf16.xpose.msra.mxu1 %v17009_v33 }
0x130e   :  { %17038 = vmatprep.subr.bf16.mxu1 %v17037_v30 }
0x1314   :  { %15829 = vmatmul.mubr.f32.vlgmr.msra.gmra.mrb[18].mxu1 %v8995_v62 }
0x1315   :  { %17040 = vmatpush3.bf16.xpose.msra.mxu1 %v17037_v30  ;;  %15839 = vmatprep.mubr.f32.mxu1 %v18640_v29 }
0x1316   :  { %17042 = vmatprep.subr.bf16.mxu1 %v17041_v63 }
0x131d   :  { %17044 = vmatpush3.bf16.xpose.msra.mxu1 %v17041_v63 }
0x131e   :  { %17046 = vmatprep.subr.bf16.mxu1 %v18655_v9 }
0x1324   :  { %15840 = vmatmul.mubr.f32.vlgmr.msra.gmra.mrb[18].mxu1 %v8993_v17 }
0x1325   :  { %17048 = vmatpush3.bf16.xpose.msra.mxu1 %v18655_v9  ;;  %15850 = vmatprep.mubr.f32.mxu1 %v18640_v29 }
0x1326   :  { %17050 = vmatprep.subr.bf16.mxu1 %v17009_v33 }
0x132d   :  { %17052 = vmatpush3.bf16.xpose.msra.mxu1 %v17009_v33 }
0x1334   :  { %15851 = vmatmul.mubr.f32.vlgmr.msra.gmra.mrb[18].mxu1 %v8993_v17 }
0x13a2   :  { %v18674_v38 = vpop.f32.mrb[16].mxu1 }
0x13a3   :  { %v18676_v6 = vpop.f32.mrb[17].mxu1 }
0x1407   :  { %v15852_v8 = vpop.f32.mrb[18].mxu1 }
0x1408   :  { %v17509_v3 = vadd.f32 %v15852_v8, %v18574_v7  ;;  %v9432_v14 = vpop.f32.mrb[19].mxu1 }
0x1409   :  { %v17510_v54 = vadd.f32 %v9432_v14, %v18579_v58 }
0x140a   :  { %v9445_v0 = vsel %vm89_vm0, %v17509_v3, -inf }
0x140b   :  { %9446 = vmax.xlane.f32.xlu1 %v9445_v0  ;;  %v9442_v15 = vsel %vm89_vm0, %v17510_v54, -inf }
0x140c   :  { %9443 = vmax.xlane.f32.xlu0 %v9442_v15 }
0x141c   :  { %9470 = vrot.lane.b32.xlu1 %v18541_v13, %s17875_s7 }
0x1420   :  { %9474 = vrot.lane.b32.xlu1 %v18543_v56, %s17875_s7 }
0x1424   :  { %9476 = vrot.lane.b32.xlu1 %v18537_v11, %s17875_s7 }
0x1428   :  { %10022 = vrot.lane.b32.xlu1 %v18546_v1, %s17878_s10 }
0x142c   :  { %10026 = vrot.lane.b32.xlu1 %v18549_v20, %s17878_s10 }
0x1430   :  { %10018 = vrot.lane.b32.xlu1 %v18539_v12, %s17878_s10 }
0x1498   :  { %v9447_v29 = vpop.xlane.xlu1 %9446 }
0x1499   :  { %v9449_v22 = vsub.f32 %v17509_v3, %v9447_v29  ;;  %v9444_v9 = vpop.xlane.xlu0 %9443 }
0x149a   :  { %v9448_v53 = vsub.f32 %v17510_v54, %v9444_v9 }
0x149b   :  { %v9452_v36 = vmul.f32 1.442695, %v9449_v22 }
0x149c   :  { %v9450_v34 = vmul.f32 1.442695, %v9448_v53  ;;  %v9471_v31 = vpop.permute.xlu1 %9470 }
0x149d   :  { %v9489_v5 = vand.u32 4294901760, %v9471_v31 }
0x149e   :  { %17835 = vpow2.f32 %v9450_v34 }
0x149f   :  { %17837 = vpow2.f32 %v9452_v36  ;;  %v18704_v41 = vsub.f32 %v9471_v31, %v9489_v5 }
0x14a0   :  { %v9475_v32 = vpop.permute.xlu1 %9474 }
0x14a1   :  { %v9580_v45 = vand.u32 4294901760, %v18704_v41  ;;  %v9495_v47 = vand.u32 4294901760, %v9475_v32 }
0x14a3   :  { %v9581_v49 = vsub.f32 %v18704_v41, %v9580_v45  ;;  %v9593_v0 = vsub.f32 %v9475_v32, %v9495_v47 }
0x14a4   :  { %v9477_v33 = vpop.permute.xlu1 %9476 }
0x14a5   :  { %v9498_v18 = vand.u32 4294901760, %v9477_v33  ;;  %v9582_v28 = vand.u32 4294901760, %v9581_v49  ;;  %v9594_v36 = vand.u32 4294901760, %v9593_v0 }
0x14a7   :  { %v18714_v57 = vpack.c.bf16 %v9498_v18, %v9495_v47  ;;  %v9600_v8 = vsub.f32 %v9477_v33, %v9498_v18 }
0x14a8   :  { %v17836_v60 = vpop.eup %17835 }
0x14a9   :  { %v9454_v19 = vsel %vm89_vm0, %v17836_v60, 0.0  ;;  %v17838_v4 = vpop.eup %17837  ;;  %v9601_v22 = vand.u32 4294901760, %v9600_v8  ;;  %v17073_v47 = vpack.c.bf16 %v9600_v8, %v9593_v0 }
0x14aa   :  { %9455 = vadd.xlane.f32.xlu0 %v9454_v19  ;;  %v9457_v24 = vsel %vm89_vm0, %v17838_v4, 0.0 }
0x14ab   :  { %v9602_v19 = vsub.f32 %v9600_v8, %v9601_v22 }
0x14ad   :  { %v9603_v33 = vand.u32 4294901760, %v9602_v19 }
0x14ae   :  { %9458 = vadd.xlane.f32.xlu0 %v9457_v24 }
0x14c4   :  { %9472 = vrot.lane.b32.xlu0 %v18535_v10, %s17875_s7 }
0x14c8   :  { %10020 = vrot.lane.b32.xlu0 %v18552_v42, %s17878_s10 }
0x14cc   :  { %10024 = vrot.lane.b32.xlu0 %v18555_v21, %s17878_s10 }
0x14d0   :  { %10016 = vrot.lane.b32.xlu0 %v18523_v2, %s17878_s10 }
0x1537   :  { %v9456_v35 = vpop.xlane.xlu0 %9455 }
0x1538   :  { %17839 = vrcp.f32 %v9456_v35 }
0x153b   :  { %v9459_v17 = vpop.xlane.xlu0 %9458 }
0x153c   :  { %17841 = vrcp.f32 %v9459_v17 }
0x153f   :  { %v9473_v44 = vpop.permute.xlu0 %9472 }
0x1540   :  { %v9492_v52 = vand.u32 4294901760, %v9473_v44 }
0x1542   :  { %v17840_v59 = vpop.eup %17839  ;;  %v18707_v46 = vpack.c.bf16 %v9492_v52, %v9489_v5  ;;  %v18709_v62 = vsub.f32 %v9473_v44, %v9492_v52 }
0x1543   :  { %v9462_v43 = vmul.f32 %v17840_v59, %v9456_v35  ;;  %v9595_v35 = vsub.f32 %v9593_v0, %v9594_v36 }
0x1544   :  { %v9587_v55 = vand.u32 4294901760, %v18709_v62  ;;  %17054 = vmatprep.subr.bf16.mxu0 %v18707_v46  ;;  %v17069_v52 = vpack.c.bf16 %v18709_v62, %v18704_v41 }
0x1545   :  { %v9464_v23 = vsub.f32 2.0, %v9462_v43  ;;  %17056 = vmatpush3.bf16.msra.mxu0 %v18707_v46 }
0x1546   :  { %v17842_v25 = vpop.eup %17841  ;;  %v9588_v26 = vsub.f32 %v18709_v62, %v9587_v55  ;;  %17058 = vmatprep.subr.bf16.mxu0 %v18714_v57 }
0x1547   :  { %v9466_v39 = vmul.f32 %v17840_v59, %v9464_v23  ;;  %v9463_v40 = vmul.f32 %v17842_v25, %v9459_v17  ;;  %v10021_v59 = vpop.permute.xlu0 %10020  ;;  %v17085_v23 = vpack.c.bf16 %v9587_v55, %v9580_v45 }
0x1548   :  { %v9589_v48 = vand.u32 4294901760, %v9588_v26  ;;  %v17089_v26 = vpack.c.bf16 %v9601_v22, %v9594_v36 }
0x1549   :  { %v9468_v30 = vmul.f32 %v17836_v60, %v9466_v39  ;;  %v9465_v63 = vsub.f32 2.0, %v9463_v40  ;;  %17060 = vmatpush3.bf16.msra.mxu0 %v18714_v57  ;;  %v10023_v39 = vpop.permute.xlu1 %10022 }
0x154a   :  { %v17061_v3 = vpack.c.bf16 %v9589_v48, %v9582_v28  ;;  %v10032_v28 = vsel %vm1190_vm1, %v10021_v59, 0  ;;  %v10034_v41 = vsel %vm1190_vm1, %v10023_v39, 0 }
0x154b   :  { %v9483_v14 = vsel %vm89_vm0, %v9468_v30, 0  ;;  %v9467_v54 = vmul.f32 %v17842_v25, %v9465_v63  ;;  %v10025_v43 = vpop.permute.xlu0 %10024  ;;  %v10041_v48 = vand.u32 4294901760, %v10032_v28  ;;  %v10044_v30 = vand.u32 4294901760, %v10034_v41 }
0x154c   :  { %v9557_v15 = vand.u32 4294901760, %v9483_v14  ;;  %17062 = vmatprep.subr.bf16.mxu0 %v17061_v3 }
0x154d   :  { %v9469_v29 = vmul.f32 %v17838_v4, %v9467_v54  ;;  %v9596_v4 = vand.u32 4294901760, %v9595_v35  ;;  %v10027_v45 = vpop.permute.xlu1 %10026  ;;  %v18752_v8 = vpack.c.bf16 %v10044_v30, %v10041_v48  ;;  %v10036_v54 = vsel %vm1190_vm1, %v10025_v43, 0 }
0x154e   :  { %v9558_v9 = vsub.f32 %v9483_v14, %v9557_v15  ;;  %v10131_v14 = vsub.f32 %v10032_v28, %v10041_v48  ;;  %v10138_v0 = vsub.f32 %v10034_v41, %v10044_v30 }
0x154f   :  { %v9486_v53 = vsel %vm89_vm0, %v9469_v29, 0  ;;  %v17065_v18 = vpack.c.bf16 %v9603_v33, %v9596_v4  ;;  %v10017_v49 = vpop.permute.xlu0 %10016 }
0x1550   :  { %v18724_v34 = vand.u32 4294901760, %v9486_v53  ;;  %v9559_v60 = vand.u32 4294901760, %v9558_v9  ;;  %v10028_v62 = vsel %vm1190_vm1, %v10017_v49, 0  ;;  %v10132_v22 = vand.u32 4294901760, %v10131_v14 }
0x1551   :  { %v18737_v25 = vand.u32 4294901760, %v10028_v62 }
0x1552   :  { %v9568_v24 = vsub.f32 %v9486_v53, %v18724_v34  ;;  %v9560_v31 = vsub.f32 %v9558_v9, %v9559_v60  ;;  %v10139_v53 = vand.u32 4294901760, %v10138_v0  ;;  %v10133_v19 = vsub.f32 %v10131_v14, %v10132_v22 }
0x1553   :  { %v18740_v40 = vsub.f32 %v10028_v62, %v18737_v25 }
0x1554   :  { %v9561_v5 = vand.u32 4294901760, %v9560_v31  ;;  %v9569_v17 = vand.u32 4294901760, %v9568_v24  ;;  %v10140_v31 = vsub.f32 %v10138_v0, %v10139_v53  ;;  %v17133_v39 = vpack.c.bf16 %v10139_v53, %v10132_v22 }
0x1555   :  { %v10111_v55 = vand.u32 4294901760, %v18740_v40 }
0x1556   :  { %15861 = vmatprep.mubr.f32.mxu0 %v9561_v5  ;;  %v9570_v32 = vsub.f32 %v9568_v24, %v9569_v17 }
0x1557   :  { %v10112_v63 = vsub.f32 %v18740_v40, %v10111_v55 }
0x1558   :  { %v9571_v44 = vand.u32 4294901760, %v9570_v32  ;;  %v10134_v32 = vand.u32 4294901760, %v10133_v19 }
0x155a   :  { %15862 = vmatmul.mubr.f32.vlgmr.msra.gmra.mrb[18].mxu0 %v9571_v44 }
0x155b   :  { %17064 = vmatpush3.bf16.msra.mxu0 %v17061_v3  ;;  %15872 = vmatprep.mubr.f32.mxu0 %v9557_v15  ;;  %v10019_v3 = vpop.permute.xlu1 %10018 }
0x155c   :  { %17066 = vmatprep.subr.bf16.mxu0 %v17065_v18  ;;  %v10030_v29 = vsel %vm1190_vm1, %v10019_v3, 0 }
0x155f   :  { %17068 = vmatpush3.bf16.msra.mxu0 %v17065_v18 }
0x1560   :  { %17070 = vmatprep.subr.bf16.mxu0 %v17069_v52 }
0x1562   :  { %15873 = vmatmul.mubr.f32.vlgmr.msra.gmra.mrb[18].mxu0 %v18724_v34 }
0x1563   :  { %17072 = vmatpush3.bf16.msra.mxu0 %v17069_v52  ;;  %15883 = vmatprep.mubr.f32.mxu0 %v9558_v9  ;;  %v10047_v9 = vand.u32 4294901760, %v10036_v54 }
0x1564   :  { %17074 = vmatprep.subr.bf16.mxu0 %v17073_v47 }
0x1567   :  { %17076 = vmatpush3.bf16.msra.mxu0 %v17073_v47 }
0x1568   :  { %17078 = vmatprep.subr.bf16.mxu0 %v18707_v46 }
0x156a   :  { %15884 = vmatmul.mubr.f32.vlgmr.msra.gmra.mrb[18].mxu0 %v9568_v24  ;;  %v10145_v24 = vsub.f32 %v10036_v54, %v10047_v9 }
0x156b   :  { %17080 = vmatpush3.bf16.msra.mxu0 %v18707_v46  ;;  %15894 = vmatprep.mubr.f32.mxu0 %v9559_v60  ;;  %v10119_v60 = vand.u32 4294901760, %v10030_v29 }
0x156c   :  { %17082 = vmatprep.subr.bf16.mxu0 %v18714_v57 }
0x156d   :  { %v10120_v5 = vsub.f32 %v10030_v29, %v10119_v60 }
0x156f   :  { %17084 = vmatpush3.bf16.msra.mxu0 %v18714_v57  ;;  %v10121_v44 = vand.u32 4294901760, %v10120_v5 }
0x1570   :  { %17086 = vmatprep.subr.bf16.mxu0 %v17085_v23 }
0x1571   :  { %v10122_v59 = vsub.f32 %v10120_v5, %v10121_v44 }
0x1572   :  { %15895 = vmatmul.mubr.f32.vlgmr.msra.gmra.mrb[18].mxu0 %v9569_v17  ;;  %v10146_v17 = vand.u32 4294901760, %v10145_v24 }
0x1573   :  { %17088 = vmatpush3.bf16.msra.mxu0 %v17085_v23  ;;  %15905 = vmatprep.mubr.f32.mxu0 %v9557_v15  ;;  %v10123_v43 = vand.u32 4294901760, %v10122_v59  ;;  %v17117_v23 = vpack.c.bf16 %v10138_v0, %v10131_v14 }
0x1574   :  { %17090 = vmatprep.subr.bf16.mxu0 %v17089_v26  ;;  %v10147_v4 = vsub.f32 %v10145_v24, %v10146_v17 }
0x1576   :  { %v10148_v47 = vand.u32 4294901760, %v10147_v4 }
0x1577   :  { %17092 = vmatpush3.bf16.msra.mxu0 %v17089_v26 }
0x1578   :  { %17094 = vmatprep.subr.bf16.mxu0 %v18707_v46 }
0x157a   :  { %15906 = vmatmul.mubr.f32.vlgmr.msra.gmra.mrb[18].mxu0 %v18724_v34 }
0x157b   :  { %17096 = vmatpush3.bf16.msra.mxu0 %v18707_v46  ;;  %15916 = vmatprep.mubr.f32.mxu0 %v9557_v15  ;;  %v10113_v46 = vand.u32 4294901760, %v10112_v63  ;;  %v10038_v15 = vsel %vm1190_vm1, %v10027_v45, 0 }
0x157c   :  { %17098 = vmatprep.subr.bf16.mxu0 %v18714_v57  ;;  %v10050_v36 = vand.u32 4294901760, %v10038_v15 }
0x157e   :  { %v10152_v35 = vsub.f32 %v10038_v15, %v10050_v36 }
0x157f   :  { %17100 = vmatpush3.bf16.msra.mxu0 %v18714_v57  ;;  %v17105_v57 = vpack.c.bf16 %v10050_v36, %v10047_v9 }
0x1580   :  { %17102 = vmatprep.subr.bf16.mxu0 %v18752_v8  ;;  %v10153_v33 = vand.u32 4294901760, %v10152_v35  ;;  %v17121_v26 = vpack.c.bf16 %v10152_v35, %v10145_v24 }
0x1582   :  { %15917 = vmatmul.mubr.f32.vlgmr.msra.gmra.mrb[18].mxu0 %v18724_v34  ;;  %v10141_v34 = vand.u32 4294901760, %v10140_v31  ;;  %v10154_v52 = vsub.f32 %v10152_v35, %v10153_v33  ;;  %v17137_v28 = vpack.c.bf16 %v10153_v33, %v10146_v17 }
0x1583   :  { %15927 = vmatprep.mubr.f32.mxu0 %v10113_v46 }
0x1584   :  { %v17109_v18 = vpack.c.bf16 %v10141_v34, %v10134_v32  ;;  %v10155_v49 = vand.u32 4294901760, %v10154_v52 }
0x1586   :  { %v17113_v62 = vpack.c.bf16 %v10155_v49, %v10148_v47 }
0x1588   :  { %17104 = vmatpush3.bf16.xpose.msra.mxu0 %v18752_v8 }
0x1589   :  { %17106 = vmatprep.subr.bf16.mxu0 %v17105_v57 }
0x1590   :  { %17108 = vmatpush3.bf16.xpose.msra.mxu0 %v17105_v57 }
0x1591   :  { %17110 = vmatprep.subr.bf16.mxu0 %v17109_v18 }
0x1597   :  { %15928 = vmatmul.mubr.f32.vlgmr.msra.gmra.mrb[20].mxu0 %v10123_v43 }
0x1598   :  { %17112 = vmatpush3.bf16.xpose.msra.mxu0 %v17109_v18  ;;  %15938 = vmatprep.mubr.f32.mxu0 %v18737_v25 }
0x1599   :  { %17114 = vmatprep.subr.bf16.mxu0 %v17113_v62 }
0x15a0   :  { %17116 = vmatpush3.bf16.xpose.msra.mxu0 %v17113_v62 }
0x15a1   :  { %17118 = vmatprep.subr.bf16.mxu0 %v17117_v23 }
0x15a7   :  { %15939 = vmatmul.mubr.f32.vlgmr.msra.gmra.mrb[20].mxu0 %v10119_v60 }
0x15a8   :  { %17120 = vmatpush3.bf16.xpose.msra.mxu0 %v17117_v23  ;;  %15949 = vmatprep.mubr.f32.mxu0 %v18740_v40 }
0x15a9   :  { %17122 = vmatprep.subr.bf16.mxu0 %v17121_v26 }
0x15b0   :  { %17124 = vmatpush3.bf16.xpose.msra.mxu0 %v17121_v26 }
0x15b1   :  { %17126 = vmatprep.subr.bf16.mxu0 %v18752_v8 }
0x15b7   :  { %15950 = vmatmul.mubr.f32.vlgmr.msra.gmra.mrb[20].mxu0 %v10120_v5 }
0x15b8   :  { %17128 = vmatpush3.bf16.xpose.msra.mxu0 %v18752_v8  ;;  %15960 = vmatprep.mubr.f32.mxu0 %v10111_v55 }
0x15b9   :  { %17130 = vmatprep.subr.bf16.mxu0 %v17105_v57 }
0x15c0   :  { %17132 = vmatpush3.bf16.xpose.msra.mxu0 %v17105_v57 }
0x15c1   :  { %17134 = vmatprep.subr.bf16.mxu0 %v17133_v39 }
0x15c7   :  { %15961 = vmatmul.mubr.f32.vlgmr.msra.gmra.mrb[20].mxu0 %v10121_v44 }
0x15c8   :  { %17136 = vmatpush3.bf16.xpose.msra.mxu0 %v17133_v39  ;;  %15971 = vmatprep.mubr.f32.mxu0 %v18737_v25 }
0x15c9   :  { %17138 = vmatprep.subr.bf16.mxu0 %v17137_v28 }
0x15d0   :  { %17140 = vmatpush3.bf16.xpose.msra.mxu0 %v17137_v28 }
0x15d1   :  { %17142 = vmatprep.subr.bf16.mxu0 %v18752_v8 }
0x15d7   :  { %15972 = vmatmul.mubr.f32.vlgmr.msra.gmra.mrb[20].mxu0 %v10119_v60 }
0x15d8   :  { %17144 = vmatpush3.bf16.xpose.msra.mxu0 %v18752_v8  ;;  %15982 = vmatprep.mubr.f32.mxu0 %v18737_v25 }
0x15d9   :  { %17146 = vmatprep.subr.bf16.mxu0 %v17105_v57 }
0x15e0   :  { %17148 = vmatpush3.bf16.xpose.msra.mxu0 %v17105_v57 }
0x15e7   :  { %15983 = vmatmul.mubr.f32.vlgmr.msra.gmra.mrb[20].mxu0 %v10119_v60 }
0x1655   :  { %v18771_v40 = vpop.f32.mrb[18].mxu0 }
0x1656   :  { %v18773_v41 = vpop.f32.mrb[19].mxu0 }
0x16ba   :  { %v15984_v45 = vpop.f32.mrb[20].mxu0 }
0x16bb   :  { %v17511_v55 = vadd.f32 %v15984_v45, %v18574_v7  ;;  %v10558_v48 = vpop.f32.mrb[21].mxu0 }
0x16bc   :  { %v17512_v30 = vadd.f32 %v10558_v48, %v18579_v58 }
0x16bd   :  { %v10571_v63 = vsel %vm89_vm0, %v17511_v55, -inf }
0x16be   :  { %10572 = vmax.xlane.f32.xlu1 %v10571_v63  ;;  %v10568_v8 = vsel %vm89_vm0, %v17512_v30, -inf }
0x16bf   :  { %10569 = vmax.xlane.f32.xlu0 %v10568_v8 }
0x16cf   :  { %10596 = vrot.lane.b32.xlu1 %v18541_v13, %s17877_s9 }
0x16d3   :  { %10600 = vrot.lane.b32.xlu1 %v18543_v56, %s17877_s9 }
0x16d7   :  { %10602 = vrot.lane.b32.xlu1 %v18537_v11, %s17877_s9 }
0x16db   :  { %11148 = vrot.lane.b32.xlu1 %v18546_v1, %s17880_s12 }
0x16df   :  { %11152 = vrot.lane.b32.xlu1 %v18549_v20, %s17880_s12 }
0x16e3   :  { %11144 = vrot.lane.b32.xlu1 %v18539_v12, %s17880_s12 }
0x174b   :  { %v10573_v25 = vpop.xlane.xlu1 %10572 }
0x174c   :  { %v10575_v3 = vsub.f32 %v17511_v55, %v10573_v25  ;;  %v10570_v14 = vpop.xlane.xlu0 %10569 }
0x174d   :  { %v10574_v54 = vsub.f32 %v17512_v30, %v10570_v14 }
0x174e   :  { %v10578_v0 = vmul.f32 1.442695, %v10575_v3 }
0x174f   :  { %v10576_v46 = vmul.f32 1.442695, %v10574_v54  ;;  %v10597_v12 = vpop.permute.xlu1 %10596 }
0x1750   :  { %v10615_v53 = vand.u32 4294901760, %v10597_v12 }
0x1751   :  { %17843 = vpow2.f32 %v10576_v46 }
0x1752   :  { %17845 = vpow2.f32 %v10578_v0  ;;  %v18801_v60 = vsub.f32 %v10597_v12, %v10615_v53 }
0x1753   :  { %v10601_v20 = vpop.permute.xlu1 %10600 }
0x1754   :  { %v10706_v24 = vand.u32 4294901760, %v18801_v60 }
0x1756   :  { %v10707_v32 = vsub.f32 %v18801_v60, %v10706_v24 }
0x1757   :  { %v10603_v19 = vpop.permute.xlu1 %10602 }
0x1758   :  { %v10708_v47 = vand.u32 4294901760, %v10707_v32 }
0x175b   :  { %v17844_v15 = vpop.eup %17843  ;;  %v11149_v32 = vpop.permute.xlu1 %11148 }
0x175c   :  { %v10580_v29 = vsel %vm89_vm0, %v17844_v15, 0.0  ;;  %v17846_v22 = vpop.eup %17845 }
0x175d   :  { %10581 = vadd.xlane.f32.xlu0 %v10580_v29  ;;  %v10583_v1 = vsel %vm89_vm0, %v17846_v22, 0.0 }
0x1761   :  { %10584 = vadd.xlane.f32.xlu0 %v10583_v1 }
0x1777   :  { %10598 = vrot.lane.b32.xlu0 %v18535_v10, %s17877_s9 }
0x177b   :  { %11146 = vrot.lane.b32.xlu0 %v18552_v42, %s17880_s12  ;;  %v10624_v42 = vand.u32 4294901760, %v10603_v19 }
0x177d   :  { %v10726_v23 = vsub.f32 %v10603_v19, %v10624_v42 }
0x177f   :  { %11150 = vrot.lane.b32.xlu0 %v18555_v21, %s17880_s12  ;;  %v10621_v21 = vand.u32 4294901760, %v10601_v20  ;;  %v10727_v30 = vand.u32 4294901760, %v10726_v23 }
0x1781   :  { %v18811_v33 = vpack.c.bf16 %v10624_v42, %v10621_v21  ;;  %v10719_v45 = vsub.f32 %v10601_v20, %v10621_v21  ;;  %v10728_v54 = vsub.f32 %v10726_v23, %v10727_v30 }
0x1783   :  { %11142 = vrot.lane.b32.xlu0 %v18523_v2, %s17880_s12  ;;  %v10720_v25 = vand.u32 4294901760, %v10719_v45  ;;  %v10729_v20 = vand.u32 4294901760, %v10728_v54 }
0x17ea   :  { %v10582_v9 = vpop.xlane.xlu0 %10581 }
0x17eb   :  { %17847 = vrcp.f32 %v10582_v9 }
0x17ee   :  { %v10585_v36 = vpop.xlane.xlu0 %10584 }
0x17ef   :  { %17849 = vrcp.f32 %v10585_v36 }
0x17f2   :  { %v10599_v57 = vpop.permute.xlu0 %10598 }
0x17f3   :  { %v10618_v31 = vand.u32 4294901760, %v10599_v57 }
0x17f5   :  { %v17848_v35 = vpop.eup %17847  ;;  %v18804_v5 = vpack.c.bf16 %v10618_v31, %v10615_v53  ;;  %v18806_v2 = vsub.f32 %v10599_v57, %v10618_v31  ;;  %v17169_v57 = vpack.c.bf16 %v10726_v23, %v10719_v45 }
0x17f6   :  { %v10588_v17 = vmul.f32 %v17848_v35, %v10582_v9  ;;  %v11147_v19 = vpop.permute.xlu0 %11146 }
0x17f7   :  { %v10713_v44 = vand.u32 4294901760, %v18806_v2  ;;  %17150 = vmatprep.subr.bf16.mxu1 %v18804_v5 }
0x17f8   :  { %v10590_v34 = vsub.f32 2.0, %v10588_v17  ;;  %17152 = vmatpush3.bf16.msra.mxu1 %v18804_v5  ;;  %v17185_v17 = vpack.c.bf16 %v10727_v30, %v10720_v25 }
0x17f9   :  { %v17850_v4 = vpop.eup %17849  ;;  %v10714_v18 = vsub.f32 %v18806_v2, %v10713_v44  ;;  %17154 = vmatprep.subr.bf16.mxu1 %v18811_v33  ;;  %v17181_v21 = vpack.c.bf16 %v10713_v44, %v10706_v24  ;;  %v11153_v24 = vpop.permute.xlu1 %11152 }
0x17fa   :  { %v10592_v52 = vmul.f32 %v17848_v35, %v10590_v34  ;;  %v10589_v59 = vmul.f32 %v17850_v4, %v10585_v36  ;;  %v17165_v36 = vpack.c.bf16 %v18806_v2, %v18801_v60  ;;  %v11151_v42 = vpop.permute.xlu0 %11150  ;;  %v11160_v60 = vsel %vm1190_vm1, %v11149_v32, 0 }
0x17fb   :  { %v10715_v43 = vand.u32 4294901760, %v10714_v18 }
0x17fc   :  { %v10594_v49 = vmul.f32 %v17844_v15, %v10592_v52  ;;  %v10591_v62 = vsub.f32 2.0, %v10589_v59  ;;  %17156 = vmatpush3.bf16.msra.mxu1 %v18811_v33  ;;  %v10721_v15 = vsub.f32 %v10719_v45, %v10720_v25  ;;  %v11170_v52 = vand.u32 4294901760, %v11160_v60 }
0x17fd   :  { %v17157_v26 = vpack.c.bf16 %v10715_v43, %v10708_v47  ;;  %v11145_v43 = vpop.permute.xlu1 %11144 }
0x17fe   :  { %v10609_v39 = vsel %vm89_vm0, %v10594_v49, 0  ;;  %v10593_v28 = vmul.f32 %v17850_v4, %v10591_v62  ;;  %v11143_v31 = vpop.permute.xlu0 %11142  ;;  %v11158_v4 = vsel %vm1190_vm1, %v11147_v19, 0  ;;  %v11162_v62 = vsel %vm1190_vm1, %v11151_v42, 0 }
0x17ff   :  { %v10683_v55 = vand.u32 4294901760, %v10609_v39  ;;  %17158 = vmatprep.subr.bf16.mxu1 %v17157_v26  ;;  %v11154_v35 = vsel %vm1190_vm1, %v11143_v31, 0  ;;  %v11167_v18 = vand.u32 4294901760, %v11158_v4  ;;  %v11264_v23 = vsub.f32 %v11160_v60, %v11170_v52 }
0x1800   :  { %v10595_v48 = vmul.f32 %v17846_v22, %v10593_v28  ;;  %v10722_v22 = vand.u32 4294901760, %v10721_v15  ;;  %v18834_v2 = vand.u32 4294901760, %v11154_v35  ;;  %v11173_v45 = vand.u32 4294901760, %v11162_v62 }
0x1801   :  { %v10684_v63 = vsub.f32 %v10609_v39, %v10683_v55  ;;  %v18849_v47 = vpack.c.bf16 %v11170_v52, %v11167_v18  ;;  %v11257_v49 = vsub.f32 %v11158_v4, %v11167_v18  ;;  %v11156_v39 = vsel %vm1190_vm1, %v11145_v43, 0 }
0x1802   :  { %v10612_v8 = vsel %vm89_vm0, %v10595_v48, 0  ;;  %v17161_v53 = vpack.c.bf16 %v10729_v20, %v10722_v22  ;;  %v18837_v34 = vsub.f32 %v11154_v35, %v18834_v2  ;;  %v11245_v30 = vand.u32 4294901760, %v11156_v39 }
0x1803   :  { %v18821_v3 = vand.u32 4294901760, %v10612_v8  ;;  %v10685_v14 = vand.u32 4294901760, %v10684_v63  ;;  %v11258_v28 = vand.u32 4294901760, %v11257_v49 }
0x1804   :  { %v11237_v44 = vand.u32 4294901760, %v18837_v34  ;;  %v11246_v54 = vsub.f32 %v11156_v39, %v11245_v30 }
0x1805   :  { %v10694_v0 = vsub.f32 %v10612_v8, %v18821_v3  ;;  %v10686_v46 = vsub.f32 %v10684_v63, %v10685_v14  ;;  %v11271_v8 = vsub.f32 %v11162_v62, %v11173_v45 }
0x1806   :  { %v11238_v59 = vsub.f32 %v18837_v34, %v11237_v44 }
0x1807   :  { %v10687_v29 = vand.u32 4294901760, %v10686_v46  ;;  %v10695_v1 = vand.u32 4294901760, %v10694_v0 }
0x1809   :  { %15993 = vmatprep.mubr.f32.mxu1 %v10687_v29  ;;  %v10696_v12 = vsub.f32 %v10694_v0, %v10695_v1  ;;  %v11247_v29 = vand.u32 4294901760, %v11246_v54 }
0x180b   :  { %v10697_v9 = vand.u32 4294901760, %v10696_v12 }
0x180d   :  { %15994 = vmatmul.mubr.f32.vlgmr.msra.gmra.mrb[20].mxu1 %v10697_v9  ;;  %v11248_v9 = vsub.f32 %v11246_v54, %v11247_v29 }
0x180e   :  { %17160 = vmatpush3.bf16.msra.mxu1 %v17157_v26  ;;  %16004 = vmatprep.mubr.f32.mxu1 %v10683_v55  ;;  %v11164_v26 = vsel %vm1190_vm1, %v11153_v24, 0 }
0x180f   :  { %17162 = vmatprep.subr.bf16.mxu1 %v17161_v53  ;;  %v11176_v48 = vand.u32 4294901760, %v11164_v26 }
0x1812   :  { %17164 = vmatpush3.bf16.msra.mxu1 %v17161_v53  ;;  %v11249_v53 = vand.u32 4294901760, %v11248_v9 }
0x1813   :  { %17166 = vmatprep.subr.bf16.mxu1 %v17165_v36 }
0x1815   :  { %16005 = vmatmul.mubr.f32.vlgmr.msra.gmra.mrb[20].mxu1 %v18821_v3 }
0x1816   :  { %17168 = vmatpush3.bf16.msra.mxu1 %v17165_v36  ;;  %16015 = vmatprep.mubr.f32.mxu1 %v10684_v63  ;;  %v11259_v63 = vsub.f32 %v11257_v49, %v11258_v28 }
0x1817   :  { %17170 = vmatprep.subr.bf16.mxu1 %v17169_v57 }
0x1818   :  { %v11260_v46 = vand.u32 4294901760, %v11259_v63 }
0x181a   :  { %17172 = vmatpush3.bf16.msra.mxu1 %v17169_v57  ;;  %v17213_v57 = vpack.c.bf16 %v11264_v23, %v11257_v49 }
0x181b   :  { %17174 = vmatprep.subr.bf16.mxu1 %v18804_v5 }
0x181d   :  { %16016 = vmatmul.mubr.f32.vlgmr.msra.gmra.mrb[20].mxu1 %v10694_v0  ;;  %v11272_v0 = vand.u32 4294901760, %v11271_v8 }
0x181e   :  { %17176 = vmatpush3.bf16.msra.mxu1 %v18804_v5  ;;  %16026 = vmatprep.mubr.f32.mxu1 %v10685_v14  ;;  %v11278_v14 = vsub.f32 %v11164_v26, %v11176_v48 }
0x181f   :  { %17178 = vmatprep.subr.bf16.mxu1 %v18811_v33 }
0x1820   :  { %v11279_v15 = vand.u32 4294901760, %v11278_v14  ;;  %v17217_v42 = vpack.c.bf16 %v11278_v14, %v11271_v8 }
0x1822   :  { %17180 = vmatpush3.bf16.msra.mxu1 %v18811_v33  ;;  %v11280_v20 = vsub.f32 %v11278_v14, %v11279_v15  ;;  %v17233_v35 = vpack.c.bf16 %v11279_v15, %v11272_v0 }
0x1823   :  { %17182 = vmatprep.subr.bf16.mxu1 %v17181_v21 }
0x1824   :  { %v11281_v36 = vand.u32 4294901760, %v11280_v20 }
0x1825   :  { %16027 = vmatmul.mubr.f32.vlgmr.msra.gmra.mrb[20].mxu1 %v10695_v1  ;;  %v11273_v1 = vsub.f32 %v11271_v8, %v11272_v0 }
0x1826   :  { %17184 = vmatpush3.bf16.msra.mxu1 %v17181_v21  ;;  %16037 = vmatprep.mubr.f32.mxu1 %v10683_v55 }
0x1827   :  { %17186 = vmatprep.subr.bf16.mxu1 %v17185_v17  ;;  %v11274_v22 = vand.u32 4294901760, %v11273_v1 }
0x1829   :  { %v17209_v19 = vpack.c.bf16 %v11281_v36, %v11274_v22 }
0x182a   :  { %17188 = vmatpush3.bf16.msra.mxu1 %v17185_v17 }
0x182b   :  { %17190 = vmatprep.subr.bf16.mxu1 %v18804_v5 }
0x182d   :  { %16038 = vmatmul.mubr.f32.vlgmr.msra.gmra.mrb[20].mxu1 %v18821_v3 }
0x182e   :  { %17192 = vmatpush3.bf16.msra.mxu1 %v18804_v5  ;;  %16048 = vmatprep.mubr.f32.mxu1 %v10683_v55  ;;  %v11239_v5 = vand.u32 4294901760, %v11238_v59  ;;  %v11265_v55 = vand.u32 4294901760, %v11264_v23 }
0x182f   :  { %17194 = vmatprep.subr.bf16.mxu1 %v18811_v33 }
0x1830   :  { %v11266_v25 = vsub.f32 %v11264_v23, %v11265_v55  ;;  %v17229_v31 = vpack.c.bf16 %v11265_v55, %v11258_v28 }
0x1832   :  { %17196 = vmatpush3.bf16.msra.mxu1 %v18811_v33  ;;  %v17201_v33 = vpack.c.bf16 %v11176_v48, %v11173_v45 }
0x1833   :  { %17198 = vmatprep.subr.bf16.mxu1 %v18849_v47 }
0x1835   :  { %16049 = vmatmul.mubr.f32.vlgmr.msra.gmra.mrb[20].mxu1 %v18821_v3  ;;  %v11267_v3 = vand.u32 4294901760, %v11266_v25 }
0x1836   :  { %16059 = vmatprep.mubr.f32.mxu1 %v11239_v5 }
0x1837   :  { %v17205_v12 = vpack.c.bf16 %v11267_v3, %v11260_v46 }
0x183b   :  { %17200 = vmatpush3.bf16.xpose.msra.mxu1 %v18849_v47 }
0x183c   :  { %17202 = vmatprep.subr.bf16.mxu1 %v17201_v33 }
0x1843   :  { %17204 = vmatpush3.bf16.xpose.msra.mxu1 %v17201_v33 }
0x1844   :  { %17206 = vmatprep.subr.bf16.mxu1 %v17205_v12 }
0x184a   :  { %16060 = vmatmul.mubr.f32.vlgmr.msra.gmra.mrb[22].mxu1 %v11249_v53 }
0x184b   :  { %17208 = vmatpush3.bf16.xpose.msra.mxu1 %v17205_v12  ;;  %16070 = vmatprep.mubr.f32.mxu1 %v18834_v2 }
0x184c   :  { %17210 = vmatprep.subr.bf16.mxu1 %v17209_v19 }
0x1853   :  { %17212 = vmatpush3.bf16.xpose.msra.mxu1 %v17209_v19 }
0x1854   :  { %17214 = vmatprep.subr.bf16.mxu1 %v17213_v57 }
0x185a   :  { %16071 = vmatmul.mubr.f32.vlgmr.msra.gmra.mrb[22].mxu1 %v11245_v30 }
0x185b   :  { %17216 = vmatpush3.bf16.xpose.msra.mxu1 %v17213_v57  ;;  %16081 = vmatprep.mubr.f32.mxu1 %v18837_v34 }
0x185c   :  { %17218 = vmatprep.subr.bf16.mxu1 %v17217_v42 }
0x1863   :  { %17220 = vmatpush3.bf16.xpose.msra.mxu1 %v17217_v42 }
0x1864   :  { %17222 = vmatprep.subr.bf16.mxu1 %v18849_v47 }
0x186a   :  { %16082 = vmatmul.mubr.f32.vlgmr.msra.gmra.mrb[22].mxu1 %v11246_v54 }
0x186b   :  { %17224 = vmatpush3.bf16.xpose.msra.mxu1 %v18849_v47  ;;  %16092 = vmatprep.mubr.f32.mxu1 %v11237_v44 }
0x186c   :  { %17226 = vmatprep.subr.bf16.mxu1 %v17201_v33 }
0x1873   :  { %17228 = vmatpush3.bf16.xpose.msra.mxu1 %v17201_v33 }
0x1874   :  { %17230 = vmatprep.subr.bf16.mxu1 %v17229_v31 }
0x187a   :  { %16093 = vmatmul.mubr.f32.vlgmr.msra.gmra.mrb[22].mxu1 %v11247_v29 }
0x187b   :  { %17232 = vmatpush3.bf16.xpose.msra.mxu1 %v17229_v31  ;;  %16103 = vmatprep.mubr.f32.mxu1 %v18834_v2 }
0x187c   :  { %17234 = vmatprep.subr.bf16.mxu1 %v17233_v35 }
0x1883   :  { %17236 = vmatpush3.bf16.xpose.msra.mxu1 %v17233_v35 }
0x1884   :  { %17238 = vmatprep.subr.bf16.mxu1 %v18849_v47 }
0x188a   :  { %16104 = vmatmul.mubr.f32.vlgmr.msra.gmra.mrb[22].mxu1 %v11245_v30 }
0x188b   :  { %17240 = vmatpush3.bf16.xpose.msra.mxu1 %v18849_v47  ;;  %16114 = vmatprep.mubr.f32.mxu1 %v18834_v2 }
0x188c   :  { %17242 = vmatprep.subr.bf16.mxu1 %v17201_v33 }
0x1893   :  { %17244 = vmatpush3.bf16.xpose.msra.mxu1 %v17201_v33 }
0x189a   :  { %16115 = vmatmul.mubr.f32.vlgmr.msra.gmra.mrb[22].mxu1 %v11245_v30 }
0x1908   :  { %v16050_v21 = vpop.f32.mrb[20].mxu1 }
0x1909   :  { %v11132_v17 = vpop.f32.mrb[21].mxu1 }
0x196d   :  { %v16116_v32 = vpop.f32.mrb[22].mxu1 }
0x196e   :  { %v17513_v34 = vadd.f32 %v16116_v32, %v18574_v7  ;;  %v11684_v4 = vpop.f32.mrb[23].mxu1 }
0x196f   :  { %v17514_v60 = vadd.f32 %v11684_v4, %v18579_v58 }
0x1970   :  { %v11697_v24 = vsel %vm89_vm0, %v17513_v34, -inf }
0x1971   :  { %11698 = vmax.xlane.f32.xlu1 %v11697_v24  ;;  %v11694_v44 = vsel %vm89_vm0, %v17514_v60, -inf }
0x1972   :  { %11695 = vmax.xlane.f32.xlu0 %v11694_v44 }
0x1982   :  { %11722 = vrot.lane.b32.xlu1 %v18541_v13, %s17879_s11 }
0x1986   :  { %11726 = vrot.lane.b32.xlu1 %v18543_v56, %s17879_s11 }
0x198a   :  { %11728 = vrot.lane.b32.xlu1 %v18537_v11, %s17879_s11 }
0x198e   :  { %12272 = vrot.lane.b32.xlu1 %v18771_v40, %s17881_s13 }
0x1992   :  { %12280 = vrot.lane.b32.xlu1 %v16050_v21, %s17882_s14 }
0x19fe   :  { %v11699_v7 = vpop.xlane.xlu1 %11698 }
0x19ff   :  { %v11701_v58 = vsub.f32 %v17513_v34, %v11699_v7  ;;  %v11696_v2 = vpop.xlane.xlu0 %11695 }
0x1a00   :  { %v11700_v18 = vsub.f32 %v17514_v60, %v11696_v2 }
0x1a01   :  { %v11704_v52 = vmul.f32 1.442695, %v11701_v58 }
0x1a02   :  { %v11702_v59 = vmul.f32 1.442695, %v11700_v18  ;;  %v11723_v40 = vpop.permute.xlu1 %11722 }
0x1a03   :  { %v11741_v62 = vand.u32 4294901760, %v11723_v40 }
0x1a04   :  { %17851 = vpow2.f32 %v11702_v59 }
0x1a05   :  { %17853 = vpow2.f32 %v11704_v52  ;;  %v18888_v5 = vsub.f32 %v11723_v40, %v11741_v62  ;;  %v7760_v40 = vld [vmem:[%s19105_s2 + $0x20] sm:$0xff] }
0x1a06   :  { %v11727_v43 = vpop.permute.xlu1 %11726 }
0x1a07   :  { %v11832_v28 = vand.u32 4294901760, %v18888_v5  ;;  %v11747_v48 = vand.u32 4294901760, %v11727_v43 }
0x1a09   :  { %v11833_v33 = vsub.f32 %v18888_v5, %v11832_v28  ;;  %v11845_v36 = vsub.f32 %v11727_v43, %v11747_v48  ;;  %v7761_v43 = vld [vmem:[%s19105_s2 + $0x28] sm:$0xff] }
0x1a0a   :  { %v11729_v26 = vpop.permute.xlu1 %11728 }
0x1a0b   :  { %v11750_v45 = vand.u32 4294901760, %v11729_v26  ;;  %v11834_v29 = vand.u32 4294901760, %v11833_v33  ;;  %v11846_v21 = vand.u32 4294901760, %v11845_v36 }
0x1a0d   :  { %v18898_v8 = vpack.c.bf16 %v11750_v45, %v11747_v48  ;;  %v11852_v20 = vsub.f32 %v11729_v26, %v11750_v45  ;;  %v11847_v24 = vsub.f32 %v11845_v36, %v11846_v21 }
0x1a0e   :  { %v17852_v13 = vpop.eup %17851 }
0x1a0f   :  { %v11706_v47 = vsel %vm89_vm0, %v17852_v13, 0.0  ;;  %v17854_v56 = vpop.eup %17853  ;;  %v11853_v42 = vand.u32 4294901760, %v11852_v20  ;;  %v11848_v52 = vand.u32 4294901760, %v11847_v24 }
0x1a10   :  { %11707 = vadd.xlane.f32.xlu0 %v11706_v47  ;;  %v11709_v11 = vsel %vm89_vm0, %v17854_v56, 0.0  ;;  %v17265_v47 = vpack.c.bf16 %v11852_v20, %v11845_v36 }
0x1a11   :  { %v11854_v34 = vsub.f32 %v11852_v20, %v11853_v42 }
0x1a13   :  { %v11855_v2 = vand.u32 4294901760, %v11854_v34 }
0x1a14   :  { %11710 = vadd.xlane.f32.xlu0 %v11709_v11  ;;  %v17281_v11 = vpack.c.bf16 %v11853_v42, %v11846_v21 }
0x1a15   :  { %v17257_v59 = vpack.c.bf16 %v11855_v2, %v11848_v52 }
0x1a2a   :  { %11724 = vrot.lane.b32.xlu0 %v18535_v10, %s17879_s11 }
0x1a2e   :  { %12270 = vrot.lane.b32.xlu0 %v18773_v41, %s17881_s13 }
0x1a32   :  { %12278 = vrot.lane.b32.xlu0 %v11132_v17, %s17882_s14 }
0x1a9d   :  { %v11708_v49 = vpop.xlane.xlu0 %11707 }
0x1a9e   :  { %17855 = vrcp.f32 %v11708_v49 }
0x1aa1   :  { %v11711_v23 = vpop.xlane.xlu0 %11710 }
0x1aa2   :  { %17857 = vrcp.f32 %v11711_v23 }
0x1aa5   :  { %v11725_v39 = vpop.permute.xlu0 %11724 }
0x1aa6   :  { %v11744_v10 = vand.u32 4294901760, %v11725_v39 }
0x1aa8   :  { %v17856_v55 = vpop.eup %17855  ;;  %v18891_v41 = vpack.c.bf16 %v11744_v10, %v11741_v62  ;;  %v18893_v30 = vsub.f32 %v11725_v39, %v11744_v10  ;;  %v12312_v62 = vand.u32 4294901760, %v7761_v43  ;;  %v7762_v39 = vld [vmem:[%s19105_s2 + $0x30] sm:$0xff] }
0x1aa9   :  { %v11714_v63 = vmul.f32 %v17856_v55, %v11708_v49  ;;  %v12309_v49 = vand.u32 4294901760, %v7760_v40  ;;  %v12315_v45 = vand.u32 4294901760, %v7762_v39  ;;  %v12271_v42 = vpop.permute.xlu0 %12270 }
0x1aaa   :  { %v11839_v25 = vand.u32 4294901760, %v18893_v30  ;;  %17246 = vmatprep.subr.bf16.mxu0 %v18891_v41  ;;  %v12406_v26 = vsub.f32 %v7761_v43, %v12312_v62  ;;  %v18964_v43 = vld [vmem:[%s19104_s3] sm:$0xff] }
0x1aab   :  { %v11716_v14 = vsub.f32 2.0, %v11714_v63  ;;  %17248 = vmatpush3.bf16.msra.mxu0 %v18891_v41  ;;  %v12413_v33 = vsub.f32 %v7762_v39, %v12315_v45 }
0x1aac   :  { %v17858_v54 = vpop.eup %17857  ;;  %v11840_v0 = vsub.f32 %v18893_v30, %v11839_v25  ;;  %17250 = vmatprep.subr.bf16.mxu0 %v18898_v8  ;;  %v12407_v48 = vand.u32 4294901760, %v12406_v26 }
0x1aad   :  { %v11718_v46 = vmul.f32 %v17856_v55, %v11716_v14  ;;  %v11715_v15 = vmul.f32 %v17858_v54, %v11711_v23  ;;  %v18926_v23 = vpack.c.bf16 %v12312_v62, %v12309_v49 }
0x1aae   :  { %v11841_v3 = vand.u32 4294901760, %v11840_v0  ;;  %v12408_v63 = vsub.f32 %v12406_v26, %v12407_v48 }
0x1aaf   :  { %v11720_v1 = vmul.f32 %v17852_v13, %v11718_v46  ;;  %v11717_v12 = vsub.f32 2.0, %v11715_v15  ;;  %17252 = vmatpush3.bf16.msra.mxu0 %v18898_v8  ;;  %v17261_v13 = vpack.c.bf16 %v18893_v30, %v18888_v5  ;;  %v12399_v5 = vsub.f32 %v7760_v40, %v12309_v49 }
0x1ab0   :  { %v17253_v9 = vpack.c.bf16 %v11841_v3, %v11834_v29  ;;  %v12409_v14 = vand.u32 4294901760, %v12408_v63  ;;  %v12300_v40 = vsub.s32 4, %v17971_v50 }
0x1ab1   :  { %v11735_v22 = vsel %vm89_vm0, %v11720_v1, 0  ;;  %v11719_v53 = vmul.f32 %v17858_v54, %v11717_v12  ;;  %v12400_v55 = vand.u32 4294901760, %v12399_v5  ;;  %v12414_v54 = vand.u32 4294901760, %v12413_v33 }
0x1ab2   :  { %v11809_v19 = vand.u32 4294901760, %v11735_v22  ;;  %17254 = vmatprep.subr.bf16.mxu0 %v17253_v9  ;;  %v12301_v49 = vrot.slane %v18964_v43, %v12300_v40 }
0x1ab3   :  { %v11721_v57 = vmul.f32 %v17854_v56, %v11719_v53  ;;  %v17277_v56 = vpack.c.bf16 %v11839_v25, %v11832_v28  ;;  %v7763_v28 = vld [vmem:[%s19105_s2 + $0x38] sm:$0xff]  ;;  %v12401_v30 = vsub.f32 %v12399_v5, %v12400_v55  ;;  %v12415_v3 = vsub.f32 %v12413_v33, %v12414_v54 }
0x1ab4   :  { %v11810_v31 = vsub.f32 %v11735_v22, %v11809_v19  ;;  %v12318_v10 = vand.u32 4294901760, %v7763_v28  ;;  %v17309_v22 = vpack.c.bf16 %v12406_v26, %v12399_v5  ;;  %v17325_v36 = vpack.c.bf16 %v12407_v48, %v12400_v55 }
0x1ab5   :  { %v11738_v35 = vsel %vm89_vm0, %v11721_v57, 0  ;;  %v12402_v25 = vand.u32 4294901760, %v12401_v30  ;;  %v12416_v12 = vand.u32 4294901760, %v12415_v3  ;;  %v12273_v57 = vpop.permute.xlu1 %12272 }
0x1ab6   :  { %v11819_v17 = vand.u32 4294901760, %v11738_v35  ;;  %v11811_v32 = vand.u32 4294901760, %v11810_v31  ;;  %v12293_v21 = vsel %vm1190_vm1, %v18674_v38, %v12273_v57 }
0x1ab7   :  { %v17301_v29 = vpack.c.bf16 %v12409_v14, %v12402_v25 }
0x1ab8   :  { %v11820_v4 = vsub.f32 %v11738_v35, %v11819_v17  ;;  %v11812_v60 = vsub.f32 %v11810_v31, %v11811_v32  ;;  %v12279_v35 = vpop.permute.xlu0 %12278 }
0x1aba   :  { %v11813_v44 = vand.u32 4294901760, %v11812_v60  ;;  %v11821_v7 = vand.u32 4294901760, %v11820_v4 }
0x1abc   :  { %16125 = vmatprep.mubr.f32.mxu0 %v11813_v44  ;;  %v11822_v58 = vsub.f32 %v11820_v4, %v11821_v7 }
0x1abe   :  { %v11823_v18 = vand.u32 4294901760, %v11822_v58 }
0x1ac0   :  { %16126 = vmatmul.mubr.f32.vlgmr.msra.gmra.mrb[22].mxu0 %v11823_v18 }
0x1ac1   :  { %17256 = vmatpush3.bf16.msra.mxu0 %v17253_v9  ;;  %16136 = vmatprep.mubr.f32.mxu0 %v11809_v19 }
0x1ac2   :  { %17258 = vmatprep.subr.bf16.mxu0 %v17257_v59 }
0x1ac5   :  { %17260 = vmatpush3.bf16.msra.mxu0 %v17257_v59 }
0x1ac6   :  { %17262 = vmatprep.subr.bf16.mxu0 %v17261_v13 }
0x1ac8   :  { %16137 = vmatmul.mubr.f32.vlgmr.msra.gmra.mrb[22].mxu0 %v11819_v17 }
0x1ac9   :  { %17264 = vmatpush3.bf16.msra.mxu0 %v17261_v13  ;;  %16147 = vmatprep.mubr.f32.mxu0 %v11810_v31  ;;  %v12281_v31 = vpop.permute.xlu1 %12280 }
0x1aca   :  { %17266 = vmatprep.subr.bf16.mxu0 %v17265_v47 }
0x1acd   :  { %17268 = vmatpush3.bf16.msra.mxu0 %v17265_v47 }
0x1ace   :  { %17270 = vmatprep.subr.bf16.mxu0 %v18891_v41 }
0x1ad0   :  { %16148 = vmatmul.mubr.f32.vlgmr.msra.gmra.mrb[22].mxu0 %v11820_v4 }
0x1ad1   :  { %17272 = vmatpush3.bf16.msra.mxu0 %v18891_v41  ;;  %16158 = vmatprep.mubr.f32.mxu0 %v11811_v32  ;;  %v12292_v32 = vsel %vm1190_vm1, %v18676_v6, %v12271_v42 }
0x1ad2   :  { %17274 = vmatprep.subr.bf16.mxu0 %v18898_v8  ;;  %v12294_v4 = vsel %vm1703_vm6, %v12292_v32, %v12279_v35 }
0x1ad5   :  { %17276 = vmatpush3.bf16.msra.mxu0 %v18898_v8 }
0x1ad6   :  { %17278 = vmatprep.subr.bf16.mxu0 %v17277_v56 }
0x1ad8   :  { %16159 = vmatmul.mubr.f32.vlgmr.msra.gmra.mrb[22].mxu0 %v11821_v7 }
0x1ad9   :  { %17280 = vmatpush3.bf16.msra.mxu0 %v17277_v56  ;;  %16169 = vmatprep.mubr.f32.mxu0 %v11809_v19 }
0x1ada   :  { %17282 = vmatprep.subr.bf16.mxu0 %v17281_v11 }
0x1add   :  { %17284 = vmatpush3.bf16.msra.mxu0 %v17281_v11 }
0x1ade   :  { %17286 = vmatprep.subr.bf16.mxu0 %v18891_v41 }
0x1ae0   :  { %16170 = vmatmul.mubr.f32.vlgmr.msra.gmra.mrb[22].mxu0 %v11819_v17 }
0x1ae1   :  { %17288 = vmatpush3.bf16.msra.mxu0 %v18891_v41  ;;  %16180 = vmatprep.mubr.f32.mxu0 %v11809_v19  ;;  %v18936_v41 = vpack.c.bf16 %v12318_v10, %v12315_v45 }
0x1ae2   :  { %17290 = vmatprep.subr.bf16.mxu0 %v18898_v8 }
0x1ae5   :  { %17292 = vmatpush3.bf16.msra.mxu0 %v18898_v8  ;;  %v12420_v8 = vsub.f32 %v7763_v28, %v12318_v10 }
0x1ae6   :  { %17294 = vmatprep.subr.bf16.mxu0 %v18926_v23 }
0x1ae7   :  { %v12421_v46 = vand.u32 4294901760, %v12420_v8  ;;  %v17313_v53 = vpack.c.bf16 %v12420_v8, %v12413_v33 }
0x1ae8   :  { %16181 = vmatmul.mubr.f32.vlgmr.msra.gmra.mrb[22].mxu0 %v11819_v17  ;;  %v12295_v17 = vsel %vm1703_vm6, %v12293_v21, %v12281_v31 }
0x1ae9   :  { %17296 = vmatpush3.bf16.msra.mxu0 %v18926_v23  ;;  %v12422_v1 = vsub.f32 %v12420_v8, %v12421_v46  ;;  %v17329_v19 = vpack.c.bf16 %v12421_v46, %v12414_v54  ;;  %v12877_v54 = vld [vmem:[%s19102_s1 + $0x48] sm:$0xff] }
0x1aea   :  { %17298 = vmatprep.subr.bf16.mxu0 %v18936_v41 }
0x1aeb   :  { %v12423_v20 = vand.u32 4294901760, %v12422_v1 }
0x1aed   :  { %17300 = vmatpush3.bf16.msra.mxu0 %v18936_v41  ;;  %v17305_v9 = vpack.c.bf16 %v12423_v20, %v12416_v12 }
0x1aee   :  { %17302 = vmatprep.subr.bf16.mxu0 %v17301_v29 }
0x1bbb   :  { %v16182_v0 = vpop.f32.mrb[22].mxu0 }
0x1bbc   :  { %12288 = vrot.lane.b32.xlu1 %v16182_v0, %s17883_s23  ;;  %v12258_v15 = vpop.f32.mrb[23].mxu0  ;;  %v12878_v0 = vld [vmem:[%s19102_s1 + $0x50] sm:$0xff] }
0x1bbd   :  { %12286 = vrot.lane.b32.xlu0 %v12258_v15, %s17883_s23  ;;  %v12894_v15 = vand.u32 4294901760, %v12877_v54  ;;  %v12897_v3 = vand.u32 4294901760, %v12878_v0 }
0x1bbf   :  { %v12995_v42 = vsub.f32 %v12878_v0, %v12897_v3 }
0x1c2e   :  { %v12289_v34 = vpop.permute.xlu1 %12288 }
0x1c2f   :  { %v12297_v60 = vsel %vm5450_vm7, %v12295_v17, %v12289_v34  ;;  %v12287_v24 = vpop.permute.xlu0 %12286  ;;  %v12996_v17 = vand.u32 4294901760, %v12995_v42 }
0x1c30   :  { %v12306_v44 = vsel %vm89_vm0, %v12297_v60, 0  ;;  %v12296_v7 = vsel %vm5450_vm7, %v12294_v4, %v12287_v24 }
0x1c31   :  { %v12387_v58 = vand.u32 4294901760, %v12306_v44  ;;  %v12303_v2 = vsel %vm89_vm0, %v12296_v7, 0  ;;  %v12997_v4 = vsub.f32 %v12995_v42, %v12996_v17 }
0x1c32   :  { %v12377_v18 = vand.u32 4294901760, %v12303_v2 }
0x1c33   :  { %v12388_v38 = vsub.f32 %v12306_v44, %v12387_v58  ;;  %v12998_v24 = vand.u32 4294901760, %v12997_v4 }
0x1c34   :  { %v12378_v52 = vsub.f32 %v12303_v2, %v12377_v18 }
0x1c35   :  { %v12389_v59 = vand.u32 4294901760, %v12388_v38 }
0x1c36   :  { %v12379_v13 = vand.u32 4294901760, %v12378_v52 }
0x1c37   :  { %v12390_v47 = vsub.f32 %v12388_v38, %v12389_v59 }
0x1c38   :  { %v12380_v6 = vsub.f32 %v12378_v52, %v12379_v13 }
0x1c39   :  { %v12391_v11 = vand.u32 4294901760, %v12390_v47 }
0x1c3a   :  { %v12381_v56 = vand.u32 4294901760, %v12380_v6 }
0x1c3c   :  { %16191 = vmatprep.mubr.f32.mxu0 %v12381_v56 }
0x1c3d   :  { %16192 = vmatmul.mubr.f32.vlgmr.msra.gmra.mrb[24].mxu0 %v12391_v11  ;;  %v18996_v11 = vld [vmem:[%s19104_s3 + $0x8] sm:$0xf] }
0x1c3e   :  { %17304 = vmatpush3.bf16.msra.mxu0 %v17301_v29  ;;  %16202 = vmatprep.mubr.f32.mxu0 %v12377_v18  ;;  %v12879_v29 = vld [vmem:[%s19102_s1 + $0x58] sm:$0xff]  ;;  %v12867_v40 = vrot.slane %v18996_v11, %v87_v51 }
0x1c3f   :  { %17306 = vmatprep.subr.bf16.mxu0 %v17305_v9  ;;  %v12900_v1 = vand.u32 4294901760, %v12879_v29 }
0x1c41   :  { %v18987_v20 = vpack.c.bf16 %v12900_v1, %v12897_v3  ;;  %v13002_v31 = vsub.f32 %v12879_v29, %v12900_v1  ;;  %v13422_v29 = vld [vmem:[%s19105_s2 + $0x50] sm:$0xff]  ;;  %v13423_v3 = vld [vmem:[%s19105_s2 + $0x58] sm:$0xff] }
0x1c42   :  { %17308 = vmatpush3.bf16.msra.mxu0 %v17305_v9  ;;  %v13446_v1 = vand.u32 4294901760, %v13422_v29 }
0x1c43   :  { %17310 = vmatprep.subr.bf16.mxu0 %v17309_v22  ;;  %v13003_v32 = vand.u32 4294901760, %v13002_v31  ;;  %v17361_v2 = vpack.c.bf16 %v13002_v31, %v12995_v42 }
0x1c45   :  { %16203 = vmatmul.mubr.f32.vlgmr.msra.gmra.mrb[24].mxu0 %v12387_v58  ;;  %v13004_v60 = vsub.f32 %v13002_v31, %v13003_v32  ;;  %v13426_v31 = vld [vmem:[%s19105_s2 + $0x70] sm:$0xff] }
0x1c46   :  { %17312 = vmatpush3.bf16.msra.mxu0 %v17309_v22  ;;  %16213 = vmatprep.mubr.f32.mxu0 %v12378_v52  ;;  %v12988_v22 = vsub.f32 %v12877_v54, %v12894_v15  ;;  %v13421_v54 = vld [vmem:[%s19105_s2 + $0x48] sm:$0xff] }
0x1c47   :  { %17314 = vmatprep.subr.bf16.mxu0 %v17313_v53  ;;  %v13005_v44 = vand.u32 4294901760, %v13004_v60 }
0x1c49   :  { %v17353_v7 = vpack.c.bf16 %v13005_v44, %v12998_v24  ;;  %v13548_v24 = vsub.f32 %v13422_v29, %v13446_v1 }
0x1c4a   :  { %17316 = vmatpush3.bf16.msra.mxu0 %v17313_v53 }
0x1c4b   :  { %17318 = vmatprep.subr.bf16.mxu0 %v18926_v23 }
0x1c4d   :  { %16214 = vmatmul.mubr.f32.vlgmr.msra.gmra.mrb[24].mxu0 %v12388_v38  ;;  %v17377_v38 = vpack.c.bf16 %v13003_v32, %v12996_v17 }
0x1c4e   :  { %17320 = vmatpush3.bf16.msra.mxu0 %v18926_v23  ;;  %16224 = vmatprep.mubr.f32.mxu0 %v12379_v13 }
0x1c4f   :  { %17322 = vmatprep.subr.bf16.mxu0 %v18936_v41 }
0x1c52   :  { %17324 = vmatpush3.bf16.msra.mxu0 %v18936_v41 }
0x1c53   :  { %17326 = vmatprep.subr.bf16.mxu0 %v17325_v36 }
0x1c55   :  { %16225 = vmatmul.mubr.f32.vlgmr.msra.gmra.mrb[24].mxu0 %v12389_v59 }
0x1c56   :  { %17328 = vmatpush3.bf16.msra.mxu0 %v17325_v36  ;;  %16235 = vmatprep.mubr.f32.mxu0 %v12377_v18  ;;  %v12989_v36 = vand.u32 4294901760, %v12988_v22 }
0x1c57   :  { %17330 = vmatprep.subr.bf16.mxu0 %v17329_v19 }
0x1c58   :  { %v12990_v57 = vsub.f32 %v12988_v22, %v12989_v36 }
0x1c5a   :  { %17332 = vmatpush3.bf16.msra.mxu0 %v17329_v19  ;;  %v12991_v21 = vand.u32 4294901760, %v12990_v57 }
0x1c5b   :  { %17334 = vmatprep.subr.bf16.mxu0 %v18926_v23 }
0x1c5d   :  { %16236 = vmatmul.mubr.f32.vlgmr.msra.gmra.mrb[24].mxu0 %v12387_v58 }
0x1c5e   :  { %17336 = vmatpush3.bf16.msra.mxu0 %v18926_v23  ;;  %16246 = vmatprep.mubr.f32.mxu0 %v12377_v18 }
0x1c5f   :  { %17338 = vmatprep.subr.bf16.mxu0 %v18936_v41 }
0x1c62   :  { %17340 = vmatpush3.bf16.msra.mxu0 %v18936_v41 }
0x1c65   :  { %16247 = vmatmul.mubr.f32.vlgmr.msra.gmra.mrb[24].mxu0 %v12387_v58 }
0x1d38   :  { %v16248_v62 = vpop.f32.mrb[24].mxu0 }
0x1d39   :  { %v17515_v5 = vadd.f32 %v16248_v62, %v12301_v49  ;;  %v12826_v26 = vpop.f32.mrb[25].mxu0  ;;  %v12873_v62 = vrot.slane %v18996_v11, %v6040_v37 }
0x1d3a   :  { %v17516_v39 = vadd.f32 %v12826_v26, %v12301_v49 }
0x1d3b   :  { %v12837_v23 = vadd.f32 %v17515_v5, %v18383_v16 }
0x1d3c   :  { %v12836_v28 = vadd.f32 %v17516_v39, %v18387_v61  ;;  %v12876_v61 = vld [vmem:[%s19102_s1 + $0x40] sm:$0xff] }
0x1d3d   :  { %v12841_v45 = vsel %vm89_vm0, %v12837_v23, 0.0  ;;  %v12891_v46 = vand.u32 4294901760, %v12876_v61 }
0x1d3e   :  { %12842 = vadd.xlane.f32.xlu1 %v12841_v45  ;;  %v12838_v10 = vsel %vm89_vm0, %v12836_v28, 0.0 }
0x1d3f   :  { %12839 = vadd.xlane.f32.xlu0 %v12838_v10  ;;  %v18985_v12 = vpack.c.bf16 %v12894_v15, %v12891_v46  ;;  %v12981_v9 = vsub.f32 %v12876_v61, %v12891_v46  ;;  %v13420_v61 = vld [vmem:[%s19105_s2 + $0x40] sm:$0xff]  ;;  %v13443_v46 = vand.u32 4294901760, %v13421_v54 }
0x1d40   :  { %v13440_v0 = vand.u32 4294901760, %v13420_v61 }
0x1d41   :  { %17342 = vmatprep.subr.bf16.mxu1 %v18985_v12  ;;  %v12982_v53 = vand.u32 4294901760, %v12981_v9  ;;  %v17357_v58 = vpack.c.bf16 %v12988_v22, %v12981_v9  ;;  %v13425_v22 = vld [vmem:[%s19105_s2 + $0x68] sm:$0xff]  ;;  %v13541_v42 = vsub.f32 %v13421_v54, %v13443_v46 }
0x1d42   :  { %17344 = vmatpush3.bf16.msra.mxu1 %v18985_v12  ;;  %v19026_v15 = vpack.c.bf16 %v13443_v46, %v13440_v0  ;;  %v13534_v57 = vsub.f32 %v13420_v61, %v13440_v0 }
0x1d43   :  { %17346 = vmatprep.subr.bf16.mxu1 %v18987_v20  ;;  %v12983_v19 = vsub.f32 %v12981_v9, %v12982_v53  ;;  %v17373_v18 = vpack.c.bf16 %v12989_v36, %v12982_v53  ;;  %v13424_v9 = vld [vmem:[%s19105_s2 + $0x60] sm:$0xff]  ;;  %v13455_v36 = vand.u32 4294901760, %v13425_v22 }
0x1d44   :  { %17390 = vmatprep.subr.bf16.mxu0 %v19026_v15  ;;  %v13452_v53 = vand.u32 4294901760, %v13424_v9  ;;  %v13535_v32 = vand.u32 4294901760, %v13534_v57 }
0x1d45   :  { %v12984_v35 = vand.u32 4294901760, %v12983_v19  ;;  %17392 = vmatpush3.bf16.msra.mxu0 %v19026_v15 }
0x1d46   :  { %17348 = vmatpush3.bf16.msra.mxu1 %v18987_v20  ;;  %v19046_v19 = vpack.c.bf16 %v13455_v36, %v13452_v53  ;;  %v13536_v60 = vsub.f32 %v13534_v57, %v13535_v32 }
0x1d47   :  { %v17349_v34 = vpack.c.bf16 %v12991_v21, %v12984_v35  ;;  %v13427_v35 = vld [vmem:[%s19105_s2 + $0x78] sm:$0xff]  ;;  %v13458_v21 = vand.u32 4294901760, %v13426_v31 }
0x1d48   :  { %v13461_v17 = vand.u32 4294901760, %v13427_v35 }
0x1d49   :  { %17350 = vmatprep.subr.bf16.mxu1 %v17349_v34 }
0x1d4a   :  { %v19056_v4 = vpack.c.bf16 %v13461_v17, %v13458_v21 }
0x1dcb   :  { %v12843_v55 = vpop.xlane.xlu1 %12842 }
0x1dcc   :  { %v12845_v48 = vmul.f32 0.03125, %v12843_v55  ;;  %v12840_v41 = vpop.xlane.xlu0 %12839 }
0x1dcd   :  { %v12844_v30 = vmul.f32 0.03125, %v12840_v41 }
0x1dce   :  { %v12847_v63 = vsub.f32 %v12837_v23, %v12845_v48 }
0x1dcf   :  { %v12846_v33 = vsub.f32 %v12836_v28, %v12844_v30 }
0x1dd0   :  { %v12849_v14 = vmul.f32 %v12847_v63, %v12847_v63 }
0x1dd1   :  { %v12848_v8 = vmul.f32 %v12846_v33, %v12846_v33 }
0x1dd2   :  { %v12853_v16 = vsel %vm89_vm0, %v12849_v14, 0.0 }
0x1dd3   :  { %v12850_v25 = vsel %vm89_vm0, %v12848_v8, 0.0 }
0x1dd4   :  { %12851 = vadd.xlane.f32.xlu0 %v12850_v25 }
0x1dd8   :  { %12854 = vadd.xlane.f32.xlu0 %v12853_v16 }
0x1e61   :  { %v12852_v52 = vpop.xlane.xlu0 %12851 }
0x1e62   :  { %v12856_v59 = vmul.f32 0.03125, %v12852_v52 }
0x1e64   :  { %v12858_v13 = vadd.f32 1e-05, %v12856_v59 }
0x1e65   :  { %v12855_v47 = vpop.xlane.xlu0 %12854 }
0x1e66   :  { %17859 = vrsqrt.f32 %v12858_v13  ;;  %v12857_v6 = vmul.f32 0.03125, %v12855_v47  ;;  %v13562_v13 = vsub.f32 %v13424_v9, %v13452_v53  ;;  %v13569_v47 = vsub.f32 %v13425_v22, %v13455_v36 }
0x1e68   :  { %v12859_v56 = vadd.f32 1e-05, %v12857_v6  ;;  %v17429_v61 = vpack.c.bf16 %v13569_v47, %v13562_v13 }
0x1e6a   :  { %17861 = vrsqrt.f32 %v12859_v56 }
0x1e70   :  { %v17860_v49 = vpop.eup %17859 }
0x1e71   :  { %v12862_v5 = vmul.f32 %v17860_v49, %v12846_v33  ;;  %v13563_v49 = vand.u32 4294901760, %v13562_v13 }
0x1e73   :  { %v12868_v26 = vmul.f32 %v12867_v40, %v12862_v5 }
0x1e74   :  { %v17862_v39 = vpop.eup %17861 }
0x1e75   :  { %v12863_v23 = vmul.f32 %v17862_v39, %v12847_v63  ;;  %v19004_v28 = vadd.f32 %v12873_v62, %v12868_v26  ;;  %v13564_v26 = vsub.f32 %v13562_v13, %v13563_v49 }
0x1e77   :  { %v12869_v45 = vmul.f32 %v12867_v40, %v12863_v23  ;;  %v12885_v10 = vsel %vm89_vm0, %v19004_v28, 0  ;;  %v13576_v23 = vsub.f32 %v13426_v31, %v13458_v21 }
0x1e78   :  { %v12959_v55 = vand.u32 4294901760, %v12885_v10 }
0x1e79   :  { %v19008_v48 = vadd.f32 %v12873_v62, %v12869_v45  ;;  %v13570_v62 = vand.u32 4294901760, %v13569_v47  ;;  %v13583_v45 = vsub.f32 %v13427_v35, %v13461_v17 }
0x1e7a   :  { %v12960_v41 = vsub.f32 %v12885_v10, %v12959_v55  ;;  %v13565_v10 = vand.u32 4294901760, %v13564_v26 }
0x1e7b   :  { %v12888_v51 = vsel %vm89_vm0, %v19008_v48, 0  ;;  %v13571_v39 = vsub.f32 %v13569_v47, %v13570_v62  ;;  %v17433_v54 = vpack.c.bf16 %v13583_v45, %v13576_v23  ;;  %v17461_v29 = vpack.c.bf16 %v13570_v62, %v13563_v49 }
0x1e7c   :  { %v12961_v30 = vand.u32 4294901760, %v12960_v41  ;;  %v12969_v8 = vand.u32 4294901760, %v12888_v51 }
0x1e7e   :  { %v12962_v37 = vsub.f32 %v12960_v41, %v12961_v30  ;;  %v12970_v33 = vsub.f32 %v12888_v51, %v12969_v8  ;;  %v13584_v51 = vand.u32 4294901760, %v13583_v45 }
0x1e80   :  { %v12963_v25 = vand.u32 4294901760, %v12962_v37  ;;  %v12971_v14 = vand.u32 4294901760, %v12970_v33  ;;  %v13585_v37 = vsub.f32 %v13583_v45, %v13584_v51 }
0x1e82   :  { %16257 = vmatprep.mubr.f32.mxu1 %v12963_v25  ;;  %v12972_v63 = vsub.f32 %v12970_v33, %v12971_v14  ;;  %v13586_v25 = vand.u32 4294901760, %v13585_v37  ;;  %v14056_v37 = vrot.slane %v18996_v11, %v5455_v27 }
0x1e84   :  { %v12973_v16 = vand.u32 4294901760, %v12972_v63  ;;  %v17421_v63 = vpack.c.bf16 %v13541_v42, %v13534_v57 }
0x1e86   :  { %16258 = vmatmul.mubr.f32.vlgmr.msra.gmra.mrb[24].mxu1 %v12973_v16 }
0x1e87   :  { %17352 = vmatpush3.bf16.msra.mxu1 %v17349_v34  ;;  %16268 = vmatprep.mubr.f32.mxu1 %v12959_v55  ;;  %v13542_v34 = vand.u32 4294901760, %v13541_v42 }
0x1e88   :  { %17354 = vmatprep.subr.bf16.mxu1 %v17353_v7 }
0x1e89   :  { %v17453_v0 = vpack.c.bf16 %v13542_v34, %v13535_v32 }
0x1e8b   :  { %17356 = vmatpush3.bf16.msra.mxu1 %v17353_v7  ;;  %v13543_v7 = vsub.f32 %v13541_v42, %v13542_v34 }
0x1e8c   :  { %17358 = vmatprep.subr.bf16.mxu1 %v17357_v58 }
0x1e8e   :  { %16269 = vmatmul.mubr.f32.vlgmr.msra.gmra.mrb[24].mxu1 %v12969_v8 }
0x1e8f   :  { %17360 = vmatpush3.bf16.msra.mxu1 %v17357_v58  ;;  %16279 = vmatprep.mubr.f32.mxu1 %v12960_v41  ;;  %v13537_v58 = vand.u32 4294901760, %v13536_v60  ;;  %v13577_v41 = vand.u32 4294901760, %v13576_v23 }
0x1e90   :  { %17362 = vmatprep.subr.bf16.mxu1 %v17361_v2 }
0x1e93   :  { %17364 = vmatpush3.bf16.msra.mxu1 %v17361_v2  ;;  %v13549_v2 = vand.u32 4294901760, %v13548_v24 }
0x1e94   :  { %17366 = vmatprep.subr.bf16.mxu1 %v18985_v12 }
0x1e95   :  { %v13550_v52 = vsub.f32 %v13548_v24, %v13549_v2 }
0x1e96   :  { %16280 = vmatmul.mubr.f32.vlgmr.msra.gmra.mrb[24].mxu1 %v12970_v33 }
0x1e97   :  { %17368 = vmatpush3.bf16.msra.mxu1 %v18985_v12  ;;  %16290 = vmatprep.mubr.f32.mxu1 %v12961_v30  ;;  %v13551_v56 = vand.u32 4294901760, %v13550_v52 }
0x1e98   :  { %17370 = vmatprep.subr.bf16.mxu1 %v18987_v20 }
0x1e9b   :  { %17372 = vmatpush3.bf16.msra.mxu1 %v18987_v20 }
0x1e9c   :  { %17374 = vmatprep.subr.bf16.mxu1 %v17373_v18 }
0x1e9e   :  { %16291 = vmatmul.mubr.f32.vlgmr.msra.gmra.mrb[24].mxu1 %v12971_v14 }
0x1e9f   :  { %17376 = vmatpush3.bf16.msra.mxu1 %v17373_v18  ;;  %16301 = vmatprep.mubr.f32.mxu1 %v12959_v55 }
0x1ea0   :  { %17378 = vmatprep.subr.bf16.mxu1 %v17377_v38 }
0x1ea3   :  { %17380 = vmatpush3.bf16.msra.mxu1 %v17377_v38  ;;  %v13544_v38 = vand.u32 4294901760, %v13543_v7 }
0x1ea4   :  { %17382 = vmatprep.subr.bf16.mxu1 %v18985_v12 }
0x1ea5   :  { %v17405_v6 = vpack.c.bf16 %v13544_v38, %v13537_v58 }
0x1ea6   :  { %16302 = vmatmul.mubr.f32.vlgmr.msra.gmra.mrb[24].mxu1 %v12969_v8 }
0x1ea7   :  { %17384 = vmatpush3.bf16.msra.mxu1 %v18985_v12  ;;  %16312 = vmatprep.mubr.f32.mxu1 %v12959_v55  ;;  %v13449_v12 = vand.u32 4294901760, %v13423_v3  ;;  %v13572_v55 = vand.u32 4294901760, %v13571_v39 }
0x1ea8   :  { %17386 = vmatprep.subr.bf16.mxu1 %v18987_v20 }
0x1ea9   :  { %v13555_v44 = vsub.f32 %v13423_v3, %v13449_v12  ;;  %v17413_v30 = vpack.c.bf16 %v13572_v55, %v13565_v10  ;;  %v17465_v3 = vpack.c.bf16 %v13584_v51, %v13577_v41 }
0x1eab   :  { %17388 = vmatpush3.bf16.msra.mxu1 %v18987_v20  ;;  %v19036_v20 = vpack.c.bf16 %v13449_v12, %v13446_v1  ;;  %v13556_v18 = vand.u32 4294901760, %v13555_v44  ;;  %v17425_v16 = vpack.c.bf16 %v13555_v44, %v13548_v24  ;;  %v12882_v1 = vsub.s32 2, %v17971_v50 }
0x1ead   :  { %17394 = vmatprep.subr.bf16.mxu0 %v19036_v20  ;;  %v13557_v59 = vsub.f32 %v13555_v44, %v13556_v18  ;;  %v17457_v46 = vpack.c.bf16 %v13556_v18, %v13549_v2  ;;  %v12883_v12 = vrot.slane %v18964_v43, %v12882_v1  ;;  %v13430_v18 = vsub.s32 5, %v17971_v50 }
0x1eae   :  { %16313 = vmatmul.mubr.f32.vlgmr.msra.gmra.mrb[24].mxu1 %v12969_v8  ;;  %17396 = vmatpush3.bf16.msra.mxu0 %v19036_v20  ;;  %v13578_v8 = vsub.f32 %v13576_v23, %v13577_v41  ;;  %v14050_v51 = vrot.slane %v18996_v11, %v12882_v1 }
0x1eaf   :  { %17398 = vmatprep.subr.bf16.mxu0 %v19046_v19  ;;  %v13558_v40 = vand.u32 4294901760, %v13557_v59  ;;  %v13431_v38 = vrot.slane %v18964_v43, %v13430_v18 }
0x1eb0   :  { %v13579_v33 = vand.u32 4294901760, %v13578_v8 }
0x1eb1   :  { %v17409_v5 = vpack.c.bf16 %v13558_v40, %v13551_v56 }
0x1eb2   :  { %17400 = vmatpush3.bf16.msra.mxu0 %v19046_v19  ;;  %v17417_v14 = vpack.c.bf16 %v13586_v25, %v13579_v33 }
0x1eb3   :  { %17402 = vmatprep.subr.bf16.mxu0 %v19056_v4 }
0x1eb6   :  { %17404 = vmatpush3.bf16.msra.mxu0 %v19056_v4 }
0x1eb7   :  { %17406 = vmatprep.subr.bf16.mxu0 %v17405_v6 }
0x1f81   :  { %v16314_v9 = vpop.f32.mrb[24].mxu1 }
0x1f82   :  { %v17517_v22 = vadd.f32 %v16314_v9, %v12883_v12  ;;  %v13408_v53 = vpop.f32.mrb[25].mxu1 }
0x1f83   :  { %v17518_v36 = vadd.f32 %v13408_v53, %v12883_v12 }
0x1f84   :  { %v13419_v31 = vmax.f32 %v17517_v22, 0.0 }
0x1f85   :  { %v13418_v57 = vmax.f32 %v17518_v36, 0.0 }
0x1f86   :  { %v13437_v42 = vsel %vm13432_vm11, %v13419_v31, 0 }
0x1f87   :  { %v13522_v35 = vand.u32 4294901760, %v13437_v42  ;;  %v13434_v21 = vsel %vm13432_vm11, %v13418_v57, 0 }
0x1f88   :  { %v13512_v17 = vand.u32 4294901760, %v13434_v21 }
0x1f89   :  { %v13523_v32 = vsub.f32 %v13437_v42, %v13522_v35 }
0x1f8a   :  { %v13513_v34 = vsub.f32 %v13434_v21, %v13512_v17 }
0x1f8b   :  { %v13524_v60 = vand.u32 4294901760, %v13523_v32 }
0x1f8c   :  { %v13514_v24 = vand.u32 4294901760, %v13513_v34 }
0x1f8d   :  { %v13525_v44 = vsub.f32 %v13523_v32, %v13524_v60 }
0x1f8e   :  { %v13515_v7 = vsub.f32 %v13513_v34, %v13514_v24 }
0x1f8f   :  { %v13526_v2 = vand.u32 4294901760, %v13525_v44 }
0x1f90   :  { %v13516_v58 = vand.u32 4294901760, %v13515_v7 }
0x1f92   :  { %16331 = vmatprep.mubr.f32.mxu0 %v13516_v58 }
0x1f93   :  { %16332 = vmatmul.mubr.f32.vlgmr.msra.gmra.mrb[26].mxu0 %v13526_v2 }
0x1f94   :  { %17408 = vmatpush3.bf16.msra.mxu0 %v17405_v6  ;;  %16350 = vmatprep.mubr.f32.mxu0 %v13512_v17 }
0x1f95   :  { %17410 = vmatprep.subr.bf16.mxu0 %v17409_v5 }
0x1f98   :  { %17412 = vmatpush3.bf16.msra.mxu0 %v17409_v5 }
0x1f99   :  { %17414 = vmatprep.subr.bf16.mxu0 %v17413_v30 }
0x1f9c   :  { %17416 = vmatpush3.bf16.msra.mxu0 %v17413_v30 }
0x1f9d   :  { %17418 = vmatprep.subr.bf16.mxu0 %v17417_v14 }
0x1fa0   :  { %17420 = vmatpush3.bf16.msra.mxu0 %v17417_v14 }
0x1fa1   :  { %17422 = vmatprep.subr.bf16.mxu0 %v17421_v63 }
0x1fa3   :  { %16351 = vmatmul.mubr.f32.vlgmr.msra.gmra.mrb[26].mxu0 %v13522_v35 }
0x1fa4   :  { %17424 = vmatpush3.bf16.msra.mxu0 %v17421_v63  ;;  %16369 = vmatprep.mubr.f32.mxu0 %v13513_v34 }
0x1fa5   :  { %17426 = vmatprep.subr.bf16.mxu0 %v17425_v16 }
0x1fa8   :  { %17428 = vmatpush3.bf16.msra.mxu0 %v17425_v16 }
0x1fa9   :  { %17430 = vmatprep.subr.bf16.mxu0 %v17429_v61 }
0x1fac   :  { %17432 = vmatpush3.bf16.msra.mxu0 %v17429_v61 }
0x1fad   :  { %17434 = vmatprep.subr.bf16.mxu0 %v17433_v54 }
0x1fb0   :  { %17436 = vmatpush3.bf16.msra.mxu0 %v17433_v54 }
0x1fb1   :  { %17438 = vmatprep.subr.bf16.mxu0 %v19026_v15 }
0x1fb3   :  { %16370 = vmatmul.mubr.f32.vlgmr.msra.gmra.mrb[26].mxu0 %v13523_v32 }
0x1fb4   :  { %17440 = vmatpush3.bf16.msra.mxu0 %v19026_v15  ;;  %16388 = vmatprep.mubr.f32.mxu0 %v13514_v24 }
0x1fb5   :  { %17442 = vmatprep.subr.bf16.mxu0 %v19036_v20 }
0x1fb8   :  { %17444 = vmatpush3.bf16.msra.mxu0 %v19036_v20 }
0x1fb9   :  { %17446 = vmatprep.subr.bf16.mxu0 %v19046_v19 }
0x1fbc   :  { %17448 = vmatpush3.bf16.msra.mxu0 %v19046_v19 }
0x1fbd   :  { %17450 = vmatprep.subr.bf16.mxu0 %v19056_v4 }
0x1fc0   :  { %17452 = vmatpush3.bf16.msra.mxu0 %v19056_v4 }
0x1fc1   :  { %17454 = vmatprep.subr.bf16.mxu0 %v17453_v0 }
0x1fc3   :  { %16389 = vmatmul.mubr.f32.vlgmr.msra.gmra.mrb[26].mxu0 %v13524_v60 }
0x1fc4   :  { %17456 = vmatpush3.bf16.msra.mxu0 %v17453_v0  ;;  %16407 = vmatprep.mubr.f32.mxu0 %v13512_v17 }
0x1fc5   :  { %17458 = vmatprep.subr.bf16.mxu0 %v17457_v46 }
0x1fc8   :  { %17460 = vmatpush3.bf16.msra.mxu0 %v17457_v46 }
0x1fc9   :  { %17462 = vmatprep.subr.bf16.mxu0 %v17461_v29 }
0x1fcc   :  { %17464 = vmatpush3.bf16.msra.mxu0 %v17461_v29 }
0x1fcd   :  { %17466 = vmatprep.subr.bf16.mxu0 %v17465_v3 }
0x1fd0   :  { %17468 = vmatpush3.bf16.msra.mxu0 %v17465_v3 }
0x1fd1   :  { %17470 = vmatprep.subr.bf16.mxu0 %v19026_v15 }
0x1fd3   :  { %16408 = vmatmul.mubr.f32.vlgmr.msra.gmra.mrb[26].mxu0 %v13522_v35 }
0x1fd4   :  { %17472 = vmatpush3.bf16.msra.mxu0 %v19026_v15  ;;  %16426 = vmatprep.mubr.f32.mxu0 %v13512_v17 }
0x1fd5   :  { %17474 = vmatprep.subr.bf16.mxu0 %v19036_v20 }
0x1fd8   :  { %17476 = vmatpush3.bf16.msra.mxu0 %v19036_v20 }
0x1fd9   :  { %17478 = vmatprep.subr.bf16.mxu0 %v19046_v19 }
0x1fdc   :  { %17480 = vmatpush3.bf16.msra.mxu0 %v19046_v19 }
0x1fdd   :  { %17482 = vmatprep.subr.bf16.mxu0 %v19056_v4 }
0x1fe0   :  { %17484 = vmatpush3.bf16.msra.mxu0 %v19056_v4 }
0x1fe3   :  { %16427 = vmatmul.mubr.f32.vlgmr.msra.gmra.mrb[26].mxu0 %v13522_v35 }
0x20b6   :  { %v16428_v52 = vpop.f32.mrb[26].mxu0 }
0x20b7   :  { %v17519_v15 = vadd.f32 %v16428_v52, %v13431_v38  ;;  %v14009_v59 = vpop.f32.mrb[27].mxu0 }
0x20b8   :  { %v17520_v13 = vadd.f32 %v14009_v59, %v13431_v38 }
0x20b9   :  { %v14020_v47 = vadd.f32 %v17519_v15, %v19008_v48 }
0x20ba   :  { %v14019_v20 = vadd.f32 %v17520_v13, %v19004_v28 }
0x20bb   :  { %v14024_v6 = vsel %vm89_vm0, %v14020_v47, 0.0 }
0x20bc   :  { %14025 = vadd.xlane.f32.xlu0 %v14024_v6  ;;  %v14021_v19 = vsel %vm89_vm0, %v14019_v20, 0.0 }
0x20bd   :  { %14022 = vadd.xlane.f32.xlu1 %v14021_v19 }
0x2149   :  { %v14026_v4 = vpop.xlane.xlu0 %14025 }
0x214a   :  { %v14028_v56 = vmul.f32 0.03125, %v14026_v4  ;;  %v14023_v40 = vpop.xlane.xlu1 %14022 }
0x214b   :  { %v14027_v49 = vmul.f32 0.03125, %v14023_v40 }
0x214c   :  { %v14030_v62 = vsub.f32 %v14020_v47, %v14028_v56 }
0x214d   :  { %v14029_v43 = vsub.f32 %v14019_v20, %v14027_v49 }
0x214e   :  { %v14032_v5 = vmul.f32 %v14030_v62, %v14030_v62 }
0x214f   :  { %v14031_v26 = vmul.f32 %v14029_v43, %v14029_v43 }
0x2150   :  { %v14036_v39 = vsel %vm89_vm0, %v14032_v5, 0.0 }
0x2151   :  { %14037 = vadd.xlane.f32.xlu0 %v14036_v39  ;;  %v14033_v48 = vsel %vm89_vm0, %v14031_v26, 0.0 }
0x2152   :  { %14034 = vadd.xlane.f32.xlu1 %v14033_v48 }
0x21de   :  { %v14038_v28 = vpop.xlane.xlu0 %14037 }
0x21df   :  { %v14040_v23 = vmul.f32 0.03125, %v14038_v28  ;;  %v14035_v45 = vpop.xlane.xlu1 %14034 }
0x21e0   :  { %v14039_v10 = vmul.f32 0.03125, %v14035_v45 }
0x21e1   :  { %v14042_v55 = vadd.f32 1e-05, %v14040_v23 }
0x21e2   :  { %v14041_v41 = vadd.f32 1e-05, %v14039_v10 }
0x21e3   :  { %17863 = vrsqrt.f32 %v14042_v55 }
0x21e4   :  { %17865 = vrsqrt.f32 %v14041_v41 }
0x21ed   :  { %v17864_v30 = vpop.eup %17863 }
0x21ee   :  { %v17866_v8 = vpop.eup %17865  ;;  %v14046_v33 = vmul.f32 %v17864_v30, %v14030_v62 }
0x21ef   :  { %v14045_v25 = vmul.f32 %v17866_v8, %v14029_v43 }
0x21f0   :  { %v14052_v14 = vmul.f32 %v14050_v51, %v14046_v33 }
0x21f1   :  { %v14051_v63 = vmul.f32 %v14050_v51, %v14045_v25 }
0x21f2   :  { %v14058_v16 = vadd.f32 %v14056_v37, %v14052_v14 }
0x21f3   :  { %v14057_v61 = vadd.f32 %v14056_v37, %v14051_v63 }
0x21f4   :  { %14060 = vst.msk [vmem:[%s19106_s4 + $0x8] sm:$0xff] %vm89_vm0, %v14058_v16 }
0x21f5   :  { %14059 = vst.msk [vmem:[%s19106_s4] sm:$0xff] %vm89_vm0, %v14057_v61 }

</bundles_post_ra>
